<compile_context>
chip_gen: v6e
topology: v6e:2x2x1
jax: 0.10.0
libtpu: 0.0.40
codegen_flags: <defaults>
</compile_context>

<pallas_src>
import functools

import jax
import jax.numpy as jnp
from jax import lax
from jax.experimental import pallas as pl
from jax.experimental.pallas import tpu as pltpu

LN_EPS = 1e-5
BN_EPS = 1e-5


def _dot(a, b):
    # default precision -> single-pass bf16 MXU with f32 accumulation
    return jnp.dot(a, b, preferred_element_type=jnp.float32)


def _pick_hw_tile(hw, batch):
    """Largest lane-aligned token tile; keep >=2 total grid steps if possible."""
    cands = [c for c in (1024, 512, 256, 128) if hw % c == 0]
    for c in cands:
        if batch * (hw // c) >= 2:
            return c
    return cands[0] if cands else hw


# --------------------------------------------------------------------------
# Kernel 1: everything that is pointwise over spatial locations.
#   Activations are channel-major (C, T) tiles; all channel mixing is a
#   (D_out, D_in) @ (D_in, T) MXU matmul with the token dim on the lanes.
# --------------------------------------------------------------------------
def mfm_token_kernel(t_ref, s_ref, wf_ref, wgv_ref, w1h_ref, w1v_ref,
                     w2_ref, wo1_ref, wo2_ref, b4_ref, cvec_ref, out_ref):
    f32 = jnp.float32
    t = t_ref[...].astype(f32)                      # (C, T)
    s = s_ref[...].astype(f32)                      # (C, T)
    C = t.shape[0]

    # packed per-channel columns: [fuse_b, b2_h+b2_v, bn_scale, bn_shift, o1_b, o2_b]
    b_fuse = cvec_ref[:, 0:1]
    b_ffn2 = cvec_ref[:, 1:2]
    bn_scl = cvec_ref[:, 2:3]
    bn_sft = cvec_ref[:, 3:4]
    b_o1 = cvec_ref[:, 4:5]
    b_o2 = cvec_ref[:, 5:6]

    # fuse_conv (1x1) on the stacked [t; s] slab: (C, 2C) @ (2C, T)
    fused = _dot(wf_ref[...], jnp.concatenate([t, s], axis=0)) + b_fuse

    # shared LayerNorm statistics over channels (affine folded into wgv / bgv)
    inv_c = 1.0 / C
    mu = jnp.sum(fused, axis=0, keepdims=True) * inv_c
    xc = fused - mu
    var = jnp.sum(xc * xc, axis=0, keepdims=True) * inv_c
    z = xc * lax.rsqrt(var + LN_EPS)

    # both branches' gate + value projections as ONE (4C, C) @ (C, T) matmul
    gv = _dot(wgv_ref[...], z) + b4_ref[:, 0:1]
    y_h = jax.nn.sigmoid(gv[0:C]) * gv[C:2 * C] + fused
    y_v = jax.nn.sigmoid(gv[2 * C:3 * C]) * gv[3 * C:4 * C] + fused

    # FFN: per-branch first layer, fused second layer (sums both branches)
    hid_h = jax.nn.gelu(_dot(w1h_ref[...], y_h) + b4_ref[:, 1:2], approximate=True)
    hid_v = jax.nn.gelu(_dot(w1v_ref[...], y_v) + b4_ref[:, 2:3], approximate=True)
    out_hv = _dot(w2_ref[...], jnp.concatenate([hid_h, hid_v], axis=0)) + b_ffn2

    o = out_hv + t                                  # + t_feat residual
    o = o * bn_scl + bn_sft                         # folded eval-mode BatchNorm
    o = jnp.maximum(_dot(wo1_ref[...], o) + b_o1, 0.0)   # out_conv[0] + ReLU
    o = _dot(wo2_ref[...], o) + b_o2                      # out_conv[2]
    out_ref[...] = o.astype(out_ref.dtype)


# --------------------------------------------------------------------------
# Kernel 2: 3x3 'SAME' cost_conv, one image per grid step, single im2col
#           matmul (49, 9C) @ (9C, H*W).
# --------------------------------------------------------------------------
def cost_conv_kernel(x_ref, w_ref, b_ref, m_ref, out_ref, *, width):
    f32 = jnp.float32
    x = x_ref[...].astype(f32)                      # (C, H*W) channel-major flat
    C, HW = x.shape

    # zero-extend the flat image on both ends of the lane axis: any source row
    # outside the image then reads zeros automatically.
    zpad = jnp.zeros((C, width + 1), f32)
    fp = jnp.concatenate([zpad, x, zpad], axis=1)   # (C, HW + 2W + 2)

    m_left = m_ref[0:1, :]                          # 1.0 where column x-1 valid
    m_right = m_ref[1:2, :]                         # 1.0 where column x+1 valid

    slabs = []
    for dy in range(3):
        for dx in range(3):
            # source flat index = i + (dy-1)*W + (dx-1)  ->  offset dy*W+dx in fp
            off = dy * width + dx
            slab = fp[:, off:off + HW]
            if dx == 0:
                slab = slab * m_left
            elif dx == 2:
                slab = slab * m_right
            slabs.append(slab)
    patches = jnp.concatenate(slabs, axis=0)        # (9C, HW) im2col slab

    acc = _dot(w_ref[...], patches) + b_ref[...]    # (49, HW), bias added once
    out_ref[...] = acc.astype(out_ref.dtype)


# --------------------------------------------------------------------------
# Wrapper
# --------------------------------------------------------------------------
def _fold_ln_into_linear(w, bias, g, b):
    # y = W @ (g*z + b) + bias  ==  (W*g) @ z + (W @ b + bias)
    w_f = w * g[None, :]
    b_f = jnp.dot(w, b, precision=lax.Precision.HIGHEST) + bias
    return w_f, b_f


def mfm_double_gated_mlp(t_feat, s_feat, params):
    B, C, H, W = t_feat.shape
    Kc = params['cost_w'].shape[0]
    HW = H * W
    dt = t_feat.dtype
    f32 = jnp.float32

    # free reshapes: NCHW -> (B, C, H*W); channels on sublanes, tokens on lanes
    t3 = t_feat.reshape(B, C, HW)
    s3 = s_feat.reshape(B, C, HW)

    # ---- fold LayerNorm affine into gate/value projections, stack branches
    def branch(p):
        wg, bg = _fold_ln_into_linear(p['wg'], p['bg'], p['ln_g'], p['ln_b'])
        wv, bv = _fold_ln_into_linear(p['wv'], p['bv'], p['ln_g'], p['ln_b'])
        return wg, bg, wv, bv

    hg, hbg, hv, hbv = branch(params['h'])
    vg, vbg, vv, vbv = branch(params['v'])
    wgv = jnp.concatenate([hg, hv, vg, vv], axis=0).astype(f32)      # (4C, C)
    bgv = jnp.concatenate([hbg, hbv, vbg, vbv], axis=0)              # (4C,)

    w1h = params['h']['w1'].astype(f32)                              # (4C, C)
    w1v = params['v']['w1'].astype(f32)
    w2c = jnp.concatenate([params['h']['w2'], params['v']['w2']],
                          axis=1).astype(f32)                        # (C, 8C)
    wf = params['fuse_w'].astype(f32)                                # (C, 2C)
    wo1 = params['o1_w'].astype(f32)
    wo2 = params['o2_w'].astype(f32)

    bn_scale = params['bn_g'] * lax.rsqrt(params['bn_rv'] + BN_EPS)
    bn_shift = params['bn_b'] - params['bn_rm'] * bn_scale

    bias4c = jnp.stack([bgv, params['h']['b1'], params['v']['b1']],
                       axis=1).astype(f32)                           # (4C, 3)
    cvec = jnp.stack([params['fuse_b'],
                      params['h']['b2'] + params['v']['b2'],
                      bn_scale, bn_shift,
                      params['o1_b'], params['o2_b']],
                     axis=1).astype(f32)                             # (C, 6)

    weight_args = (wf, wgv, w1h, w1v, w2c, wo1, wo2, bias4c, cvec)

    ts = _pick_hw_tile(HW, B)
    act_spec = pl.BlockSpec((None, C, ts), lambda b, j: (b, 0, j))

    def wspec(a):
        nd = a.ndim
        return pl.BlockSpec(a.shape, lambda b, j, _n=nd: (0,) * _n)

    N = B * HW
    cost_est = pl.CostEstimate(
        flops=int(48 * C * C * N),
        transcendentals=int(13 * C * N),
        bytes_accessed=int(3 * N * C * dt.itemsize
                           + sum(int(w.size) * 4 for w in weight_args)))

    fused_tok = pl.pallas_call(
        mfm_token_kernel,
        out_shape=jax.ShapeDtypeStruct((B, C, HW), dt),
        grid_spec=pltpu.PrefetchScalarGridSpec(
            num_scalar_prefetch=0,
            grid=(B, HW // ts),
            in_specs=[act_spec, act_spec] + [wspec(w) for w in weight_args],
            out_specs=act_spec),
        compiler_params=pltpu.CompilerParams(
            dimension_semantics=("parallel", "parallel")),
        cost_estimate=cost_est,
    )(t3, s3, *weight_args)

    # ---- cost_conv: 3x3, padding=1, single matmul per image ----
    # weight (Kc, C, 3, 3) -> (Kc, 9C), tap-major (tap = 3*dy + dx), channel-minor
    cw = jnp.transpose(params['cost_w'], (0, 2, 3, 1)).reshape(Kc, 9 * C).astype(f32)
    cb = params['cost_b'].astype(f32)[:, None]                       # (Kc, 1)
    xpos = jnp.arange(HW, dtype=jnp.int32) % W
    col_mask = jnp.stack([(xpos >= 1), (xpos <= W - 2)], axis=0).astype(f32)  # (2, HW)

    cost_tok = pl.pallas_call(
        functools.partial(cost_conv_kernel, width=W),
        out_shape=jax.ShapeDtypeStruct((B, Kc, HW), dt),
        grid_spec=pltpu.PrefetchScalarGridSpec(
            num_scalar_prefetch=0,
            grid=(B,),
            in_specs=[pl.BlockSpec((None, C, HW), lambda b: (b, 0, 0)),
                      pl.BlockSpec((Kc, 9 * C), lambda b: (0, 0)),
                      pl.BlockSpec((Kc, 1), lambda b: (0, 0)),
                      pl.BlockSpec((2, HW), lambda b: (0, 0))],
            out_specs=pl.BlockSpec((None, Kc, HW), lambda b: (b, 0, 0))),
        compiler_params=pltpu.CompilerParams(dimension_semantics=("parallel",)),
    )(fused_tok, cw, cb, col_mask)

    fused_feat = fused_tok.reshape(B, C, H, W)       # free reshapes back to NCHW
    cost_3_s = cost_tok.reshape(B, Kc, H, W)
    return fused_feat, cost_3_s


# --------------------------------------------------------------------------
# Pure-JAX reference mirroring the PyTorch forward (incl. the permutes).
# Uses default matmul precision, like the kernels.
# --------------------------------------------------------------------------
def _gated_mlp_ref(x, p):
    mu = jnp.mean(x, axis=-1, keepdims=True)
    var = jnp.mean((x - mu) ** 2, axis=-1, keepdims=True)
    xn = (x - mu) / jnp.sqrt(var + LN_EPS) * p['ln_g'] + p['ln_b']
    gate = jax.nn.sigmoid(xn @ p['wg'].T + p['bg'])
    val = xn @ p['wv'].T + p['bv']
    y = gate * val + x
    hid = jax.nn.gelu(y @ p['w1'].T + p['b1'], approximate=True)
    return hid @ p['w2'].T + p['b2']


def mfm_ref(t_feat, s_feat, params):
    B, C, H, W = t_feat.shape
    x = jnp.concatenate([t_feat, s_feat], axis=1)
    fused = (jnp.einsum('oi,bihw->bohw', params['fuse_w'], x)
             + params['fuse_b'][None, :, None, None])
    x_h = jnp.transpose(fused, (0, 2, 3, 1)).reshape(B * H, W, C)
    out_h = _gated_mlp_ref(x_h, params['h']).reshape(B, H, W, C)
    x_v = jnp.transpose(fused, (0, 3, 2, 1)).reshape(B * W, H, C)
    out_v = jnp.transpose(_gated_mlp_ref(x_v, params['v']).reshape(B, W, H, C),
                          (0, 2, 1, 3))
    out = jnp.transpose(out_h + out_v, (0, 3, 1, 2)) + t_feat
    scale = params['bn_g'] / jnp.sqrt(params['bn_rv'] + BN_EPS)
    shift = params['bn_b'] - params['bn_rm'] * scale
    out = out * scale[None, :, None, None] + shift[None, :, None, None]
    o = (jnp.einsum('oi,bihw->bohw', params['o1_w'], out)
         + params['o1_b'][None, :, None, None])
    o = jnp.maximum(o, 0.0)
    fused_feat = (jnp.einsum('oi,bihw->bohw', params['o2_w'], o)
                  + params['o2_b'][None, :, None, None])
    cost = lax.conv_general_dilated(
        fused_feat, params['cost_w'], (1, 1), 'SAME',
        dimension_numbers=('NCHW', 'OIHW', 'NCHW'))
    cost = cost + params['cost_b'][None, :, None, None]
    return fused_feat, cost


if __name__ == "__main__":
    B, C, H, W = 2, 32, 16, 16
    Kc = 49

    keys = iter(jax.random.split(jax.random.PRNGKey(0), 64))

    def nrm(shape, scale):
        return jax.random.normal(next(keys), shape, jnp.float32) * scale

    def gmlp_params():
        return dict(
            ln_g=1.0 + nrm((C,), 0.1), ln_b=nrm((C,), 0.1),
            wg=nrm((C, C), 0.15), bg=nrm((C,), 0.05),
            wv=nrm((C, C), 0.15), bv=nrm((C,), 0.05),
            w1=nrm((4 * C, C), 0.15), b1=nrm((4 * C,), 0.05),
            w2=nrm((C, 4 * C), 0.08), b2=nrm((C,), 0.05))

    params = dict(
        fuse_w=nrm((C, 2 * C), 0.12), fuse_b=nrm((C,), 0.05),
        h=gmlp_params(), v=gmlp_params(),
        bn_g=1.0 + nrm((C,), 0.1), bn_b=nrm((C,), 0.1),
        bn_rm=nrm((C,), 0.1), bn_rv=0.5 + jnp.abs(nrm((C,), 0.5)),
        o1_w=nrm((C, C), 0.15), o1_b=nrm((C,), 0.05),
        o2_w=nrm((C, C), 0.15), o2_b=nrm((C,), 0.05),
        cost_w=nrm((Kc, C, 3, 3), 0.05), cost_b=nrm((Kc,), 0.05))

    t_feat = jax.random.normal(next(keys), (B, C, H, W), jnp.float32)
    s_feat = jax.random.normal(next(keys), (B, C, H, W), jnp.float32)

    fused_feat, cost_3_s = mfm_double_gated_mlp(t_feat, s_feat, params)
    fused_feat, cost_3_s = jax.block_until_ready((fused_feat, cost_3_s))

    ref_feat, ref_cost = mfm_ref(t_feat, s_feat, params)
    assert fused_feat.shape == (B, C, H, W)
    assert cost_3_s.shape == (B, Kc, H, W)
    # Both kernel and reference run default-precision (single-pass bf16) MXU
    # matmuls; 1e-2 absorbs the bf16 rounding-path differences from LN folding.
    assert jnp.allclose(fused_feat, ref_feat, atol=1e-2, rtol=1e-2), "fused_feat mismatch"
    assert jnp.allclose(cost_3_s, ref_cost, atol=1e-2, rtol=1e-2), "cost_3_s mismatch"
    print("KERNEL_OK")
</pallas_src>

<mosaic_0001>
module attributes {stable_mosaic.version = 11 : i64} {
  func.func @mfm_token_kernel(%arg0: i32, %arg1: i32, %arg2: memref<1x32x256xf32, #tpu.memory_space<vmem>>, %arg3: memref<1x32x256xf32, #tpu.memory_space<vmem>>, %arg4: memref<32x64xf32, #tpu.memory_space<vmem>>, %arg5: memref<128x32xf32, #tpu.memory_space<vmem>>, %arg6: memref<128x32xf32, #tpu.memory_space<vmem>>, %arg7: memref<128x32xf32, #tpu.memory_space<vmem>>, %arg8: memref<32x256xf32, #tpu.memory_space<vmem>>, %arg9: memref<32x32xf32, #tpu.memory_space<vmem>>, %arg10: memref<32x32xf32, #tpu.memory_space<vmem>>, %arg11: memref<128x3xf32, #tpu.memory_space<vmem>>, %arg12: memref<32x6xf32, #tpu.memory_space<vmem>>, %arg13: memref<1x32x256xf32, #tpu.memory_space<vmem>>) attributes {dimension_semantics = [#tpu.dimension_semantics<parallel>, #tpu.dimension_semantics<parallel>], iteration_bounds = array<i64: 2, 1>, scalar_prefetch = 0 : i64, scratch_operands = 0 : i64, tpu.core_type = #tpu.core_type<tc>, window_params = [{transform_indices = @transform_0, window_bounds = array<i64: 1, 32, 256>}, {transform_indices = @transform_1, window_bounds = array<i64: 1, 32, 256>}, {pipeline_mode = #tpu.pipeline_mode<synchronous>, transform_indices = @transform_2, window_bounds = array<i64: 32, 64>}, {pipeline_mode = #tpu.pipeline_mode<synchronous>, transform_indices = @transform_3, window_bounds = array<i64: 128, 32>}, {pipeline_mode = #tpu.pipeline_mode<synchronous>, transform_indices = @transform_4, window_bounds = array<i64: 128, 32>}, {pipeline_mode = #tpu.pipeline_mode<synchronous>, transform_indices = @transform_5, window_bounds = array<i64: 128, 32>}, {pipeline_mode = #tpu.pipeline_mode<synchronous>, transform_indices = @transform_6, window_bounds = array<i64: 32, 256>}, {pipeline_mode = #tpu.pipeline_mode<synchronous>, transform_indices = @transform_7, window_bounds = array<i64: 32, 32>}, {pipeline_mode = #tpu.pipeline_mode<synchronous>, transform_indices = @transform_8, window_bounds = array<i64: 32, 32>}, {pipeline_mode = #tpu.pipeline_mode<synchronous>, transform_indices = @transform_9, window_bounds = array<i64: 128, 3>}, {pipeline_mode = #tpu.pipeline_mode<synchronous>, transform_indices = @transform_10, window_bounds = array<i64: 32, 6>}, {transform_indices = @transform_11, window_bounds = array<i64: 1, 32, 256>}]} {
    %c0 = arith.constant 0 : index
    %c0_0 = arith.constant 0 : index
    %c0_1 = arith.constant 0 : index
    %0 = vector.load %arg2[%c0, %c0_0, %c0_1] : memref<1x32x256xf32, #tpu.memory_space<vmem>>, vector<1x32x256xf32>
    %1 = vector.shape_cast %0 : vector<1x32x256xf32> to vector<32x256xf32>
    %c0_2 = arith.constant 0 : index
    %c0_3 = arith.constant 0 : index
    %c0_4 = arith.constant 0 : index
    %2 = vector.load %arg3[%c0_2, %c0_3, %c0_4] : memref<1x32x256xf32, #tpu.memory_space<vmem>>, vector<1x32x256xf32>
    %3 = vector.shape_cast %2 : vector<1x32x256xf32> to vector<32x256xf32>
    %c0_5 = arith.constant 0 : index
    %c0_6 = arith.constant 0 : index
    %4 = vector.load %arg12[%c0_5, %c0_6] : memref<32x6xf32, #tpu.memory_space<vmem>>, vector<32x1xf32>
    %c0_7 = arith.constant 0 : index
    %c1 = arith.constant 1 : index
    %5 = vector.load %arg12[%c0_7, %c1] : memref<32x6xf32, #tpu.memory_space<vmem>>, vector<32x1xf32>
    %c0_8 = arith.constant 0 : index
    %c2 = arith.constant 2 : index
    %6 = vector.load %arg12[%c0_8, %c2] : memref<32x6xf32, #tpu.memory_space<vmem>>, vector<32x1xf32>
    %c0_9 = arith.constant 0 : index
    %c3 = arith.constant 3 : index
    %7 = vector.load %arg12[%c0_9, %c3] : memref<32x6xf32, #tpu.memory_space<vmem>>, vector<32x1xf32>
    %c0_10 = arith.constant 0 : index
    %c4 = arith.constant 4 : index
    %8 = vector.load %arg12[%c0_10, %c4] : memref<32x6xf32, #tpu.memory_space<vmem>>, vector<32x1xf32>
    %c0_11 = arith.constant 0 : index
    %c5 = arith.constant 5 : index
    %9 = vector.load %arg12[%c0_11, %c5] : memref<32x6xf32, #tpu.memory_space<vmem>>, vector<32x1xf32>
    %c0_12 = arith.constant 0 : index
    %c0_13 = arith.constant 0 : index
    %10 = vector.load %arg4[%c0_12, %c0_13] : memref<32x64xf32, #tpu.memory_space<vmem>>, vector<32x64xf32>
    %11 = tpu.concatenate %1, %3 in 0 : vector<32x256xf32>, vector<32x256xf32> -> vector<64x256xf32>
    %cst = arith.constant dense<0.000000e+00> : vector<32x256xf32>
    %12 = tpu.matmul %10, %11, %cst {dimension_numbers = #tpu.dot_dimension_numbers<[1], [0], [0], [1], [0, 0, 1, 1], [], []>} : vector<32x64xf32>, vector<64x256xf32>, vector<32x256xf32> -> vector<32x256xf32>
    %13 = vector.broadcast %4 : vector<32x1xf32> to vector<32x256xf32>
    %14 = arith.addf %12, %13 : vector<32x256xf32>
    %cst_14 = arith.constant dense<0.000000e+00> : vector<256xf32>
    %15 = vector.multi_reduction <add>, %14, %cst_14 [0] : vector<32x256xf32> to vector<256xf32>
    %16 = vector.shape_cast %15 : vector<256xf32> to vector<1x256xf32>
    %cst_15 = arith.constant 3.125000e-02 : f32
    %17 = vector.broadcast %cst_15 : f32 to vector<1x256xf32>
    %18 = arith.mulf %16, %17 : vector<1x256xf32>
    %19 = vector.broadcast %18 : vector<1x256xf32> to vector<32x256xf32>
    %20 = arith.subf %14, %19 : vector<32x256xf32>
    %21 = arith.mulf %20, %20 : vector<32x256xf32>
    %cst_16 = arith.constant dense<0.000000e+00> : vector<256xf32>
    %22 = vector.multi_reduction <add>, %21, %cst_16 [0] : vector<32x256xf32> to vector<256xf32>
    %23 = vector.shape_cast %22 : vector<256xf32> to vector<1x256xf32>
    %cst_17 = arith.constant 3.125000e-02 : f32
    %24 = vector.broadcast %cst_17 : f32 to vector<1x256xf32>
    %25 = arith.mulf %23, %24 : vector<1x256xf32>
    %cst_18 = arith.constant 9.99999974E-6 : f32
    %26 = vector.broadcast %cst_18 : f32 to vector<1x256xf32>
    %27 = arith.addf %25, %26 : vector<1x256xf32>
    %28 = math.rsqrt %27 : vector<1x256xf32>
    %29 = vector.broadcast %28 : vector<1x256xf32> to vector<32x256xf32>
    %30 = arith.mulf %20, %29 : vector<32x256xf32>
    %c0_19 = arith.constant 0 : index
    %c0_20 = arith.constant 0 : index
    %31 = vector.load %arg5[%c0_19, %c0_20] : memref<128x32xf32, #tpu.memory_space<vmem>>, vector<128x32xf32>
    %cst_21 = arith.constant dense<0.000000e+00> : vector<128x256xf32>
    %32 = tpu.matmul %31, %30, %cst_21 {dimension_numbers = #tpu.dot_dimension_numbers<[1], [0], [0], [1], [0, 0, 1, 1], [], []>} : vector<128x32xf32>, vector<32x256xf32>, vector<128x256xf32> -> vector<128x256xf32>
    %c0_22 = arith.constant 0 : index
    %c0_23 = arith.constant 0 : index
    %33 = vector.load %arg11[%c0_22, %c0_23] : memref<128x3xf32, #tpu.memory_space<vmem>>, vector<128x1xf32>
    %34 = vector.broadcast %33 : vector<128x1xf32> to vector<128x256xf32>
    %35 = arith.addf %32, %34 : vector<128x256xf32>
    %36 = vector.extract_strided_slice %35 {offsets = [0, 0], sizes = [32, 256], strides = [1, 1]} : vector<128x256xf32> to vector<32x256xf32>
    %37 = arith.negf %36 : vector<32x256xf32>
    %38 = math.exp %37 : vector<32x256xf32>
    %cst_24 = arith.constant 1.000000e+00 : f32
    %39 = vector.broadcast %cst_24 : f32 to vector<32x256xf32>
    %40 = arith.addf %39, %38 : vector<32x256xf32>
    %41 = arith.divf %39, %40 : vector<32x256xf32>
    %42 = vector.extract_strided_slice %35 {offsets = [32, 0], sizes = [32, 256], strides = [1, 1]} : vector<128x256xf32> to vector<32x256xf32>
    %43 = arith.mulf %41, %42 : vector<32x256xf32>
    %44 = arith.addf %43, %14 : vector<32x256xf32>
    %45 = vector.extract_strided_slice %35 {offsets = [64, 0], sizes = [32, 256], strides = [1, 1]} : vector<128x256xf32> to vector<32x256xf32>
    %46 = arith.negf %45 : vector<32x256xf32>
    %47 = math.exp %46 : vector<32x256xf32>
    %cst_25 = arith.constant 1.000000e+00 : f32
    %48 = vector.broadcast %cst_25 : f32 to vector<32x256xf32>
    %49 = arith.addf %48, %47 : vector<32x256xf32>
    %50 = arith.divf %48, %49 : vector<32x256xf32>
    %51 = vector.extract_strided_slice %35 {offsets = [96, 0], sizes = [32, 256], strides = [1, 1]} : vector<128x256xf32> to vector<32x256xf32>
    %52 = arith.mulf %50, %51 : vector<32x256xf32>
    %53 = arith.addf %52, %14 : vector<32x256xf32>
    %c0_26 = arith.constant 0 : index
    %c0_27 = arith.constant 0 : index
    %54 = vector.load %arg6[%c0_26, %c0_27] : memref<128x32xf32, #tpu.memory_space<vmem>>, vector<128x32xf32>
    %cst_28 = arith.constant dense<0.000000e+00> : vector<128x256xf32>
    %55 = tpu.matmul %54, %44, %cst_28 {dimension_numbers = #tpu.dot_dimension_numbers<[1], [0], [0], [1], [0, 0, 1, 1], [], []>} : vector<128x32xf32>, vector<32x256xf32>, vector<128x256xf32> -> vector<128x256xf32>
    %c0_29 = arith.constant 0 : index
    %c1_30 = arith.constant 1 : index
    %56 = vector.load %arg11[%c0_29, %c1_30] : memref<128x3xf32, #tpu.memory_space<vmem>>, vector<128x1xf32>
    %57 = vector.broadcast %56 : vector<128x1xf32> to vector<128x256xf32>
    %58 = arith.addf %55, %57 : vector<128x256xf32>
    %59 = arith.mulf %58, %58 : vector<128x256xf32>
    %60 = arith.mulf %58, %59 : vector<128x256xf32>
    %cst_31 = arith.constant 4.471500e-02 : f32
    %61 = vector.broadcast %cst_31 : f32 to vector<128x256xf32>
    %62 = arith.mulf %61, %60 : vector<128x256xf32>
    %63 = arith.addf %58, %62 : vector<128x256xf32>
    %cst_32 = arith.constant 0.797884583 : f32
    %64 = vector.broadcast %cst_32 : f32 to vector<128x256xf32>
    %65 = arith.mulf %64, %63 : vector<128x256xf32>
    %66 = math.tanh %65 : vector<128x256xf32>
    %cst_33 = arith.constant 1.000000e+00 : f32
    %67 = vector.broadcast %cst_33 : f32 to vector<128x256xf32>
    %68 = arith.addf %67, %66 : vector<128x256xf32>
    %cst_34 = arith.constant 5.000000e-01 : f32
    %69 = vector.broadcast %cst_34 : f32 to vector<128x256xf32>
    %70 = arith.mulf %69, %68 : vector<128x256xf32>
    %71 = arith.mulf %58, %70 : vector<128x256xf32>
    %c0_35 = arith.constant 0 : index
    %c0_36 = arith.constant 0 : index
    %72 = vector.load %arg7[%c0_35, %c0_36] : memref<128x32xf32, #tpu.memory_space<vmem>>, vector<128x32xf32>
    %cst_37 = arith.constant dense<0.000000e+00> : vector<128x256xf32>
    %73 = tpu.matmul %72, %53, %cst_37 {dimension_numbers = #tpu.dot_dimension_numbers<[1], [0], [0], [1], [0, 0, 1, 1], [], []>} : vector<128x32xf32>, vector<32x256xf32>, vector<128x256xf32> -> vector<128x256xf32>
    %c0_38 = arith.constant 0 : index
    %c2_39 = arith.constant 2 : index
    %74 = vector.load %arg11[%c0_38, %c2_39] : memref<128x3xf32, #tpu.memory_space<vmem>>, vector<128x1xf32>
    %75 = vector.broadcast %74 : vector<128x1xf32> to vector<128x256xf32>
    %76 = arith.addf %73, %75 : vector<128x256xf32>
    %77 = arith.mulf %76, %76 : vector<128x256xf32>
    %78 = arith.mulf %76, %77 : vector<128x256xf32>
    %cst_40 = arith.constant 4.471500e-02 : f32
    %79 = vector.broadcast %cst_40 : f32 to vector<128x256xf32>
    %80 = arith.mulf %79, %78 : vector<128x256xf32>
    %81 = arith.addf %76, %80 : vector<128x256xf32>
    %cst_41 = arith.constant 0.797884583 : f32
    %82 = vector.broadcast %cst_41 : f32 to vector<128x256xf32>
    %83 = arith.mulf %82, %81 : vector<128x256xf32>
    %84 = math.tanh %83 : vector<128x256xf32>
    %cst_42 = arith.constant 1.000000e+00 : f32
    %85 = vector.broadcast %cst_42 : f32 to vector<128x256xf32>
    %86 = arith.addf %85, %84 : vector<128x256xf32>
    %cst_43 = arith.constant 5.000000e-01 : f32
    %87 = vector.broadcast %cst_43 : f32 to vector<128x256xf32>
    %88 = arith.mulf %87, %86 : vector<128x256xf32>
    %89 = arith.mulf %76, %88 : vector<128x256xf32>
    %c0_44 = arith.constant 0 : index
    %c0_45 = arith.constant 0 : index
    %90 = vector.load %arg8[%c0_44, %c0_45] : memref<32x256xf32, #tpu.memory_space<vmem>>, vector<32x256xf32>
    %91 = tpu.concatenate %71, %89 in 0 : vector<128x256xf32>, vector<128x256xf32> -> vector<256x256xf32>
    %cst_46 = arith.constant dense<0.000000e+00> : vector<32x256xf32>
    %92 = tpu.matmul %90, %91, %cst_46 {dimension_numbers = #tpu.dot_dimension_numbers<[1], [0], [0], [1], [0, 0, 1, 1], [], []>} : vector<32x256xf32>, vector<256x256xf32>, vector<32x256xf32> -> vector<32x256xf32>
    %93 = vector.broadcast %5 : vector<32x1xf32> to vector<32x256xf32>
    %94 = arith.addf %92, %93 : vector<32x256xf32>
    %95 = arith.addf %94, %1 : vector<32x256xf32>
    %96 = vector.broadcast %6 : vector<32x1xf32> to vector<32x256xf32>
    %97 = arith.mulf %95, %96 : vector<32x256xf32>
    %98 = vector.broadcast %7 : vector<32x1xf32> to vector<32x256xf32>
    %99 = arith.addf %97, %98 : vector<32x256xf32>
    %c0_47 = arith.constant 0 : index
    %c0_48 = arith.constant 0 : index
    %100 = vector.load %arg9[%c0_47, %c0_48] : memref<32x32xf32, #tpu.memory_space<vmem>>, vector<32x32xf32>
    %cst_49 = arith.constant dense<0.000000e+00> : vector<32x256xf32>
    %101 = tpu.matmul %100, %99, %cst_49 {dimension_numbers = #tpu.dot_dimension_numbers<[1], [0], [0], [1], [0, 0, 1, 1], [], []>} : vector<32x32xf32>, vector<32x256xf32>, vector<32x256xf32> -> vector<32x256xf32>
    %102 = vector.broadcast %8 : vector<32x1xf32> to vector<32x256xf32>
    %103 = arith.addf %101, %102 : vector<32x256xf32>
    %cst_50 = arith.constant 0.000000e+00 : f32
    %104 = vector.broadcast %cst_50 : f32 to vector<32x256xf32>
    %105 = arith.maximumf %103, %104 : vector<32x256xf32>
    %c0_51 = arith.constant 0 : index
    %c0_52 = arith.constant 0 : index
    %106 = vector.load %arg10[%c0_51, %c0_52] : memref<32x32xf32, #tpu.memory_space<vmem>>, vector<32x32xf32>
    %cst_53 = arith.constant dense<0.000000e+00> : vector<32x256xf32>
    %107 = tpu.matmul %106, %105, %cst_53 {dimension_numbers = #tpu.dot_dimension_numbers<[1], [0], [0], [1], [0, 0, 1, 1], [], []>} : vector<32x32xf32>, vector<32x256xf32>, vector<32x256xf32> -> vector<32x256xf32>
    %108 = vector.broadcast %9 : vector<32x1xf32> to vector<32x256xf32>
    %109 = arith.addf %107, %108 : vector<32x256xf32>
    %c0_54 = arith.constant 0 : index
    %c0_55 = arith.constant 0 : index
    %c0_56 = arith.constant 0 : index
    %110 = vector.load %arg13[%c0_54, %c0_55, %c0_56] : memref<1x32x256xf32, #tpu.memory_space<vmem>>, vector<1x32x256xf32>
    %111 = vector.shape_cast %110 : vector<1x32x256xf32> to vector<32x256xf32>
    %112 = vector.shape_cast %109 : vector<32x256xf32> to vector<1x32x256xf32>
    tpu.vector_store %arg13[%c0_54, %c0_55, %c0_56], %112 {strides = array<i32>} : memref<1x32x256xf32, #tpu.memory_space<vmem>>, vector<1x32x256xf32>,
    return
  }
  func.func @transform_0(%arg0: i32, %arg1: i32) -> (i32, i32, i32) {
    %c0_i32 = arith.constant 0 : i32
    %c0_i32_0 = arith.constant 0 : i32
    return %arg0, %c0_i32, %arg1 : i32, i32, i32
  }
  func.func @transform_1(%arg0: i32, %arg1: i32) -> (i32, i32, i32) {
    %c0_i32 = arith.constant 0 : i32
    %c0_i32_0 = arith.constant 0 : i32
    return %arg0, %c0_i32, %arg1 : i32, i32, i32
  }
  func.func @transform_2(%arg0: i32, %arg1: i32) -> (i32, i32) {
    %c0_i32 = arith.constant 0 : i32
    %c0_i32_0 = arith.constant 0 : i32
    %c0_i32_1 = arith.constant 0 : i32
    return %c0_i32, %c0_i32_0 : i32, i32
  }
  func.func @transform_3(%arg0: i32, %arg1: i32) -> (i32, i32) {
    %c0_i32 = arith.constant 0 : i32
    %c0_i32_0 = arith.constant 0 : i32
    %c0_i32_1 = arith.constant 0 : i32
    return %c0_i32, %c0_i32_0 : i32, i32
  }
  func.func @transform_4(%arg0: i32, %arg1: i32) -> (i32, i32) {
    %c0_i32 = arith.constant 0 : i32
    %c0_i32_0 = arith.constant 0 : i32
    %c0_i32_1 = arith.constant 0 : i32
    return %c0_i32, %c0_i32_0 : i32, i32
  }
  func.func @transform_5(%arg0: i32, %arg1: i32) -> (i32, i32) {
    %c0_i32 = arith.constant 0 : i32
    %c0_i32_0 = arith.constant 0 : i32
    %c0_i32_1 = arith.constant 0 : i32
    return %c0_i32, %c0_i32_0 : i32, i32
  }
  func.func @transform_6(%arg0: i32, %arg1: i32) -> (i32, i32) {
    %c0_i32 = arith.constant 0 : i32
    %c0_i32_0 = arith.constant 0 : i32
    %c0_i32_1 = arith.constant 0 : i32
    return %c0_i32, %c0_i32_0 : i32, i32
  }
  func.func @transform_7(%arg0: i32, %arg1: i32) -> (i32, i32) {
    %c0_i32 = arith.constant 0 : i32
    %c0_i32_0 = arith.constant 0 : i32
    %c0_i32_1 = arith.constant 0 : i32
    return %c0_i32, %c0_i32_0 : i32, i32
  }
  func.func @transform_8(%arg0: i32, %arg1: i32) -> (i32, i32) {
    %c0_i32 = arith.constant 0 : i32
    %c0_i32_0 = arith.constant 0 : i32
    %c0_i32_1 = arith.constant 0 : i32
    return %c0_i32, %c0_i32_0 : i32, i32
  }
  func.func @transform_9(%arg0: i32, %arg1: i32) -> (i32, i32) {
    %c0_i32 = arith.constant 0 : i32
    %c0_i32_0 = arith.constant 0 : i32
    %c0_i32_1 = arith.constant 0 : i32
    return %c0_i32, %c0_i32_0 : i32, i32
  }
  func.func @transform_10(%arg0: i32, %arg1: i32) -> (i32, i32) {
    %c0_i32 = arith.constant 0 : i32
    %c0_i32_0 = arith.constant 0 : i32
    %c0_i32_1 = arith.constant 0 : i32
    return %c0_i32, %c0_i32_0 : i32, i32
  }
  func.func @transform_11(%arg0: i32, %arg1: i32) -> (i32, i32, i32) {
    %c0_i32 = arith.constant 0 : i32
    %c0_i32_0 = arith.constant 0 : i32
    return %arg0, %c0_i32, %arg1 : i32, i32, i32
  }
}

</mosaic_0001>

<bundles_post_ra>
// kernel: tpu_custom_call.1
= control target key start
LH: loop header
LB: loop body
LE: loop exit
PB: predicated region body
PF: predicated region fallthrough
CT: control target
= control target key end

     0   :  { %s4934_s0 = inlined_call_operand.vmem [shape: f32[2,32,256], index: 0, kind: input, shape index: {}]   ;;  %s4935_s1 = inlined_call_operand.vmem [shape: f32[2,32,256], index: 1, kind: input, shape index: {}]   ;;  %s4936_s2 = inlined_call_operand.vmem [shape: f32[32,64], index: 2, kind: input, shape index: {}]   ;;  %s4937_s3 = inlined_call_operand.vmem [shape: f32[128,32], index: 3, kind: input, shape index: {}]   ;;  %s4938_s4 = inlined_call_operand.vmem [shape: f32[128,32], index: 4, kind: input, shape index: {}]   ;;  %s4939_s5 = inlined_call_operand.vmem [shape: f32[128,32], index: 5, kind: input, shape index: {}]   ;;  %s4940_s6 = inlined_call_operand.vmem [shape: f32[32,256], index: 6, kind: input, shape index: {}]   ;;  %s4941_s7 = inlined_call_operand.vmem [shape: f32[32,32], index: 7, kind: input, shape index: {}]   ;;  %s4942_s8 = inlined_call_operand.vmem [shape: f32[32,32], index: 8, kind: input, shape index: {}]   ;;  %s4943_s9 = inlined_call_operand.vmem [shape: f32[128,3], index: 9, kind: input, shape index: {}]   ;;  %s4944_s10 = inlined_call_operand.vmem [shape: f32[32,6], index: 10, kind: input, shape index: {}]   ;;  %s4945_s11 = inlined_call_operand.hbm [shape: f32[2,32,256], index: 11, kind: output, shape index: {}]  }
   0x1   :  { %5000 = sst [smem:[#allocation81_spill]] %s4934_s0 }
   0x2   :  { %5001 = sst [smem:[#allocation82_spill]] %s4935_s1 }
   0x3   :  { %16 = vsyncpa [#allocation3], 0 }
   0x4   :  { %18 = vsyncpa [#allocation3 + $0x1], 0  ;;  %s3405_s17 = smov 0   ;;  %s3407_s18 = smov 0  }
   0x5   :  { %s3409_s19 = smov 0   ;;  %s3411_s20 = smov 0  }
   0x6   :  { %s3413_s21 = smov 0   ;;  %s3415_s22 = smov 0  }
   0x7 LB: > { %s2810_s23 = sadd.s32 4294967295, %s3333_s22   ;;  %s2811_s24 = sadd.s32 4294967294, %s3333_s22   ;;  %s3333_s22 = sphi %s3415_s22, %s24_s22   ;;  %s3329_s21 = sphi %s3413_s21, %s5164_s21   ;;  %s3325_s20 = sphi %s3411_s20, %s5163_s20   ;;  %s3321_s19 = sphi %s3409_s19, %s5162_s19   ;;  %s3317_s18 = sphi %s3407_s18, %s5161_s18   ;;  %s3313_s17 = sphi %s3405_s17, %s5160_s17  }
   0x8   : > { %s36_s25 = sadd.s32 1, %s3329_s21  ;;  %s290_s26 = sadd.s32 1, %s3321_s19 }
   0x9   : > { %p38_p0 = scmp.ge.s32.totalorder %s36_s25, 2  ;;  %p300_p1 = scmp.ne.s32.totalorder %s3321_s19, %s3317_s18 }
   0xa   : > { %p301_p2 = scmp.eq.s32.totalorder %s2810_s23, 1  ;;  %p306_p3 = scmp.ne.s32.totalorder %s3317_s18, %s3313_s17 }
   0xb   : > { %s5166_s25 = smov (%p38_p0, %s36_s25), 0  ;;  %p307_p5 = scmp.eq.s32.totalorder %s2811_s24, 1 }
   0xc   : > { %p3445_p4 = por %p301_p2, %p300_p1  ;;  %s285_s28 = ssub.s32 %s3329_s21, %s5166_s25 }
   0xd   : > { %p2814_p6 = scmp.ge.s32.totalorder %s3333_s22, 1  ;;  %p288_p7 = scmp.eq.s32.totalorder %s285_s28, 0 }
   0xe   : > { %p3452_p8 = por %p307_p5, %p306_p3  ;;  %p378_p9 = scmp.lt.s32.totalorder %s3333_s22, 3 }
   0xf   : > { %s3458_s30 = scalar_select %p288_p7, %s3321_s19, %s290_s26  }
  0x10   : > { %p379_p10 = pnand %p2814_p6, %p378_p9 }
  0x12   : > { %382 = sbr.rel (%p379_p10) target bundleno = 1612 (0x64c), region = 64 }
  0x17   : > { %p432_p11 = scmp.lt.s32.totalorder %s3325_s20, 1  ;;  %v4946_v0 = vmov 0.0   ;;  %v3465_v1 = vld [vmem:[%s4944_s10] sm:$0xff]  ;;  %v3470_v2 = vld [vmem:[%s4944_s10 + $0x10] sm:$0xff]  ;;  %v3336_v3 = vmov 0   ;;  %v3479_v4 = vld [vmem:[%s4944_s10 + $0x8] sm:$0xff] }
  0x18   : > { %573 = vmatprep.mubr.f32.mxu0 %v4946_v0  ;;  %891 = vmatprep.mubr.f32.mxu1 %v4946_v0  ;;  %s5004_s1 = sld [smem:[#allocation82_spill]]  ;;  %v3487_v5 = vld [vmem:[%s4944_s10 + $0x18] sm:$0xff]  ;;  %v3504_v13 = vld [vmem:[%s4943_s9 + $0x10] sm:$0xff]  ;;  %v3512_v17 = vld [vmem:[%s4943_s9 + $0x8] sm:$0xff]  ;;  %vm496_vm0 = vcmask 523264   ;;  %vm778_vm1 = vcmask 261120  }
  0x19   : > { %s433_s16 = scalar_select %p432_p11, %s3325_s20, 1  ;;  %3032 = vset.pattern.permute.xlu0 %v3336_v3  ;;  %3033 = vset.pattern.permute.xlu1 %v3336_v3  ;;  %v3494_v11 = vld [vmem:[%s4943_s9 + $0x18] sm:$0xff]  ;;  %v3518_v19 = vld [vmem:[%s4943_s9] sm:$0xff]  ;;  %v3546_v29 = vld [vmem:[%s4943_s9 + $0x30] sm:$0xff] }
  0x1a   : > { %478 = vperm.xlu0 %3032, %v3465_v1   ;;  %488 = vperm.xlu1 %3033, %v3470_v2   ;;  %s5005_s0 = sld [smem:[#allocation81_spill]]  ;;  %v3528_v23 = vld [vmem:[%s4943_s9 + $0x38] sm:$0xff]  ;;  %v472_v28 = vld [vmem:[%s4936_s2] sm:$0xff]  ;;  %v3551_v30 = vld [vmem:[%s4943_s9 + $0x50] sm:$0xff]  ;;  %s428_s24 = sand.u32 1, %s3317_s18  }
  0x1b   : > { %s2901_s23 = sshll.u32 %s433_s16, 6  ;;  %v3534_v25 = vld [vmem:[%s4943_s9 + $0x58] sm:$0xff]  ;;  %v473_v31 = vld [vmem:[%s4936_s2 + $0x8] sm:$0xff]  ;;  %v474_v34 = vld [vmem:[%s4936_s2 + $0x10] sm:$0xff]  ;;  %s2815_s26 = sshll.u32 %s428_s24, 6 }
  0x1c   : > { %v3563_v32 = vld [vmem:[%s4943_s9 + $0x28] sm:$0xff]  ;;  %v3580_v35 = vld [vmem:[%s4943_s9 + $0x20] sm:$0xff]  ;;  %v475_v37 = vld [vmem:[%s4936_s2 + $0x18] sm:$0xff] }
  0x1d   : > { %v3568_v33 = vld [vmem:[%s4943_s9 + $0x48] sm:$0xff]  ;;  %v3585_v36 = vld [vmem:[%s4943_s9 + $0x40] sm:$0xff]  ;;  %v3597_v38 = vld [vmem:[%s4943_s9 + $0x78] sm:$0xff] }
  0x1e   : > { %s449_s13 = scalar_lea.vmem %s5004_s1, %s2901_s23  ;;  %483 = vperm.xlu0 %3032, %v3479_v4   ;;  %493 = vperm.xlu1 %3033, %v3487_v5   ;;  %v3602_v39 = vld [vmem:[%s4943_s9 + $0x70] sm:$0xff]  ;;  %v3610_v40 = vld [vmem:[%s4943_s9 + $0x68] sm:$0xff]  ;;  %v3616_v41 = vld [vmem:[%s4943_s9 + $0x60] sm:$0xff] }
  0x1f   : > { %v467_v6 = vld [vmem:[%s449_s13 + $0x38] sm:$0xff]  ;;  %v466_v7 = vld [vmem:[%s449_s13 + $0x30] sm:$0xff]  ;;  %v465_v8 = vld [vmem:[%s449_s13 + $0x28] sm:$0xff] }
  0x20   : > { %525 = vmatprep.subr.mxu0 %v467_v6  ;;  %v464_v9 = vld [vmem:[%s449_s13 + $0x20] sm:$0xff]  ;;  %v463_v10 = vld [vmem:[%s449_s13 + $0x18] sm:$0xff]  ;;  %v462_v12 = vld [vmem:[%s449_s13 + $0x10] sm:$0xff]  ;;  %s3499_s12 = scalar_lea.vmem %s5005_s0, %s2901_s23 }
  0x21   : > { %526 = vmatpush1.msra.mxu0 %v466_v7  ;;  %v461_v14 = vld [vmem:[%s449_s13 + $0x8] sm:$0xff]  ;;  %v460_v15 = vld [vmem:[%s449_s13] sm:$0xff]  ;;  %v459_v16 = vld [vmem:[%s3499_s12 + $0x38] sm:$0xff]  ;;  %s2903_s13 = sshll.u32 %s3325_s20, 10  ;;  %s4889_s20 = scalar_lea.sflag [#allocation3], %s428_s24 }
  0x22   : > { %527 = vmatprep.subr.mxu0 %v465_v8  ;;  %715 = vperm.xlu0 %3032, %v3494_v11   ;;  %v458_v18 = vld [vmem:[%s3499_s12 + $0x30] sm:$0xff]  ;;  %v457_v20 = vld [vmem:[%s3499_s12 + $0x28] sm:$0xff]  ;;  %v456_v21 = vld [vmem:[%s3499_s12 + $0x20] sm:$0xff]  ;;  %s4883_s23 = scalar_lea.hbm %s4945_s11, %s2903_s13 }
  0x23   : > { %528 = vmatpush1.msra.mxu0 %v464_v9  ;;  %710 = vperm.xlu1 %3033, %v3504_v13   ;;  %v455_v22 = vld [vmem:[%s3499_s12 + $0x18] sm:$0xff]  ;;  %v454_v24 = vld [vmem:[%s3499_s12 + $0x10] sm:$0xff]  ;;  %v453_v26 = vld [vmem:[%s3499_s12 + $0x8] sm:$0xff] }
  0x24   : > { %529 = vmatprep.subr.mxu0 %v463_v10  ;;  %v452_v27 = vld [vmem:[%s3499_s12] sm:$0xff] }
  0x25   : > { %530 = vmatpush1.msra.mxu0 %v462_v12 }
  0x26   : > { %531 = vmatprep.subr.mxu0 %v461_v14  ;;  %705 = vperm.xlu0 %3032, %v3512_v17  }
  0x27   : > { %532 = vmatpush1.msra.mxu0 %v460_v15  ;;  %700 = vperm.xlu1 %3033, %v3518_v19  }
  0x28   : > { %533 = vmatprep.subr.mxu0 %v459_v16 }
  0x29   : > { %534 = vmatpush1.msra.mxu0 %v458_v18 }
  0x2a   : > { %535 = vmatprep.subr.mxu0 %v457_v20  ;;  %735 = vperm.xlu0 %3032, %v3528_v23  }
  0x2b   : > { %536 = vmatpush1.msra.mxu0 %v456_v21  ;;  %755 = vperm.xlu1 %3033, %v3534_v25  }
  0x2c   : > { %537 = vmatprep.subr.mxu0 %v455_v22 }
  0x2d   : > { %538 = vmatpush1.msra.mxu0 %v454_v24 }
  0x2e   : > { %539 = vmatprep.subr.mxu0 %v453_v26  ;;  %730 = vperm.xlu0 %3032, %v3546_v29  }
  0x2f   : > { %540 = vmatpush1.msra.mxu0 %v452_v27  ;;  %750 = vperm.xlu1 %3033, %v3551_v30  }
  0x30   : > { %2820 = vmatmul.mubr.msk.f32.vlgmr.msra.gmra.mxu0 %vm496_vm0, %v472_v28 }
  0x31   : > { %579 = vmatprep.mubr.f32.mxu0 %v4946_v0 }
  0x32   : > { %725 = vperm.xlu0 %3032, %v3563_v32  }
  0x33   : > { %745 = vperm.xlu1 %3033, %v3568_v33  }
  0x34   : > { %2821 = vmatmul.mubr.msk.f32.gmra.mxu0 %vm496_vm0, %v473_v31 }
  0x35   : > { %585 = vmatprep.mubr.f32.mxu0 %v4946_v0 }
  0x36   : > { %720 = vperm.xlu0 %3032, %v3580_v35  }
  0x37   : > { %740 = vperm.xlu1 %3033, %v3585_v36  }
  0x38   : > { %2822 = vmatmul.mubr.msk.f32.gmra.mxu0 %vm496_vm0, %v474_v34 }
  0x39   : > { %591 = vmatprep.mubr.f32.mxu0 %v4946_v0 }
  0x3a   : > { %775 = vperm.xlu0 %3032, %v3597_v38  }
  0x3b   : > { %770 = vperm.xlu1 %3033, %v3602_v39  }
  0x3c   : > { %2823 = vmatmul.mubr.msk.f32.gmra.mxu0 %vm496_vm0, %v475_v37 }
  0x3d   : > { %1308 = vmatprep.mubr.f32.mxu0 %v4946_v0 }
  0x3e   : > { %765 = vperm.xlu0 %3032, %v3610_v40  }
  0x3f   : > { %760 = vperm.xlu1 %3033, %v3616_v41  }
  0x95   : > { %v479_v42 = vpop.permute.xlu0 %478  ;;  %v489_v46 = vpop.permute.xlu1 %488 }
  0x99   : > { %v484_v47 = vpop.permute.xlu0 %483  ;;  %v494_v58 = vpop.permute.xlu1 %493 }
  0xf0   : > { %v575_v43 = vpop.f32.mrf.mxu0 }
  0xf1   : > { %v3622_v51 = vadd.f32 %v575_v43, %v479_v42 }
  0xf2   : > { %v577_v44 = vpop.f32.mrf.mxu0 }
  0xf3   : > { %v3628_v55 = vadd.f32 %v577_v44, %v479_v42 }
  0xf4   : > { %v581_v45 = vpop.f32.mrf.mxu0 }
  0xf5   : > { %v3620_v49 = vadd.f32 %v581_v45, %v484_v47 }
  0xf6   : > { %v583_v48 = vpop.f32.mrf.mxu0 }
  0xf7   : > { %v3624_v52 = vadd.f32 %v583_v48, %v484_v47  ;;  %v598_v56 = vadd.f32 %v3620_v49, %v3622_v51 }
  0xf8   : > { %v587_v50 = vpop.f32.mrf.mxu0 }
  0xf9   : > { %v3626_v53 = vadd.f32 %v587_v50, %v489_v46  ;;  %v607_v60 = vadd.f32 %v3624_v52, %v3628_v55 }
  0xfa   : > { %v589_v54 = vpop.f32.mrf.mxu0 }
  0xfb   : > { %v3632_v57 = vadd.f32 %v589_v54, %v489_v46  ;;  %v599_v61 = vadd.f32 %v598_v56, %v3626_v53 }
  0xfc   : > { %v593_v59 = vpop.f32.mrf.mxu0 }
  0xfd   : > { %v3637_v62 = vadd.f32 %v593_v59, %v494_v58  ;;  %v608_v3 = vadd.f32 %v607_v60, %v3632_v57 }
  0xfe   : > { %v595_v63 = vpop.f32.mrf.mxu0 }
  0xff   : > { %v600_v6 = vadd.f32 %v599_v61, %v3637_v62  ;;  %v3641_v7 = vadd.f32 %v595_v63, %v494_v58 }
 0x101   : > { %v601_v8 = vrot.slane %v600_v6, 4  ;;  %v609_v9 = vadd.f32 %v608_v3, %v3641_v7 }
 0x103   : > { %v602_v10 = vadd.f32 %v601_v8, %v600_v6  ;;  %v610_v12 = vrot.slane %v609_v9, 4 }
 0x105   : > { %v603_v14 = vrot.slane %v602_v10, 2  ;;  %v611_v15 = vadd.f32 %v610_v12, %v609_v9 }
 0x107   : > { %v604_v16 = vadd.f32 %v603_v14, %v602_v10  ;;  %v612_v18 = vrot.slane %v611_v15, 2 }
 0x109   : > { %v613_v20 = vadd.f32 %v612_v18, %v611_v15  ;;  %v605_v21 = vrot.slane %v604_v16, 1 }
 0x10b   : > { %v614_v22 = vrot.slane %v613_v20, 1  ;;  %v606_v24 = vadd.f32 %v605_v21, %v604_v16 }
 0x10d   : > { %v615_v26 = vadd.f32 %v614_v22, %v613_v20  ;;  %v616_v27 = vmul.f32 0.03125, %v606_v24 }
 0x10f   : > { %v617_v28 = vmul.f32 0.03125, %v615_v26  ;;  %v618_v31 = vsub.f32 %v3622_v51, %v616_v27  ;;  %v620_v34 = vsub.f32 %v3620_v49, %v616_v27  ;;  %v622_v37 = vsub.f32 %v3626_v53, %v616_v27 }
 0x110   : > { %v624_v45 = vsub.f32 %v3637_v62, %v616_v27 }
 0x111   : > { %v619_v42 = vsub.f32 %v3628_v55, %v617_v28  ;;  %v621_v43 = vsub.f32 %v3624_v52, %v617_v28  ;;  %v623_v44 = vsub.f32 %v3632_v57, %v617_v28  ;;  %v626_v46 = vmul.f32 %v618_v31, %v618_v31 }
 0x112   : > { %v628_v47 = vmul.f32 %v620_v34, %v620_v34  ;;  %v625_v48 = vsub.f32 %v3641_v7, %v617_v28  ;;  %v630_v56 = vmul.f32 %v622_v37, %v622_v37  ;;  %v632_v61 = vmul.f32 %v624_v45, %v624_v45 }
 0x113   : > { %v627_v50 = vmul.f32 %v619_v42, %v619_v42  ;;  %v629_v54 = vmul.f32 %v621_v43, %v621_v43  ;;  %v631_v59 = vmul.f32 %v623_v44, %v623_v44 }
 0x114   : > { %v634_v58 = vadd.f32 %v628_v47, %v626_v46  ;;  %v633_v3 = vmul.f32 %v625_v48, %v625_v48 }
 0x115   : > { %v643_v60 = vadd.f32 %v629_v54, %v627_v50 }
 0x116   : > { %v635_v63 = vadd.f32 %v634_v58, %v630_v56 }
 0x117   : > { %v644_v6 = vadd.f32 %v643_v60, %v631_v59 }
 0x118   : > { %v636_v8 = vadd.f32 %v635_v63, %v632_v61 }
 0x119   : > { %v645_v9 = vadd.f32 %v644_v6, %v633_v3 }
 0x11a   : > { %v637_v10 = vrot.slane %v636_v8, 4 }
 0x11b   : > { %v646_v12 = vrot.slane %v645_v9, 4 }
 0x11c   : > { %v638_v14 = vadd.f32 %v637_v10, %v636_v8  ;;  %v675_v10 = vld [vmem:[%s4937_s3 + $0x48] sm:$0xff] }
 0x11d   : > { %v647_v15 = vadd.f32 %v646_v12, %v645_v9  ;;  %v666_v9 = vld [vmem:[%s4937_s3] sm:$0xff]  ;;  %v676_v12 = vld [vmem:[%s4937_s3 + $0x50] sm:$0xff] }
 0x11e   : > { %v639_v16 = vrot.slane %v638_v14, 2 }
 0x11f   : > { %v648_v18 = vrot.slane %v647_v15, 2 }
 0x120   : > { %v640_v20 = vadd.f32 %v639_v16, %v638_v14  ;;  %v677_v14 = vld [vmem:[%s4937_s3 + $0x58] sm:$0xff]  ;;  %v679_v16 = vld [vmem:[%s4937_s3 + $0x68] sm:$0xff] }
 0x121   : > { %v649_v21 = vadd.f32 %v648_v18, %v647_v15  ;;  %v678_v15 = vld [vmem:[%s4937_s3 + $0x60] sm:$0xff]  ;;  %v680_v18 = vld [vmem:[%s4937_s3 + $0x70] sm:$0xff] }
 0x122   : > { %v641_v22 = vrot.slane %v640_v20, 1 }
 0x123   : > { %v650_v24 = vrot.slane %v649_v21, 1 }
 0x124   : > { %v642_v26 = vadd.f32 %v641_v22, %v640_v20  ;;  %v681_v20 = vld [vmem:[%s4937_s3 + $0x78] sm:$0xff]  ;;  %v711_v22 = vpop.permute.xlu1 %710 }
 0x125   : > { %v651_v27 = vadd.f32 %v650_v24, %v649_v21  ;;  %v3337_v21 = vmov 1   ;;  %v716_v24 = vpop.permute.xlu0 %715 }
 0x126   : > { %v652_v28 = vmul.f32 0.03125, %v642_v26  ;;  %3035 = vset.pattern.permute.xlu1 %v3337_v21  ;;  %3034 = vset.pattern.permute.xlu0 %v3337_v21 }
 0x127   : > { %v653_v46 = vmul.f32 0.03125, %v651_v27  ;;  %1189 = vperm.xlu1 %3035, %v3602_v39   ;;  %1193 = vperm.xlu0 %3034, %v3597_v38  }
 0x128   : > { %v654_v47 = vadd.f32 1e-05, %v652_v28  ;;  %v4948_v28 = vmov 2  }
 0x129   : > { %v655_v50 = vadd.f32 1e-05, %v653_v46  ;;  %v701_v46 = vpop.permute.xlu1 %700 }
 0x12a   : > { %3049 = vrsqrt.f32 %v654_v47 }
 0x12b   : > { %3051 = vrsqrt.f32 %v655_v50  ;;  %1185 = vperm.xlu1 %3035, %v3610_v40   ;;  %1181 = vperm.xlu0 %3034, %v3616_v41  }
 0x12f   : > { %1177 = vperm.xlu1 %3035, %v3534_v25   ;;  %1173 = vperm.xlu0 %3034, %v3551_v30  }
 0x133   : > { %1169 = vperm.xlu1 %3035, %v3568_v33   ;;  %1165 = vperm.xlu0 %3034, %v3585_v36  }
 0x137   : > { %v3050_v54 = vpop.eup %3049  ;;  %1161 = vperm.xlu1 %3035, %v3528_v23   ;;  %1157 = vperm.xlu0 %3034, %v3546_v29  }
 0x138   : > { %v3052_v56 = vpop.eup %3051  ;;  %v664_v59 = vmul.f32 %v3050_v54, %v624_v45  ;;  %v662_v61 = vmul.f32 %v3050_v54, %v622_v37  ;;  %v660_v3 = vmul.f32 %v3050_v54, %v620_v34  ;;  %v658_v8 = vmul.f32 %v3050_v54, %v618_v31  ;;  %v667_v37 = vld [vmem:[%s4937_s3 + $0x8] sm:$0xff]  ;;  %v668_v31 = vld [vmem:[%s4937_s3 + $0x10] sm:$0xff]  ;;  %v669_v34 = vld [vmem:[%s4937_s3 + $0x18] sm:$0xff]  ;;  %v706_v54 = vpop.permute.xlu0 %705 }
 0x139   : > { %v665_v58 = vmul.f32 %v3052_v56, %v625_v48  ;;  %v663_v60 = vmul.f32 %v3052_v56, %v623_v44  ;;  %v661_v63 = vmul.f32 %v3052_v56, %v621_v43  ;;  %v659_v6 = vmul.f32 %v3052_v56, %v619_v42  ;;  %v670_v42 = vld [vmem:[%s4937_s3 + $0x20] sm:$0xff]  ;;  %v671_v43 = vld [vmem:[%s4937_s3 + $0x28] sm:$0xff]  ;;  %v672_v44 = vld [vmem:[%s4937_s3 + $0x30] sm:$0xff] }
 0x13a   : > { %v673_v45 = vld [vmem:[%s4937_s3 + $0x38] sm:$0xff]  ;;  %v674_v48 = vld [vmem:[%s4937_s3 + $0x40] sm:$0xff] }
 0x13b   : > { %851 = vmatprep.subr.mxu1 %v665_v58  ;;  %1153 = vperm.xlu1 %3035, %v3563_v32  }
 0x13c   : > { %852 = vmatpush1.msra.mxu1 %v664_v59  ;;  %1149 = vperm.xlu0 %3034, %v3580_v35  }
 0x13d   : > { %853 = vmatprep.subr.mxu1 %v663_v60 }
 0x13e   : > { %854 = vmatpush1.msra.mxu1 %v662_v61 }
 0x13f   : > { %855 = vmatprep.subr.mxu1 %v661_v63  ;;  %1145 = vperm.xlu1 %3035, %v3494_v11  }
 0x140   : > { %856 = vmatpush1.msra.mxu1 %v660_v3  ;;  %1141 = vperm.xlu0 %3034, %v3504_v13  }
 0x141   : > { %857 = vmatprep.subr.mxu1 %v659_v6 }
 0x142   : > { %858 = vmatpush1.msra.mxu1 %v658_v8 }
 0x143   : > { %2824 = vmatmul.mubr.msk.f32.vlgmr.msra.gmra.mxu1 %vm778_vm1, %v666_v9  ;;  %1137 = vperm.xlu1 %3035, %v3512_v17  }
 0x144   : > { %897 = vmatprep.mubr.f32.mxu1 %v4946_v0  ;;  %1133 = vperm.xlu0 %3034, %v3518_v19  }
 0x147   : > { %2825 = vmatmul.mubr.msk.f32.gmra.mxu1 %vm778_vm1, %v667_v37  ;;  %3036 = vset.pattern.permute.xlu1 %v4948_v28 }
 0x148   : > { %903 = vmatprep.mubr.f32.mxu1 %v4946_v0  ;;  %3037 = vset.pattern.permute.xlu0 %v4948_v28 }
 0x149   : > { %1770 = vperm.xlu1 %3036, %v3597_v38   ;;  %1766 = vperm.xlu0 %3037, %v3602_v39  }
 0x14b   : > { %2826 = vmatmul.mubr.msk.f32.gmra.mxu1 %vm778_vm1, %v668_v31 }
 0x14c   : > { %909 = vmatprep.mubr.f32.mxu1 %v4946_v0 }
 0x14d   : > { %1762 = vperm.xlu1 %3036, %v3610_v40   ;;  %1754 = vperm.xlu0 %3037, %v3534_v25  }
 0x14f   : > { %2827 = vmatmul.mubr.msk.f32.gmra.mxu1 %vm778_vm1, %v669_v34 }
 0x150   : > { %915 = vmatprep.mubr.f32.mxu1 %v4946_v0 }
 0x151   : > { %1758 = vperm.xlu1 %3036, %v3616_v41   ;;  %1746 = vperm.xlu0 %3037, %v3568_v33  }
 0x153   : > { %2828 = vmatmul.mubr.msk.f32.gmra.mxu1 %vm778_vm1, %v670_v42 }
 0x154   : > { %921 = vmatprep.mubr.f32.mxu1 %v4946_v0 }
 0x155   : > { %1750 = vperm.xlu1 %3036, %v3551_v30   ;;  %1738 = vperm.xlu0 %3037, %v3528_v23  }
 0x157   : > { %2829 = vmatmul.mubr.msk.f32.gmra.mxu1 %vm778_vm1, %v671_v43 }
 0x158   : > { %927 = vmatprep.mubr.f32.mxu1 %v4946_v0 }
 0x159   : > { %1742 = vperm.xlu1 %3036, %v3585_v36   ;;  %1730 = vperm.xlu0 %3037, %v3563_v32  }
 0x15b   : > { %2830 = vmatmul.mubr.msk.f32.gmra.mxu1 %vm778_vm1, %v672_v44 }
 0x15c   : > { %933 = vmatprep.mubr.f32.mxu1 %v4946_v0 }
 0x15d   : > { %1734 = vperm.xlu1 %3036, %v3546_v29   ;;  %1722 = vperm.xlu0 %3037, %v3494_v11  }
 0x15f   : > { %2831 = vmatmul.mubr.msk.f32.gmra.mxu1 %vm778_vm1, %v673_v45  ;;  %v3764_v45 = vpop.permute.xlu1 %755 }
 0x160   : > { %939 = vmatprep.mubr.f32.mxu1 %v4946_v0 }
 0x161   : > { %1726 = vperm.xlu1 %3036, %v3580_v35   ;;  %1714 = vperm.xlu0 %3037, %v3512_v17  }
 0x163   : > { %2832 = vmatmul.mubr.msk.f32.gmra.mxu1 %vm778_vm1, %v674_v48 }
 0x164   : > { %945 = vmatprep.mubr.f32.mxu1 %v4946_v0 }
 0x165   : > { %1718 = vperm.xlu1 %3036, %v3504_v13   ;;  %3038 = vset.pattern.permute.xlu0 %v3337_v21 }
 0x166   : > { %2291 = vperm.xlu0 %3038, %v3487_v5  }
 0x167   : > { %2833 = vmatmul.mubr.msk.f32.gmra.mxu1 %vm778_vm1, %v675_v10 }
 0x168   : > { %951 = vmatprep.mubr.f32.mxu1 %v4946_v0 }
 0x169   : > { %1710 = vperm.xlu1 %3036, %v3518_v19  }
 0x16a   : > { %3040 = vset.pattern.permute.xlu0 %v4948_v28 }
 0x16b   : > { %2834 = vmatmul.mubr.msk.f32.gmra.mxu1 %vm778_vm1, %v676_v12  ;;  %v751_v12 = vpop.permute.xlu1 %750  ;;  %2404 = vperm.xlu0 %3040, %v3487_v5  }
 0x16c   : > { %957 = vmatprep.mubr.f32.mxu1 %v4946_v0 }
 0x16d   : > { %3039 = vset.pattern.permute.xlu1 %v3337_v21 }
 0x16e   : > { %2287 = vperm.xlu1 %3039, %v3470_v2  }
 0x16f   : > { %2835 = vmatmul.mubr.msk.f32.gmra.mxu1 %vm778_vm1, %v677_v14 }
 0x170   : > { %963 = vmatprep.mubr.f32.mxu1 %v4946_v0 }
 0x172   : > { %2283 = vperm.xlu1 %3039, %v3479_v4  }
 0x173   : > { %2836 = vmatmul.mubr.msk.f32.gmra.mxu1 %vm778_vm1, %v678_v15 }
 0x174   : > { %969 = vmatprep.mubr.f32.mxu1 %v4946_v0 }
 0x176   : > { %2279 = vperm.xlu1 %3039, %v3465_v1  }
 0x177   : > { %2837 = vmatmul.mubr.msk.f32.gmra.mxu1 %vm778_vm1, %v679_v16 }
 0x178   : > { %975 = vmatprep.mubr.f32.mxu1 %v4946_v0 }
 0x17a   : > { %3041 = vset.pattern.permute.xlu1 %v4948_v28 }
 0x17b   : > { %2838 = vmatmul.mubr.msk.f32.gmra.mxu1 %vm778_vm1, %v680_v18  ;;  %2400 = vperm.xlu1 %3041, %v3470_v2  }
 0x17c   : > { %981 = vmatprep.mubr.f32.mxu1 %v4946_v0 }
 0x17f   : > { %2839 = vmatmul.mubr.msk.f32.gmra.mxu1 %vm778_vm1, %v681_v20  ;;  %2396 = vperm.xlu1 %3041, %v3479_v4  }
 0x180   : > { %1885 = vmatprep.mubr.f32.mxu1 %v4946_v0 }
 0x203   : > { %v893_v26 = vpop.f32.mrf.mxu1 }
 0x204   : > { %v894_v6 = vadd.f32 %v893_v26, %v701_v46 }
 0x205   : > { %v895_v27 = vpop.f32.mrf.mxu1 }
 0x206   : > { %v896_v50 = vadd.f32 %v895_v27, %v701_v46  ;;  %v2840_v25 = vmul.f32 -1.442695, %v894_v6  ;;  %v746_v27 = vpop.permute.xlu1 %745 }
 0x207   : > { %v899_v47 = vpop.f32.mrf.mxu1 }
 0x208   : > { %v900_v59 = vadd.f32 %v899_v47, %v706_v54  ;;  %v2841_v61 = vmul.f32 -1.442695, %v896_v50  ;;  %v736_v50 = vpop.permute.xlu0 %735 }
 0x209   : > { %v901_v56 = vpop.f32.mrf.mxu1 }
 0x20a   : > { %v902_v58 = vadd.f32 %v901_v56, %v706_v54  ;;  %v2842_v9 = vmul.f32 -1.442695, %v900_v59 }
 0x20b   : > { %v905_v60 = vpop.f32.mrf.mxu1 }
 0x20c   : > { %v2843_v63 = vmul.f32 -1.442695, %v902_v58  ;;  %v906_v3 = vadd.f32 %v905_v60, %v711_v22  ;;  %v741_v60 = vpop.permute.xlu1 %740 }
 0x20d   : > { %v907_v8 = vpop.f32.mrf.mxu1 }
 0x20e   : > { %3053 = vpow2.f32 %v2843_v63  ;;  %v2844_v38 = vmul.f32 -1.442695, %v906_v3  ;;  %v908_v39 = vadd.f32 %v907_v8, %v711_v22 }
 0x20f   : > { %v911_v37 = vpop.f32.mrf.mxu1  ;;  %3055 = vpow2.f32 %v2841_v61  ;;  %v731_v61 = vpop.permute.xlu0 %730 }
 0x210   : > { %v2845_v40 = vmul.f32 -1.442695, %v908_v39  ;;  %v912_v31 = vadd.f32 %v911_v37, %v716_v24  ;;  %3057 = vpow2.f32 %v2844_v38 }
 0x211   : > { %v913_v34 = vpop.f32.mrf.mxu1 }
 0x212   : > { %3059 = vpow2.f32 %v2845_v40  ;;  %v2846_v42 = vmul.f32 -1.442695, %v912_v31  ;;  %v914_v43 = vadd.f32 %v913_v34, %v716_v24 }
 0x213   : > { %3061 = vpow2.f32 %v2842_v9  ;;  %v3760_v44 = vpop.f32.mrf.mxu1  ;;  %v726_v34 = vpop.permute.xlu0 %725 }
 0x214   : > { %3063 = vpow2.f32 %v2846_v42  ;;  %v2847_v33 = vmul.f32 -1.442695, %v914_v43 }
 0x215   : > { %3065 = vpow2.f32 %v2840_v25  ;;  %v3762_v41 = vpop.f32.mrf.mxu1 }
 0x216   : > { %3067 = vpow2.f32 %v2847_v33 }
 0x217   : > { %v3768_v48 = vpop.f32.mrf.mxu1 }
 0x219   : > { %v3770_v30 = vpop.f32.mrf.mxu1 }
 0x21b   : > { %v3054_v23 = vpop.eup %3053  ;;  %v3774_v10 = vpop.f32.mrf.mxu1 }
 0x21c   : > { %v3056_v14 = vpop.eup %3055  ;;  %v1015_v18 = vadd.f32 1.0, %v3054_v23 }
 0x21d   : > { %v3776_v15 = vpop.f32.mrf.mxu1  ;;  %v3058_v16 = vpop.eup %3057  ;;  %v1013_v54 = vadd.f32 1.0, %v3056_v14 }
 0x21e   : > { %v1016_v24 = vadd.f32 1.0, %v3058_v16  ;;  %3069 = vrcp.f32 %v1015_v18  ;;  %v926_v16 = vadd.f32 %v3770_v30, %v726_v34 }
 0x21f   : > { %v3060_v32 = vpop.eup %3059  ;;  %v935_v36 = vpop.f32.mrf.mxu1 }
 0x220   : > { %v3062_v20 = vpop.eup %3061  ;;  %v1017_v22 = vadd.f32 1.0, %v3060_v32  ;;  %v936_v18 = vadd.f32 %v935_v36, %v736_v50 }
 0x221   : > { %v3064_v29 = vpop.eup %3063  ;;  %v937_v11 = vpop.f32.mrf.mxu1  ;;  %v1014_v35 = vadd.f32 1.0, %v3062_v20 }
 0x222   : > { %v3066_v26 = vpop.eup %3065  ;;  %v1018_v46 = vadd.f32 1.0, %v3064_v29  ;;  %3071 = vrcp.f32 %v1017_v22  ;;  %v938_v29 = vadd.f32 %v937_v11, %v736_v50  ;;  %v721_v11 = vpop.permute.xlu0 %720  ;;  %v924_v50 = vadd.f32 %v3768_v48, %v726_v34 }
 0x223   : > { %v3068_v47 = vpop.eup %3067  ;;  %v941_v17 = vpop.f32.mrf.mxu1  ;;  %v1012_v58 = vadd.f32 1.0, %v3066_v26  ;;  %v918_v1 = vadd.f32 %v3760_v44, %v721_v11 }
 0x224   : > { %3073 = vrcp.f32 %v1018_v46  ;;  %v1019_v56 = vadd.f32 1.0, %v3068_v47  ;;  %v942_v63 = vadd.f32 %v941_v17, %v741_v60 }
 0x225   : > { %3075 = vrcp.f32 %v1016_v24  ;;  %v943_v59 = vpop.f32.mrf.mxu1 }
 0x226   : > { %3077 = vrcp.f32 %v1019_v56  ;;  %v944_v19 = vadd.f32 %v943_v59, %v741_v60  ;;  %v2848_v37 = vmul.f32 -1.442695, %v942_v63 }
 0x227   : > { %3079 = vrcp.f32 %v1014_v35  ;;  %v947_v13 = vpop.f32.mrf.mxu1 }
 0x228   : > { %3081 = vrcp.f32 %v1013_v54  ;;  %v948_v8 = vadd.f32 %v947_v13, %v746_v27  ;;  %v2849_v21 = vmul.f32 -1.442695, %v944_v19 }
 0x229   : > { %3083 = vrcp.f32 %v1012_v58  ;;  %v949_v3 = vpop.f32.mrf.mxu1 }
 0x22a   : > { %v950_v6 = vadd.f32 %v949_v3, %v746_v27  ;;  %v2850_v42 = vmul.f32 -1.442695, %v948_v8  ;;  %v930_v27 = vadd.f32 %v3774_v10, %v731_v61  ;;  %v920_v10 = vadd.f32 %v3762_v41, %v721_v11 }
 0x22b   : > { %v953_v38 = vpop.f32.mrf.mxu1  ;;  %v3070_v5 = vpop.eup %3069 }
 0x22c   : > { %v2851_v39 = vmul.f32 -1.442695, %v950_v6  ;;  %v954_v9 = vadd.f32 %v953_v38, %v751_v12  ;;  %v1039_v58 = vmul.f32 %v3070_v5, %v926_v16 }
 0x22d   : > { %v955_v40 = vpop.f32.mrf.mxu1 }
 0x22e   : > { %3085 = vpow2.f32 %v2851_v39  ;;  %v2852_v31 = vmul.f32 -1.442695, %v954_v9  ;;  %v956_v25 = vadd.f32 %v955_v40, %v751_v12  ;;  %v932_v12 = vadd.f32 %v3776_v15, %v731_v61  ;;  %v1116_v9 = vld [vmem:[%s4938_s4] sm:$0xff] }
 0x22f   : > { %v959_v43 = vpop.f32.mrf.mxu1  ;;  %v3072_v33 = vpop.eup %3071  ;;  %v1047_v44 = vadd.f32 %v1039_v58, %v3624_v52 }
 0x230   : > { %3087 = vpow2.f32 %v2852_v31  ;;  %v2853_v23 = vmul.f32 -1.442695, %v956_v25  ;;  %v960_v32 = vadd.f32 %v959_v43, %v3764_v45  ;;  %v1041_v36 = vmul.f32 %v3072_v33, %v932_v12  ;;  %v1117_v43 = vld [vmem:[%s4938_s4 + $0x8] sm:$0xff] }
 0x231   : > { %v3074_v14 = vpop.eup %3073  ;;  %3089 = vpow2.f32 %v2848_v37  ;;  %v961_v20 = vpop.f32.mrf.mxu1 }
 0x232   : > { %v3076_v22 = vpop.eup %3075  ;;  %3091 = vpow2.f32 %v2853_v23  ;;  %v962_v24 = vadd.f32 %v961_v20, %v3764_v45  ;;  %v1042_v46 = vmul.f32 %v3074_v14, %v936_v18  ;;  %v2854_v47 = vmul.f32 -1.442695, %v960_v32 }
 0x233   : > { %v3078_v26 = vpop.eup %3077  ;;  %3093 = vpow2.f32 %v2850_v42  ;;  %v3794_v35 = vpop.f32.mrf.mxu1  ;;  %v1040_v45 = vmul.f32 %v3076_v22, %v930_v27  ;;  %v1049_v48 = vadd.f32 %v1041_v36, %v3632_v57  ;;  %v1118_v22 = vld [vmem:[%s4938_s4 + $0x10] sm:$0xff]  ;;  %v1120_v27 = vld [vmem:[%s4938_s4 + $0x20] sm:$0xff] }
 0x234   : > { %v3080_v30 = vpop.eup %3079  ;;  %v1043_v17 = vmul.f32 %v3078_v26, %v938_v29  ;;  %3095 = vpow2.f32 %v2849_v21  ;;  %v2855_v54 = vmul.f32 -1.442695, %v962_v24  ;;  %v1050_v60 = vadd.f32 %v1042_v46, %v3637_v62  ;;  %v1119_v29 = vld [vmem:[%s4938_s4 + $0x18] sm:$0xff]  ;;  %v776_v26 = vpop.permute.xlu0 %775 }
 0x235   : > { %v3082_v15 = vpop.eup %3081  ;;  %3097 = vpow2.f32 %v2854_v47  ;;  %v1038_v13 = vmul.f32 %v3080_v30, %v924_v50  ;;  %v3802_v61 = vpop.f32.mrf.mxu1  ;;  %v1048_v3 = vadd.f32 %v1040_v45, %v3626_v53 }
 0x236   : > { %v3084_v56 = vpop.eup %3083  ;;  %3099 = vpow2.f32 %v2855_v54  ;;  %v1051_v59 = vadd.f32 %v1043_v17, %v3641_v7  ;;  %v1037_v63 = vmul.f32 %v3082_v15, %v920_v10  ;;  %v771_v47 = vpop.permute.xlu1 %770  ;;  %v1121_v15 = vld [vmem:[%s4938_s4 + $0x28] sm:$0xff] }
 0x237   : > { %v1036_v41 = vmul.f32 %v3084_v56, %v918_v1  ;;  %v1046_v8 = vadd.f32 %v1038_v13, %v3620_v49  ;;  %v3810_v38 = vpop.f32.mrf.mxu1 }
 0x238   : > { %1268 = vmatprep.subr.mxu0 %v1051_v59  ;;  %v1045_v19 = vadd.f32 %v1037_v63, %v3628_v55  ;;  %v766_v10 = vpop.permute.xlu0 %765 }
 0x239   : > { %1269 = vmatpush1.msra.mxu0 %v1050_v60  ;;  %v1044_v2 = vadd.f32 %v1036_v41, %v3622_v51  ;;  %v973_v5 = vpop.f32.mrf.mxu1 }
 0x23a   : > { %1270 = vmatprep.subr.mxu0 %v1049_v48  ;;  %v974_v13 = vadd.f32 %v973_v5, %v766_v10  ;;  %v761_v41 = vpop.permute.xlu1 %760 }
 0x23b   : > { %v3086_v6 = vpop.eup %3085  ;;  %1271 = vmatpush1.msra.mxu0 %v1048_v3  ;;  %v977_v16 = vpop.f32.mrf.mxu1  ;;  %v972_v3 = vadd.f32 %v3810_v38, %v766_v10 }
 0x23c   : > { %1272 = vmatprep.subr.mxu0 %v1047_v44  ;;  %v1079_v40 = vadd.f32 1.0, %v3086_v6  ;;  %v978_v58 = vadd.f32 %v977_v16, %v771_v47  ;;  %v1122_v6 = vld [vmem:[%s4938_s4 + $0x30] sm:$0xff] }
 0x23d   : > { %v3088_v39 = vpop.eup %3087  ;;  %1273 = vmatpush1.msra.mxu0 %v1046_v8  ;;  %v979_v12 = vpop.f32.mrf.mxu1  ;;  %v1699_v16 = vld [vmem:[%s4939_s5 + $0x30] sm:$0xff] }
 0x23e   : > { %v3090_v37 = vpop.eup %3089  ;;  %1274 = vmatprep.subr.mxu0 %v1045_v19  ;;  %v1080_v25 = vadd.f32 1.0, %v3088_v39  ;;  %3101 = vrcp.f32 %v1079_v40  ;;  %v980_v50 = vadd.f32 %v979_v12, %v771_v47  ;;  %v968_v19 = vadd.f32 %v3802_v61, %v761_v41  ;;  %v1124_v61 = vld [vmem:[%s4938_s4 + $0x40] sm:$0xff]  ;;  %v1703_v12 = vld [vmem:[%s4939_s5 + $0x50] sm:$0xff]  ;;  %v3984_v47 = vpop.permute.xlu1 %1189 }
 0x23f   : > { %v3092_v31 = vpop.eup %3091  ;;  %1275 = vmatpush1.msra.mxu0 %v1044_v2  ;;  %v1076_v20 = vadd.f32 1.0, %v3090_v37  ;;  %v983_v24 = vpop.f32.mrf.mxu1 }
 0x240   : > { %v3094_v34 = vpop.eup %3093  ;;  %v1081_v42 = vadd.f32 1.0, %v3092_v31  ;;  %2856 = vmatmul.mubr.msk.f32.vlgmr.msra.gmra.mxu0 %vm778_vm1, %v1116_v9  ;;  %3103 = vrcp.f32 %v1080_v25  ;;  %v984_v54 = vadd.f32 %v983_v24, %v776_v26  ;;  %v966_v9 = vadd.f32 %v3794_v35, %v761_v41  ;;  %v1705_v24 = vld [vmem:[%s4939_s5 + $0x60] sm:$0xff] }
 0x241   : > { %v3096_v4 = vpop.eup %3095  ;;  %1314 = vmatprep.mubr.f32.mxu0 %v4946_v0  ;;  %v1078_v23 = vadd.f32 1.0, %v3094_v34  ;;  %v985_v30 = vpop.f32.mrf.mxu1  ;;  %v1695_v34 = vld [vmem:[%s4939_s5 + $0x10] sm:$0xff] }
 0x242   : > { %v3098_v33 = vpop.eup %3097  ;;  %v1077_v18 = vadd.f32 1.0, %v3096_v4  ;;  %3105 = vrcp.f32 %v1081_v42  ;;  %v986_v45 = vadd.f32 %v985_v30, %v776_v26  ;;  %v1127_v42 = vld [vmem:[%s4938_s4 + $0x58] sm:$0xff]  ;;  %v1706_v26 = vld [vmem:[%s4939_s5 + $0x68] sm:$0xff]  ;;  %v3986_v30 = vpop.permute.xlu1 %1185 }
 0x243   : > { %v3100_v21 = vpop.eup %3099  ;;  %v1082_v14 = vadd.f32 1.0, %v3098_v33  ;;  %v1696_v4 = vld [vmem:[%s4939_s5 + $0x18] sm:$0xff]  ;;  %v1697_v33 = vld [vmem:[%s4939_s5 + $0x20] sm:$0xff] }
 0x244   : > { %v1083_v32 = vadd.f32 1.0, %v3100_v21  ;;  %2857 = vmatmul.mubr.msk.f32.gmra.mxu0 %vm778_vm1, %v1117_v43  ;;  %v1128_v43 = vld [vmem:[%s4938_s4 + $0x60] sm:$0xff]  ;;  %v1129_v21 = vld [vmem:[%s4938_s4 + $0x68] sm:$0xff] }
 0x245   : > { %3107 = vrcp.f32 %v1082_v14  ;;  %1320 = vmatprep.mubr.f32.mxu0 %v4946_v0  ;;  %v1130_v14 = vld [vmem:[%s4938_s4 + $0x70] sm:$0xff] }
 0x246   : > { %3109 = vrcp.f32 %v1083_v32  ;;  %v1700_v32 = vld [vmem:[%s4939_s5 + $0x38] sm:$0xff] }
 0x247   : > { %3111 = vrcp.f32 %v1078_v23  ;;  %v1698_v23 = vld [vmem:[%s4939_s5 + $0x28] sm:$0xff] }
 0x248   : > { %3113 = vrcp.f32 %v1077_v18  ;;  %2858 = vmatmul.mubr.msk.f32.gmra.mxu0 %vm778_vm1, %v1118_v22  ;;  %v1131_v18 = vld [vmem:[%s4938_s4 + $0x78] sm:$0xff]  ;;  %v1702_v22 = vld [vmem:[%s4939_s5 + $0x48] sm:$0xff] }
 0x249   : > { %3115 = vrcp.f32 %v1076_v20  ;;  %1326 = vmatprep.mubr.f32.mxu0 %v4946_v0  ;;  %v1701_v20 = vld [vmem:[%s4939_s5 + $0x40] sm:$0xff] }
 0x24b   : > { %v3102_v46 = vpop.eup %3101 }
 0x24c   : > { %2859 = vmatmul.mubr.msk.f32.gmra.mxu0 %vm778_vm1, %v1119_v29  ;;  %v1103_v39 = vmul.f32 %v3102_v46, %v974_v13  ;;  %v1704_v29 = vld [vmem:[%s4939_s5 + $0x58] sm:$0xff] }
 0x24d   : > { %1332 = vmatprep.mubr.f32.mxu0 %v4946_v0  ;;  %v3104_v36 = vpop.eup %3103  ;;  %v1708_v46 = vld [vmem:[%s4939_s5 + $0x78] sm:$0xff] }
 0x24e   : > { %v1104_v44 = vmul.f32 %v3104_v36, %v978_v58  ;;  %v1111_v35 = vadd.f32 %v1103_v39, %v3624_v52  ;;  %v1693_v52 = vld [vmem:[%s4939_s5] sm:$0xff]  ;;  %v3988_v36 = vpop.permute.xlu0 %1193 }
 0x24f   : > { %v3106_v17 = vpop.eup %3105 }
 0x250   : > { %2860 = vmatmul.mubr.msk.f32.gmra.mxu0 %vm778_vm1, %v1120_v27  ;;  %v1105_v60 = vmul.f32 %v3106_v17, %v980_v50  ;;  %v1112_v5 = vadd.f32 %v1104_v44, %v3626_v53  ;;  %v1707_v27 = vld [vmem:[%s4939_s5 + $0x70] sm:$0xff]  ;;  %v3990_v17 = vpop.permute.xlu1 %1177 }
 0x251   : > { %1338 = vmatprep.mubr.f32.mxu0 %v4946_v0 }
 0x252   : > { %v3108_v11 = vpop.eup %3107  ;;  %v1113_v38 = vadd.f32 %v1105_v60, %v3632_v57 }
 0x253   : > { %v3110_v56 = vpop.eup %3109  ;;  %v1106_v59 = vmul.f32 %v3108_v11, %v984_v54  ;;  %v3992_v54 = vpop.permute.xlu0 %1181 }
 0x254   : > { %v3112_v1 = vpop.eup %3111  ;;  %v1107_v63 = vmul.f32 %v3110_v56, %v986_v45  ;;  %2861 = vmatmul.mubr.msk.f32.gmra.mxu0 %vm778_vm1, %v1121_v15  ;;  %v3994_v15 = vpop.permute.xlu1 %1169 }
 0x255   : > { %v3114_v48 = vpop.eup %3113  ;;  %1344 = vmatprep.mubr.f32.mxu0 %v4946_v0  ;;  %v1102_v37 = vmul.f32 %v3112_v1, %v972_v3  ;;  %v1114_v40 = vadd.f32 %v1106_v59, %v3637_v62 }
 0x256   : > { %v3116_v8 = vpop.eup %3115  ;;  %v1115_v2 = vadd.f32 %v1107_v63, %v3641_v7  ;;  %v1101_v31 = vmul.f32 %v3114_v48, %v968_v19  ;;  %v1123_v7 = vld [vmem:[%s4938_s4 + $0x38] sm:$0xff] }
 0x257   : > { %v1100_v25 = vmul.f32 %v3116_v8, %v966_v9  ;;  %v1110_v62 = vadd.f32 %v1102_v37, %v3620_v49  ;;  %v1125_v49 = vld [vmem:[%s4938_s4 + $0x48] sm:$0xff]  ;;  %v3996_v11 = vpop.permute.xlu0 %1173 }
 0x258   : > { %2862 = vmatmul.mubr.msk.f32.gmra.mxu0 %vm778_vm1, %v1122_v6  ;;  %1845 = vmatprep.subr.mxu1 %v1115_v2  ;;  %v1109_v57 = vadd.f32 %v1101_v31, %v3628_v55  ;;  %v1126_v55 = vld [vmem:[%s4938_s4 + $0x50] sm:$0xff]  ;;  %v3998_v50 = vpop.permute.xlu1 %1161 }
 0x259   : > { %1846 = vmatpush1.msra.mxu1 %v1114_v40  ;;  %1350 = vmatprep.mubr.f32.mxu0 %v4946_v0  ;;  %v1108_v53 = vadd.f32 %v1100_v25, %v3622_v51  ;;  %v1694_v51 = vld [vmem:[%s4939_s5 + $0x8] sm:$0xff] }
 0x25a   : > { %1847 = vmatprep.subr.mxu1 %v1113_v38 }
 0x25b   : > { %1848 = vmatpush1.msra.mxu1 %v1112_v5  ;;  %v4000_v45 = vpop.permute.xlu0 %1165 }
 0x25c   : > { %2863 = vmatmul.mubr.msk.f32.gmra.mxu0 %vm778_vm1, %v1123_v7  ;;  %1849 = vmatprep.subr.mxu1 %v1111_v35  ;;  %v1154_v56 = vpop.permute.xlu1 %1153 }
 0x25d   : > { %1850 = vmatpush1.msra.mxu1 %v1110_v62  ;;  %1356 = vmatprep.mubr.f32.mxu0 %v4946_v0 }
 0x25e   : > { %1851 = vmatprep.subr.mxu1 %v1109_v57 }
 0x25f   : > { %1852 = vmatpush1.msra.mxu1 %v1108_v53  ;;  %v4002_v10 = vpop.permute.xlu0 %1157 }
 0x260   : > { %2864 = vmatmul.mubr.msk.f32.gmra.mxu0 %vm778_vm1, %v1124_v61  ;;  %2872 = vmatmul.mubr.msk.f32.vlgmr.msra.gmra.mxu1 %vm778_vm1, %v1693_v52  ;;  %v1146_v58 = vpop.permute.xlu1 %1145 }
 0x261   : > { %1362 = vmatprep.mubr.f32.mxu0 %v4946_v0  ;;  %1891 = vmatprep.mubr.f32.mxu1 %v4946_v0 }
 0x263   : > { %v1150_v59 = vpop.permute.xlu0 %1149 }
 0x264   : > { %2865 = vmatmul.mubr.msk.f32.gmra.mxu0 %vm778_vm1, %v1125_v49  ;;  %2873 = vmatmul.mubr.msk.f32.gmra.mxu1 %vm778_vm1, %v1694_v51  ;;  %v1138_v1 = vpop.permute.xlu1 %1137 }
 0x265   : > { %1368 = vmatprep.mubr.f32.mxu0 %v4946_v0  ;;  %1897 = vmatprep.mubr.f32.mxu1 %v4946_v0 }
 0x267   : > { %v1142_v13 = vpop.permute.xlu0 %1141 }
 0x268   : > { %2866 = vmatmul.mubr.msk.f32.gmra.mxu0 %vm778_vm1, %v1126_v55  ;;  %2874 = vmatmul.mubr.msk.f32.gmra.mxu1 %vm778_vm1, %v1695_v34  ;;  %v4004_v60 = vpop.permute.xlu1 %1770 }
 0x269   : > { %1374 = vmatprep.mubr.f32.mxu0 %v4946_v0  ;;  %1903 = vmatprep.mubr.f32.mxu1 %v4946_v0 }
 0x26b   : > { %v1134_v48 = vpop.permute.xlu0 %1133 }
 0x26c   : > { %2867 = vmatmul.mubr.msk.f32.gmra.mxu0 %vm778_vm1, %v1127_v42  ;;  %2875 = vmatmul.mubr.msk.f32.gmra.mxu1 %vm778_vm1, %v1696_v4  ;;  %v4006_v41 = vpop.permute.xlu1 %1762 }
 0x26d   : > { %1380 = vmatprep.mubr.f32.mxu0 %v4946_v0  ;;  %1909 = vmatprep.mubr.f32.mxu1 %v4946_v0 }
 0x270   : > { %2868 = vmatmul.mubr.msk.f32.gmra.mxu0 %vm778_vm1, %v1128_v43  ;;  %2876 = vmatmul.mubr.msk.f32.gmra.mxu1 %vm778_vm1, %v1697_v33  ;;  %v4014_v2 = vpop.permute.xlu1 %1758 }
 0x271   : > { %1386 = vmatprep.mubr.f32.mxu0 %v4946_v0  ;;  %1915 = vmatprep.mubr.f32.mxu1 %v4946_v0 }
 0x274   : > { %2869 = vmatmul.mubr.msk.f32.gmra.mxu0 %vm778_vm1, %v1129_v21  ;;  %2877 = vmatmul.mubr.msk.f32.gmra.mxu1 %vm778_vm1, %v1698_v23  ;;  %v4025_v35 = vpop.permute.xlu1 %1750 }
 0x275   : > { %1392 = vmatprep.mubr.f32.mxu0 %v4946_v0  ;;  %1921 = vmatprep.mubr.f32.mxu1 %v4946_v0 }
 0x278   : > { %2870 = vmatmul.mubr.msk.f32.gmra.mxu0 %vm778_vm1, %v1130_v14  ;;  %2878 = vmatmul.mubr.msk.f32.gmra.mxu1 %vm778_vm1, %v1699_v16  ;;  %v4046_v16 = vpop.permute.xlu1 %1742 }
 0x279   : > { %1398 = vmatprep.mubr.f32.mxu0 %v4946_v0  ;;  %1927 = vmatprep.mubr.f32.mxu1 %v4946_v0 }
 0x27c   : > { %2871 = vmatmul.mubr.msk.f32.gmra.mxu0 %vm778_vm1, %v1131_v18  ;;  %2879 = vmatmul.mubr.msk.f32.gmra.mxu1 %vm778_vm1, %v1700_v32 }
 0x27d   : > { %1933 = vmatprep.mubr.f32.mxu1 %v4946_v0 }
 0x280   : > { %2880 = vmatmul.mubr.msk.f32.gmra.mxu1 %vm778_vm1, %v1701_v20 }
 0x281   : > { %1939 = vmatprep.mubr.f32.mxu1 %v4946_v0 }
 0x284   : > { %2881 = vmatmul.mubr.msk.f32.gmra.mxu1 %vm778_vm1, %v1702_v22 }
 0x285   : > { %1945 = vmatprep.mubr.f32.mxu1 %v4946_v0 }
 0x288   : > { %2882 = vmatmul.mubr.msk.f32.gmra.mxu1 %vm778_vm1, %v1703_v12 }
 0x289   : > { %1951 = vmatprep.mubr.f32.mxu1 %v4946_v0 }
 0x28c   : > { %2883 = vmatmul.mubr.msk.f32.gmra.mxu1 %vm778_vm1, %v1704_v29 }
 0x28d   : > { %1957 = vmatprep.mubr.f32.mxu1 %v4946_v0 }
 0x290   : > { %2884 = vmatmul.mubr.msk.f32.gmra.mxu1 %vm778_vm1, %v1705_v24 }
 0x291   : > { %1963 = vmatprep.mubr.f32.mxu1 %v4946_v0 }
 0x294   : > { %2885 = vmatmul.mubr.msk.f32.gmra.mxu1 %vm778_vm1, %v1706_v26 }
 0x295   : > { %1969 = vmatprep.mubr.f32.mxu1 %v4946_v0 }
 0x298   : > { %2886 = vmatmul.mubr.msk.f32.gmra.mxu1 %vm778_vm1, %v1707_v27 }
 0x299   : > { %1975 = vmatprep.mubr.f32.mxu1 %v4946_v0 }
 0x29c   : > { %2887 = vmatmul.mubr.msk.f32.gmra.mxu1 %vm778_vm1, %v1708_v46 }
 0x300   : > { %v1310_v63 = vpop.f32.mrf.mxu0 }
 0x301   : > { %v4008_v44 = vadd.f32 %v1310_v63, %v1134_v48 }
 0x302   : > { %v1312_v3 = vpop.f32.mrf.mxu0 }
 0x303   : > { %5006 = vst [vmem:[#allocation5_spill] sm:$0xff] %v4008_v44  ;;  %v4010_v19 = vadd.f32 %v1312_v3, %v1134_v48  ;;  %v1405_v39 = vmul.f32 %v4008_v44, %v4008_v44 }
 0x304   : > { %v1316_v6 = vpop.f32.mrf.mxu0 }
 0x305   : > { %5007 = vst [vmem:[#allocation6_spill] sm:$0xff] %v4010_v19  ;;  %v4016_v40 = vadd.f32 %v1316_v6, %v1138_v1  ;;  %v1406_v31 = vmul.f32 %v4010_v19, %v4010_v19  ;;  %v1437_v38 = vmul.f32 %v1405_v39, %v4008_v44  ;;  %v4067_v39 = vpop.permute.xlu1 %1734 }
 0x306   : > { %v1318_v8 = vpop.f32.mrf.mxu0 }
 0x307   : > { %5008 = vst [vmem:[#allocation7_spill] sm:$0xff] %v4016_v40  ;;  %v4021_v5 = vadd.f32 %v1318_v8, %v1138_v1  ;;  %v1407_v57 = vmul.f32 %v4016_v40, %v4016_v40  ;;  %v1438_v53 = vmul.f32 %v1406_v31, %v4010_v19  ;;  %v1469_v52 = vmul.f32 0.044715, %v1437_v38 }
 0x308   : > { %v1322_v9 = vpop.f32.mrf.mxu0 }
 0x309   : > { %5009 = vst [vmem:[#allocation8_spill] sm:$0xff] %v4021_v5  ;;  %v4023_v7 = vadd.f32 %v1322_v9, %v1142_v13  ;;  %v1408_v49 = vmul.f32 %v4021_v5, %v4021_v5  ;;  %v1439_v4 = vmul.f32 %v1407_v57, %v4016_v40  ;;  %v1470_v33 = vmul.f32 0.044715, %v1438_v53 }
 0x30a   : > { %v1324_v37 = vpop.f32.mrf.mxu0  ;;  %v1501_v14 = vadd.f32 %v1469_v52, %v4008_v44 }
 0x30b   : > { %5010 = vst [vmem:[#allocation9_spill] sm:$0xff] %v4023_v7  ;;  %v4030_v61 = vadd.f32 %v1324_v37, %v1142_v13  ;;  %v1409_v34 = vmul.f32 %v4023_v7, %v4023_v7  ;;  %v1440_v18 = vmul.f32 %v1408_v49, %v4021_v5  ;;  %v1471_v24 = vmul.f32 0.044715, %v1439_v4 }
 0x30c   : > { %v1328_v25 = vpop.f32.mrf.mxu0  ;;  %v1502_v26 = vadd.f32 %v1470_v33, %v4010_v19  ;;  %v1533_v13 = vmul.f32 0.7978846, %v1501_v14 }
 0x30d   : > { %5011 = vst [vmem:[#allocation10_spill] sm:$0xff] %v4030_v61  ;;  %v4034_v55 = vadd.f32 %v1328_v25, %v1146_v58  ;;  %v1410_v21 = vmul.f32 %v4030_v61, %v4030_v61  ;;  %v1441_v22 = vmul.f32 %v1409_v34, %v4023_v7  ;;  %v1472_v63 = vmul.f32 0.044715, %v1440_v18 }
 0x30e   : > { %v1330_v62 = vpop.f32.mrf.mxu0  ;;  %v1503_v37 = vadd.f32 %v1471_v24, %v4016_v40  ;;  %v1534_v31 = vmul.f32 0.7978846, %v1502_v26  ;;  %3117 = vtanh.f32 %v1533_v13  ;;  %v4091_v24 = vpop.permute.xlu1 %1726 }
 0x30f   : > { %5012 = vst [vmem:[#allocation11_spill] sm:$0xff] %v4034_v55  ;;  %v4038_v42 = vadd.f32 %v1330_v62, %v1146_v58  ;;  %v1411_v20 = vmul.f32 %v4034_v55, %v4034_v55  ;;  %v1442_v58 = vmul.f32 %v1410_v21, %v4030_v61  ;;  %v1473_v6 = vmul.f32 0.044715, %v1441_v22 }
 0x310   : > { %v1334_v51 = vpop.f32.mrf.mxu0  ;;  %v1504_v53 = vadd.f32 %v1472_v63, %v4021_v5  ;;  %3119 = vtanh.f32 %v1534_v31  ;;  %v1535_v18 = vmul.f32 0.7978846, %v1503_v37 }
 0x311   : > { %5013 = vst [vmem:[#allocation12_spill] sm:$0xff] %v4038_v42  ;;  %v4043_v23 = vadd.f32 %v1334_v51, %v1150_v59  ;;  %v1412_v29 = vmul.f32 %v4038_v42, %v4038_v42  ;;  %v1443_v3 = vmul.f32 %v1411_v20, %v4034_v55  ;;  %v1505_v34 = vadd.f32 %v1473_v6, %v4023_v7 }
 0x312   : > { %v1336_v43 = vpop.f32.mrf.mxu0  ;;  %v1536_v26 = vmul.f32 0.7978846, %v1504_v53  ;;  %3121 = vtanh.f32 %v1535_v18 }
 0x313   : > { %5014 = vst [vmem:[#allocation13_spill] sm:$0xff] %v4043_v23  ;;  %v4052_v12 = vadd.f32 %v1336_v43, %v1150_v59  ;;  %v1413_v1 = vmul.f32 %v4043_v23, %v4043_v23  ;;  %v1444_v9 = vmul.f32 %v1412_v29, %v4038_v42  ;;  %v1475_v51 = vmul.f32 0.044715, %v1443_v3  ;;  %v4089_v29 = vpop.permute.xlu0 %1766 }
 0x314   : > { %v1340_v32 = vpop.f32.mrf.mxu0  ;;  %v1537_v63 = vmul.f32 0.7978846, %v1505_v34  ;;  %3123 = vtanh.f32 %v1536_v26 }
 0x315   : > { %5015 = vst [vmem:[#allocation14_spill] sm:$0xff] %v4052_v12  ;;  %v4057_v27 = vadd.f32 %v1340_v32, %v1154_v56  ;;  %v1414_v8 = vmul.f32 %v4052_v12, %v4052_v12  ;;  %v1445_v62 = vmul.f32 %v1413_v1, %v4043_v23  ;;  %v1476_v33 = vmul.f32 0.044715, %v1444_v9 }
 0x316   : > { %v1342_v46 = vpop.f32.mrf.mxu0  ;;  %v1507_v13 = vadd.f32 %v1475_v51, %v4034_v55  ;;  %3125 = vtanh.f32 %v1537_v63 }
 0x317   : > { %5016 = vst [vmem:[#allocation15_spill] sm:$0xff] %v4057_v27  ;;  %v4062_v48 = vadd.f32 %v1342_v46, %v1154_v56  ;;  %v1415_v38 = vmul.f32 %v4057_v27, %v4057_v27  ;;  %v1474_v56 = vmul.f32 0.044715, %v1442_v58  ;;  %v1446_v4 = vmul.f32 %v1414_v8, %v4052_v12 }
 0x318   : > { %v1346_v59 = vpop.f32.mrf.mxu0  ;;  %v1477_v20 = vmul.f32 0.044715, %v1445_v62  ;;  %v1508_v6 = vadd.f32 %v1476_v33, %v4038_v42  ;;  %v4119_v33 = vpop.permute.xlu0 %1754 }
 0x319   : > { %5017 = vst [vmem:[#allocation16_spill] sm:$0xff] %v4062_v48  ;;  %v4075_v57 = vadd.f32 %v1346_v59, %v4002_v10  ;;  %v1416_v52 = vmul.f32 %v4062_v48, %v4062_v48  ;;  %v1447_v21 = vmul.f32 %v1415_v38, %v4057_v27  ;;  %v1506_v32 = vadd.f32 %v1474_v56, %v4030_v61 }
 0x31a   : > { %v1348_v25 = vpop.f32.mrf.mxu0  ;;  %v1478_v59 = vmul.f32 0.044715, %v1446_v4 }
 0x31b   : > { %5018 = vst [vmem:[#allocation17_spill] sm:$0xff] %v4075_v57  ;;  %v4083_v43 = vadd.f32 %v1348_v25, %v4002_v10  ;;  %v1417_v22 = vmul.f32 %v4075_v57, %v4075_v57  ;;  %v1448_v10 = vmul.f32 %v1416_v52, %v4062_v48  ;;  %v1479_v8 = vmul.f32 0.044715, %v1447_v21  ;;  %v4121_v21 = vpop.permute.xlu1 %1718  ;;  %v3118_v63 = vpop.eup %3117 }
 0x31c   : > { %v1352_v49 = vpop.f32.mrf.mxu0  ;;  %v1538_v38 = vmul.f32 0.7978846, %v1506_v32  ;;  %v1509_v25 = vadd.f32 %v1477_v20, %v4043_v23  ;;  %v1510_v34 = vadd.f32 %v1478_v59, %v4052_v12 }
 0x31d   : > { %5019 = vst [vmem:[#allocation18_spill] sm:$0xff] %v4083_v43  ;;  %v4095_v46 = vadd.f32 %v1352_v49, %v3998_v50  ;;  %v1418_v3 = vmul.f32 %v4083_v43, %v4083_v43  ;;  %v1449_v56 = vmul.f32 %v1417_v22, %v4075_v57  ;;  %v1480_v62 = vmul.f32 0.044715, %v1448_v10  ;;  %v3120_v44 = vpop.eup %3119 }
 0x31e   : > { %v1354_v14 = vpop.f32.mrf.mxu0  ;;  %v1511_v18 = vadd.f32 %v1479_v8, %v4057_v27  ;;  %v1541_v10 = vmul.f32 0.7978846, %v1509_v25  ;;  %3127 = vtanh.f32 %v1538_v38  ;;  %v1542_v25 = vmul.f32 0.7978846, %v1510_v34  ;;  %v4150_v34 = vpop.permute.xlu0 %1746 }
 0x31f   : > { %5020 = vst [vmem:[#allocation19_spill] sm:$0xff] %v4095_v46  ;;  %v4104_v9 = vadd.f32 %v1354_v14, %v3998_v50  ;;  %v1419_v53 = vmul.f32 %v4095_v46, %v4095_v46  ;;  %v1539_v50 = vmul.f32 0.7978846, %v1507_v13  ;;  %v1450_v4 = vmul.f32 %v1418_v3, %v4083_v43 }
 0x320   : > { %v1358_v58 = vpop.f32.mrf.mxu0  ;;  %v4097_v1 = vpop.f32.mrf.mxu1  ;;  %v1540_v14 = vmul.f32 0.7978846, %v1508_v6  ;;  %v1512_v59 = vadd.f32 %v1480_v62, %v4062_v48  ;;  %v1543_v38 = vmul.f32 0.7978846, %v1511_v18 }
 0x321   : > { %5021 = vst [vmem:[#allocation20_spill] sm:$0xff] %v4104_v9  ;;  %v4113_v52 = vadd.f32 %v1358_v58, %v4000_v45  ;;  %v1420_v32 = vmul.f32 %v4104_v9, %v4104_v9  ;;  %v1481_v58 = vmul.f32 0.044715, %v1449_v56  ;;  %v1451_v3 = vmul.f32 %v1419_v53, %v4095_v46 }
 0x322   : > { %v1360_v37 = vpop.f32.mrf.mxu0  ;;  %v4106_v31 = vpop.f32.mrf.mxu1  ;;  %3129 = vtanh.f32 %v1539_v50  ;;  %v1482_v56 = vmul.f32 0.044715, %v1450_v4 }
 0x323   : > { %5022 = vst [vmem:[#allocation21_spill] sm:$0xff] %v4113_v52  ;;  %v4127_v20 = vadd.f32 %v1360_v37, %v4000_v45  ;;  %v1421_v6 = vmul.f32 %v4113_v52, %v4113_v52  ;;  %3131 = vtanh.f32 %v1540_v14  ;;  %v1452_v62 = vmul.f32 %v1420_v32, %v4104_v9  ;;  %v1711_v4 = vpop.permute.xlu1 %1710 }
 0x324   : > { %v1364_v49 = vpop.f32.mrf.mxu0  ;;  %v4115_v51 = vpop.f32.mrf.mxu1  ;;  %3133 = vtanh.f32 %v1541_v10  ;;  %v1544_v14 = vmul.f32 0.7978846, %v1512_v59  ;;  %v1483_v18 = vmul.f32 0.044715, %v1451_v3  ;;  %v1514_v10 = vadd.f32 %v1482_v56, %v4083_v43 }
 0x325   : > { %5023 = vst [vmem:[#allocation22_spill] sm:$0xff] %v4127_v20  ;;  %v4132_v13 = vadd.f32 %v1364_v49, %v3994_v15  ;;  %v1422_v53 = vmul.f32 %v4127_v20, %v4127_v20  ;;  %v1453_v32 = vmul.f32 %v1421_v6, %v4113_v52  ;;  %3135 = vtanh.f32 %v1542_v25 }
 0x326   : > { %v1366_v22 = vpop.f32.mrf.mxu0  ;;  %v4129_v26 = vpop.f32.mrf.mxu1  ;;  %3137 = vtanh.f32 %v1543_v38  ;;  %v4175_v61 = vadd.f32 %v4097_v1, %v1711_v4 }
 0x327   : > { %5024 = vst [vmem:[#allocation23_spill] sm:$0xff] %v4132_v13  ;;  %v4139_v45 = vadd.f32 %v1366_v22, %v3994_v15  ;;  %v1513_v15 = vadd.f32 %v1481_v58, %v4075_v57  ;;  %v1423_v50 = vmul.f32 %v4132_v13, %v4132_v13  ;;  %v4152_v22 = vadd.f32 1.0, %v3118_v63  ;;  %v4186_v1 = vpop.permute.xlu0 %1738 }
 0x328   : > { %v1370_v8 = vpop.f32.mrf.mxu0  ;;  %v1899_v37 = vpop.f32.mrf.mxu1  ;;  %v1484_v63 = vmul.f32 0.044715, %v1452_v62  ;;  %v1454_v59 = vmul.f32 %v1422_v53, %v4127_v20  ;;  %5031 = vst [vmem:[#allocation30_spill] sm:$0xff] %v4175_v61  ;;  %3139 = vtanh.f32 %v1544_v14  ;;  %v1485_v38 = vmul.f32 0.044715, %v1453_v32 }
 0x329   : > { %5025 = vst [vmem:[#allocation24_spill] sm:$0xff] %v4139_v45  ;;  %v4142_v49 = vadd.f32 %v1370_v8, %v3996_v11  ;;  %5027 = vst [vmem:[#allocation26_spill] sm:$0xff] %v4152_v22  ;;  %v1424_v8 = vmul.f32 %v4139_v45, %v4139_v45  ;;  %v4168_v22 = vadd.f32 1.0, %v3120_v44  ;;  %v1545_v7 = vmul.f32 0.7978846, %v1513_v15 }
 0x32a   : > { %v1372_v0 = vpop.f32.mrf.mxu0  ;;  %v1901_v28 = vpop.f32.mrf.mxu1  ;;  %v1455_v25 = vmul.f32 %v1423_v50, %v4132_v13  ;;  %v4172_v56 = vadd.f32 %v1899_v37, %v4121_v21  ;;  %v1546_v15 = vmul.f32 0.7978846, %v1514_v10  ;;  %v1486_v32 = vmul.f32 0.044715, %v1454_v59 }
 0x32b   : > { %5026 = vst [vmem:[#allocation25_spill] sm:$0xff] %v4142_v49  ;;  %v1425_v58 = vmul.f32 %v4142_v49, %v4142_v49  ;;  %v4163_v5 = vadd.f32 %v1372_v0, %v3996_v11  ;;  %5029 = vst [vmem:[#allocation28_spill] sm:$0xff] %v4168_v22  ;;  %v4177_v0 = vpop.eup %3121  ;;  %v1515_v11 = vadd.f32 %v1483_v18, %v4095_v46  ;;  %3141 = vtanh.f32 %v1545_v7 }
 0x32c   : > { %v1376_v19 = vpop.f32.mrf.mxu0  ;;  %v4157_v40 = vpop.f32.mrf.mxu1  ;;  %5030 = vst [vmem:[#allocation29_spill] sm:$0xff] %v4172_v56  ;;  %v1456_v62 = vmul.f32 %v1424_v8, %v4139_v45  ;;  %v1516_v18 = vadd.f32 %v1484_v63, %v4104_v9  ;;  %v4198_v10 = vadd.f32 %v4106_v31, %v1711_v4  ;;  %v4201_v23 = vadd.f32 %v1901_v28, %v4121_v21 }
 0x32d   : > { %5028 = vst [vmem:[#allocation27_spill] sm:$0xff] %v4163_v5  ;;  %v4181_v22 = vpop.eup %3123  ;;  %v1457_v50 = vmul.f32 %v1425_v58, %v4142_v49  ;;  %v1426_v37 = vmul.f32 %v4163_v5, %v4163_v5  ;;  %v4189_v55 = vadd.f32 %v1376_v19, %v3990_v17  ;;  %v1487_v58 = vmul.f32 0.044715, %v1455_v25 }
 0x32e   : > { %v1378_v3 = vpop.f32.mrf.mxu0  ;;  %v4166_v6 = vpop.f32.mrf.mxu1  ;;  %5032 = vst [vmem:[#allocation31_spill] sm:$0xff] %v4181_v22  ;;  %5035 = vst [vmem:[#allocation34_spill] sm:$0xff] %v4198_v10  ;;  %v1986_v19 = vmul.f32 %v4172_v56, %v4172_v56  ;;  %v1547_v27 = vmul.f32 0.7978846, %v1515_v11  ;;  %v1517_v63 = vadd.f32 %v1485_v38, %v4113_v52  ;;  %v1488_v59 = vmul.f32 0.044715, %v1456_v62 }
 0x32f   : > { %5033 = vst [vmem:[#allocation32_spill] sm:$0xff] %v4189_v55  ;;  %v4191_v14 = vpop.eup %3125  ;;  %v4195_v8 = vadd.f32 %v1378_v3, %v3990_v17  ;;  %5036 = vst [vmem:[#allocation35_spill] sm:$0xff] %v4201_v23  ;;  %3143 = vtanh.f32 %v1546_v15  ;;  %v1489_v7 = vmul.f32 0.044715, %v1457_v50  ;;  %v1458_v28 = vmul.f32 %v1426_v37, %v4163_v5 }
 0x330   : > { %v1382_v53 = vpop.f32.mrf.mxu0  ;;  %v1911_v44 = vpop.f32.mrf.mxu1  ;;  %5034 = vst [vmem:[#allocation33_spill] sm:$0xff] %v4191_v14  ;;  %v1427_v21 = vmul.f32 %v4189_v55, %v4189_v55  ;;  %v1548_v25 = vmul.f32 0.7978846, %v1516_v18  ;;  %v1518_v11 = vadd.f32 %v1486_v32, %v4127_v20  ;;  %v1519_v50 = vadd.f32 %v1487_v58, %v4132_v13 }
 0x331   : > { %v4205_v12 = vpop.eup %3127  ;;  %v4209_v17 = vadd.f32 %v1382_v53, %v3992_v54  ;;  %v1428_v38 = vmul.f32 %v4195_v8, %v4195_v8  ;;  %v4222_v62 = vadd.f32 %v1911_v44, %v4091_v24  ;;  %v1987_v37 = vmul.f32 %v4201_v23, %v4201_v23  ;;  %v4232_v18 = vpop.permute.xlu0 %1730 }
 0x332   : > { %v1913_v42 = vpop.f32.mrf.mxu1  ;;  %5037 = vst [vmem:[#allocation36_spill] sm:$0xff] %v4205_v12  ;;  %v1384_v3 = vpop.f32.mrf.mxu0  ;;  %v2018_v22 = vmul.f32 %v1986_v19, %v4172_v56  ;;  %3145 = vtanh.f32 %v1547_v27  ;;  %v1549_v44 = vmul.f32 0.7978846, %v1517_v63  ;;  %v1520_v14 = vadd.f32 %v1488_v59, %v4139_v45 }
 0x333   : > { %v4216_v4 = vpop.eup %3129  ;;  %5039 = vst [vmem:[#allocation38_spill] sm:$0xff] %v4222_v62  ;;  %v4235_v32 = vadd.f32 %v1384_v3, %v3992_v54  ;;  %v1429_v57 = vmul.f32 %v4209_v17, %v4209_v17  ;;  %v1521_v12 = vadd.f32 %v1489_v7, %v4142_v49  ;;  %v1490_v43 = vmul.f32 0.044715, %v1458_v28 }
 0x334   : > { %v4211_v31 = vpop.f32.mrf.mxu1  ;;  %5038 = vst [vmem:[#allocation37_spill] sm:$0xff] %v4216_v4  ;;  %v4226_v15 = vpop.eup %3131  ;;  %v1459_v19 = vmul.f32 %v1427_v21, %v4189_v55  ;;  %v1990_v54 = vmul.f32 %v4222_v62, %v4222_v62  ;;  %3147 = vtanh.f32 %v1548_v25  ;;  %v1550_v27 = vmul.f32 0.7978846, %v1518_v11 }
 0x335   : > { %5040 = vst [vmem:[#allocation39_spill] sm:$0xff] %v4226_v15  ;;  %v4237_v48 = vpop.eup %3133  ;;  %v1460_v63 = vmul.f32 %v1428_v38, %v4195_v8  ;;  %v4252_v59 = vadd.f32 %v1913_v42, %v4091_v24  ;;  %v1551_v7 = vmul.f32 0.7978846, %v1519_v50  ;;  %v2019_v28 = vmul.f32 %v1987_v37, %v4201_v23  ;;  %v1388_v42 = vpop.f32.mrf.mxu0 }
 0x336   : > { %v4224_v53 = vpop.f32.mrf.mxu1  ;;  %5041 = vst [vmem:[#allocation40_spill] sm:$0xff] %v4237_v48  ;;  %v4248_v3 = vpop.eup %3135  ;;  %v2050_v21 = vmul.f32 0.044715, %v2018_v22  ;;  %v1430_v15 = vmul.f32 %v4235_v32, %v4235_v32  ;;  %3149 = vtanh.f32 %v1549_v44  ;;  %v1552_v9 = vmul.f32 0.7978846, %v1520_v14  ;;  %v2271_v14 = vld [vmem:[%s4940_s6 + $0x8] sm:$0xff] }
 0x337   : > { %5042 = vst [vmem:[#allocation41_spill] sm:$0xff] %v4248_v3  ;;  %5043 = vst [vmem:[#allocation42_spill] sm:$0xff] %v4252_v59  ;;  %v4256_v46 = vpop.eup %3137  ;;  %v1461_v25 = vmul.f32 %v1429_v57, %v4209_v17  ;;  %v1982_v11 = vmul.f32 %v4175_v61, %v4175_v61  ;;  %v1553_v48 = vmul.f32 0.7978846, %v1521_v12  ;;  %v1522_v50 = vadd.f32 %v1490_v43, %v4163_v5  ;;  %v1723_v52 = vpop.permute.xlu0 %1722 }
 0x338   : > { %v4242_v58 = vpop.f32.mrf.mxu1  ;;  %5044 = vst [vmem:[#allocation43_spill] sm:$0xff] %v4256_v46  ;;  %v4266_v38 = vpop.eup %3139  ;;  %v1491_v37 = vmul.f32 0.044715, %v1459_v19  ;;  %v2022_v22 = vmul.f32 %v1990_v54, %v4222_v62  ;;  %3151 = vtanh.f32 %v1550_v27  ;;  %v1492_v57 = vmul.f32 0.044715, %v1460_v63  ;;  %2358 = vmatprep.mubr.f32.mxu0 %v2271_v14 }
 0x339   : > { %5045 = vst [vmem:[#allocation44_spill] sm:$0xff] %v4266_v38  ;;  %v1991_v44 = vmul.f32 %v4252_v59, %v4252_v59  ;;  %v4276_v3 = vadd.f32 %v4157_v40, %v1723_v52  ;;  %3153 = vtanh.f32 %v1551_v7  ;;  %v2051_v12 = vmul.f32 0.044715, %v2019_v28  ;;  %v4282_v54 = vpop.eup %3141  ;;  %v1390_v46 = vpop.f32.mrf.mxu0 }
 0x33a   : > { %v4254_v4 = vpop.f32.mrf.mxu1  ;;  %v2082_v43 = vadd.f32 %v2050_v21, %v4172_v56  ;;  %v1462_v19 = vmul.f32 %v1430_v15, %v4235_v32  ;;  %5047 = vst [vmem:[#allocation46_spill] sm:$0xff] %v4282_v54  ;;  %3155 = vtanh.f32 %v1552_v9  ;;  %v1493_v27 = vmul.f32 0.044715, %v1461_v25 }
 0x33b   : > { %5046 = vst [vmem:[#allocation45_spill] sm:$0xff] %v4276_v3  ;;  %v1983_v63 = vmul.f32 %v4198_v10, %v4198_v10  ;;  %v4289_v40 = vadd.f32 1.0, %v4177_v0  ;;  %3157 = vtanh.f32 %v1553_v48  ;;  %v1554_v7 = vmul.f32 0.7978846, %v1522_v50  ;;  %v2277_v48 = vld [vmem:[%s4940_s6 + $0x38] sm:$0xff]  ;;  %v1394_v45 = vpop.f32.mrf.mxu0 }
 0x33c   : > { %v4264_v24 = vpop.f32.mrf.mxu1  ;;  %v1523_v28 = vadd.f32 %v1491_v37, %v4189_v55  ;;  %v2054_v21 = vmul.f32 0.044715, %v2022_v22  ;;  %v4292_v14 = vpop.eup %3143  ;;  %v1524_v15 = vadd.f32 %v1492_v57, %v4195_v8  ;;  %v2023_v9 = vmul.f32 %v1991_v44, %v4252_v59  ;;  %2376 = vmatprep.mubr.f32.mxu1 %v2277_v48 }
 0x33d   : > { %5048 = vst [vmem:[#allocation47_spill] sm:$0xff] %v4289_v40  ;;  %5049 = vst [vmem:[#allocation48_spill] sm:$0xff] %v4292_v14  ;;  %v2014_v25 = vmul.f32 %v1982_v11, %v4175_v61  ;;  %v1988_v56 = vmul.f32 %v4276_v3, %v4276_v3  ;;  %v2083_v0 = vadd.f32 %v2051_v12, %v4201_v23  ;;  %v2114_v50 = vmul.f32 0.7978846, %v2082_v43 }
 0x33e   : > { %v4278_v20 = vpop.f32.mrf.mxu1  ;;  %v1494_v37 = vmul.f32 0.044715, %v1462_v19  ;;  %v4306_v22 = vadd.f32 %v1388_v42, %v3986_v30  ;;  %v1525_v57 = vadd.f32 %v1493_v27, %v4209_v17  ;;  %v2015_v11 = vmul.f32 %v1983_v63, %v4198_v10 }
 0x33f   : > { %v4311_v44 = vadd.f32 %v4166_v6, %v1723_v52  ;;  %v4315_v40 = vadd.f32 %v4211_v31, %v4232_v18  ;;  %v4319_v12 = vpop.eup %3145  ;;  %3159 = vtanh.f32 %v1554_v7  ;;  %v1555_v42 = vmul.f32 0.7978846, %v1523_v28 }
 0x340   : > { %v4286_v13 = vpop.f32.mrf.mxu1  ;;  %5052 = vst [vmem:[#allocation51_spill] sm:$0xff] %v4319_v12  ;;  %v2086_v43 = vadd.f32 %v2054_v21, %v4222_v62  ;;  %v4323_v19 = vadd.f32 %v1390_v46, %v3986_v30  ;;  %v1556_v27 = vmul.f32 0.7978846, %v1524_v15  ;;  %v2055_v63 = vmul.f32 0.044715, %v2023_v9  ;;  %v1396_v15 = vpop.f32.mrf.mxu0 }
 0x341   : > { %5050 = vst [vmem:[#allocation49_spill] sm:$0xff] %v4311_v44  ;;  %5051 = vst [vmem:[#allocation50_spill] sm:$0xff] %v4315_v40  ;;  %v2046_v52 = vmul.f32 0.044715, %v2014_v25  ;;  %v2020_v6 = vmul.f32 %v1988_v56, %v4276_v3  ;;  %v4328_v31 = vpop.eup %3147  ;;  %v4330_v23 = vmul.f32 0.7978846, %v2083_v0  ;;  %3161 = vtanh.f32 %v2114_v50 }
 0x342   : > { %v4299_v38 = vpop.f32.mrf.mxu1  ;;  %5053 = vst [vmem:[#allocation52_spill] sm:$0xff] %v4328_v31  ;;  %v1526_v7 = vadd.f32 %v1494_v37, %v4235_v32  ;;  %v1431_v28 = vmul.f32 %v4306_v22, %v4306_v22  ;;  %v1557_v21 = vmul.f32 0.7978846, %v1525_v57  ;;  %v2047_v30 = vmul.f32 0.044715, %v2015_v11 }
 0x343   : > { %5054 = vst [vmem:[#allocation53_spill] sm:$0xff] %v4330_v23  ;;  %v1989_v46 = vmul.f32 %v4311_v44, %v4311_v44  ;;  %v1992_v56 = vmul.f32 %v4315_v40, %v4315_v40  ;;  %v4341_v25 = vpop.eup %3149  ;;  %3163 = vtanh.f32 %v1555_v42  ;;  %v2118_v0 = vmul.f32 0.7978846, %v2086_v43  ;;  %v1715_v23 = vpop.permute.xlu0 %1714 }
 0x344   : > { %v4317_v54 = vpop.f32.mrf.mxu1  ;;  %5055 = vst [vmem:[#allocation54_spill] sm:$0xff] %v4341_v25  ;;  %v1432_v50 = vmul.f32 %v4323_v19, %v4323_v19  ;;  %v4346_v37 = vadd.f32 %v1394_v45, %v3984_v47  ;;  %3165 = vtanh.f32 %v1556_v27  ;;  %v2087_v57 = vadd.f32 %v2055_v63, %v4252_v59 }
 0x345   : > { %v2078_v11 = vadd.f32 %v2046_v52, %v4175_v61  ;;  %v2052_v62 = vmul.f32 0.044715, %v2020_v6  ;;  %v4352_v49 = vpop.eup %3151  ;;  %v1558_v12 = vmul.f32 0.7978846, %v1526_v7  ;;  %v1463_v42 = vmul.f32 %v1431_v28, %v4306_v22  ;;  %v1400_v7 = vpop.f32.mrf.mxu0 }
 0x346   : > { %v4326_v48 = vpop.f32.mrf.mxu1  ;;  %v4357_v43 = vadd.f32 %v4224_v53, %v4232_v18  ;;  %v1433_v45 = vmul.f32 %v4346_v37, %v4346_v37  ;;  %v4361_v27 = vpop.eup %3153  ;;  %3167 = vtanh.f32 %v1557_v21  ;;  %v4364_v63 = vadd.f32 %v2047_v30, %v4198_v10 }
 0x347   : > { %v2021_v52 = vmul.f32 %v1989_v46, %v4311_v44  ;;  %v2024_v6 = vmul.f32 %v1992_v56, %v4315_v40  ;;  %v4370_v28 = vpop.eup %3155  ;;  %3169 = vtanh.f32 %v2118_v0  ;;  %v1464_v53 = vmul.f32 %v1432_v50, %v4323_v19 }
 0x348   : > { %v4339_v9 = vpop.f32.mrf.mxu1  ;;  %5056 = vst [vmem:[#allocation55_spill] sm:$0xff] %v4357_v43  ;;  %5057 = vst [vmem:[#allocation56_spill] sm:$0xff] %v4364_v63  ;;  %v4374_v18 = vadd.f32 %v4115_v51, %v1715_v23  ;;  %v4378_v21 = vadd.f32 %v4242_v58, %v4067_v39  ;;  %v4380_v30 = vpop.eup %3157  ;;  %v2119_v46 = vmul.f32 0.7978846, %v2087_v57  ;;  %v2084_v56 = vadd.f32 %v2052_v62, %v4276_v3 }
 0x349   : > { %v1465_v10 = vmul.f32 %v1433_v45, %v4346_v37  ;;  %v4385_v59 = vadd.f32 %v1396_v15, %v3984_v47  ;;  %3171 = vtanh.f32 %v1558_v12  ;;  %v4389_v50 = vmul.f32 0.7978846, %v2078_v11  ;;  %v1402_v47 = vpop.f32.mrf.mxu0 }
 0x34a   : > { %v4350_v14 = vpop.f32.mrf.mxu1  ;;  %5058 = vst [vmem:[#allocation57_spill] sm:$0xff] %v4374_v18  ;;  %5059 = vst [vmem:[#allocation58_spill] sm:$0xff] %v4378_v21  ;;  %v1495_v51 = vmul.f32 0.044715, %v1463_v42  ;;  %v1993_v58 = vmul.f32 %v4357_v43, %v4357_v43  ;;  %v4393_v44 = vmul.f32 0.044715, %v2021_v52  ;;  %v4396_v57 = vadd.f32 %v4129_v26, %v1715_v23 }
 0x34b   : > { %5060 = vst [vmem:[#allocation59_spill] sm:$0xff] %v4389_v50  ;;  %v2056_v63 = vmul.f32 0.044715, %v2024_v6  ;;  %v1434_v62 = vmul.f32 %v4385_v59, %v4385_v59  ;;  %v1496_v15 = vmul.f32 0.044715, %v1464_v53  ;;  %v1984_v12 = vmul.f32 %v4374_v18, %v4374_v18 }
 0x34c   : > { %v4368_v61 = vpop.f32.mrf.mxu1  ;;  %5061 = vst [vmem:[#allocation60_spill] sm:$0xff] %v4393_v44  ;;  %5062 = vst [vmem:[#allocation61_spill] sm:$0xff] %v4396_v57  ;;  %v1994_v11 = vmul.f32 %v4378_v21, %v4378_v21  ;;  %v4406_v42 = vadd.f32 %v4254_v4, %v4067_v39  ;;  %v4408_v45 = vpop.eup %3159  ;;  %3173 = vtanh.f32 %v2119_v46  ;;  %v4410_v23 = vmul.f32 0.7978846, %v2084_v56 }
 0x34d   : > { %v1497_v26 = vmul.f32 0.044715, %v1465_v10  ;;  %v4413_v52 = vadd.f32 %v1400_v7, %v3988_v36  ;;  %v1527_v53 = vadd.f32 %v1495_v51, %v4306_v22  ;;  %v2025_v3 = vmul.f32 %v1993_v58, %v4357_v43 }
 0x34e   : > { %v4387_v0 = vpop.f32.mrf.mxu1  ;;  %5063 = vst [vmem:[#allocation62_spill] sm:$0xff] %v4406_v42  ;;  %5064 = vst [vmem:[#allocation63_spill] sm:$0xff] %v4410_v23  ;;  %v1466_v50 = vmul.f32 %v1434_v62, %v4385_v59  ;;  %v4421_v39 = vadd.f32 %v1402_v47, %v3988_v36  ;;  %v4423_v4 = vpop.eup %3161  ;;  %v2088_v46 = vadd.f32 %v2056_v63, %v4315_v40 }
 0x34f   : > { %5065 = vst [vmem:[#allocation64_spill] sm:$0xff] %v4423_v4  ;;  %v1985_v10 = vmul.f32 %v4396_v57, %v4396_v57  ;;  %v1995_v7 = vmul.f32 %v4406_v42, %v4406_v42  ;;  %v1435_v56 = vmul.f32 %v4413_v52, %v4413_v52  ;;  %v1528_v51 = vadd.f32 %v1496_v15, %v4323_v19 }
 0x350   : > { %v4415_v6 = vpop.f32.mrf.mxu1  ;;  %v2016_v58 = vmul.f32 %v1984_v12, %v4374_v18  ;;  %v2026_v36 = vmul.f32 %v1994_v11, %v4378_v21  ;;  %v1436_v62 = vmul.f32 %v4421_v39, %v4421_v39  ;;  %v4437_v47 = vpop.eup %3163  ;;  %v1529_v63 = vadd.f32 %v1497_v26, %v4346_v37 }
 0x351   : > { %v1467_v4 = vmul.f32 %v1435_v56, %v4413_v52  ;;  %v4443_v40 = vadd.f32 %v4264_v24, %v4186_v1  ;;  %v4447_v15 = vadd.f32 %v4278_v20, %v4186_v1  ;;  %v4451_v11 = vpop.eup %3165  ;;  %v1559_v23 = vmul.f32 0.7978846, %v1527_v53 }
 0x352   : > { %v4449_v12 = vpop.f32.mrf.mxu1  ;;  %v2057_v44 = vmul.f32 0.044715, %v2025_v3  ;;  %v1498_v18 = vmul.f32 0.044715, %v1466_v50  ;;  %v1468_v31 = vmul.f32 %v1436_v62, %v4421_v39  ;;  %v4455_v26 = vmul.f32 %v1985_v10, %v4396_v57 }
 0x353   : > { %5066 = vst [vmem:[#allocation65_spill] sm:$0xff] %v4443_v40  ;;  %5067 = vst [vmem:[#allocation66_spill] sm:$0xff] %v4447_v15  ;;  %v2027_v56 = vmul.f32 %v1995_v7, %v4406_v42  ;;  %v1499_v24 = vmul.f32 0.044715, %v1467_v4  ;;  %v4460_v5 = vadd.f32 %v4286_v13, %v4046_v16  ;;  %v4462_v20 = vpop.eup %3167  ;;  %v1560_v1 = vmul.f32 0.7978846, %v1528_v51 }
 0x354   : > { %5068 = vst [vmem:[#allocation67_spill] sm:$0xff] %v4455_v26  ;;  %v2058_v25 = vmul.f32 0.044715, %v2026_v36  ;;  %v1500_v55 = vmul.f32 0.044715, %v1468_v31  ;;  %v4466_v3 = vadd.f32 %v4299_v38, %v4046_v16  ;;  %v4468_v50 = vpop.eup %3169  ;;  %v1996_v4 = vmul.f32 %v4443_v40, %v4443_v40  ;;  %v4476_v7 = vpop.f32.mrf.mxu1 }
 0x355   : > { %5069 = vst [vmem:[#allocation68_spill] sm:$0xff] %v4460_v5  ;;  %5071 = vst [vmem:[#allocation70_spill] sm:$0xff] %v4468_v50  ;;  %v4470_v53 = vmul.f32 0.7978846, %v2088_v46  ;;  %v1561_v10 = vmul.f32 0.7978846, %v1529_v63  ;;  %v1997_v13 = vmul.f32 %v4447_v15, %v4447_v15  ;;  %3175 = vtanh.f32 %v1559_v23 }
 0x356   : > { %5070 = vst [vmem:[#allocation69_spill] sm:$0xff] %v4466_v3  ;;  %v4478_v51 = vmul.f32 0.044715, %v2016_v58  ;;  %v1530_v31 = vadd.f32 %v1498_v18, %v4385_v59  ;;  %v1532_v16 = vadd.f32 %v1500_v55, %v4421_v39  ;;  %v4482_v38 = vpop.eup %3171  ;;  %v2059_v46 = vmul.f32 0.044715, %v2027_v56 }
 0x357   : > { %5072 = vst [vmem:[#allocation71_spill] sm:$0xff] %v4470_v53  ;;  %v1531_v36 = vadd.f32 %v1499_v24, %v4413_v52  ;;  %v1998_v62 = vmul.f32 %v4460_v5, %v4460_v5  ;;  %v4489_v63 = vadd.f32 %v4317_v54, %v4150_v34  ;;  %3177 = vtanh.f32 %v1560_v1  ;;  %v1967_v54 = vpop.f32.mrf.mxu1 }
 0x358   : > { %5073 = vst [vmem:[#allocation72_spill] sm:$0xff] %v4478_v51  ;;  %v4492_v23 = vadd.f32 %v2057_v44, %v4357_v43  ;;  %v4495_v18 = vadd.f32 %v2058_v25, %v4378_v21  ;;  %v1999_v55 = vmul.f32 %v4466_v3, %v4466_v3  ;;  %3179 = vtanh.f32 %v1561_v10 }
 0x359   : > { %5074 = vst [vmem:[#allocation73_spill] sm:$0xff] %v4489_v63  ;;  %v2028_v58 = vmul.f32 %v1996_v4, %v4443_v40  ;;  %v2029_v56 = vmul.f32 %v1997_v13, %v4447_v15  ;;  %v2000_v24 = vmul.f32 %v4489_v63, %v4489_v63  ;;  %v4503_v50 = vpop.eup %3173  ;;  %v1562_v1 = vmul.f32 0.7978846, %v1530_v31 }
 0x35a   : > { %5075 = vst [vmem:[#allocation74_spill] sm:$0xff] %v4503_v50  ;;  %v1564_v44 = vmul.f32 0.7978846, %v1532_v16  ;;  %v4507_v25 = vadd.f32 %v4326_v48, %v4150_v34  ;;  %v4511_v43 = vadd.f32 %v4339_v9, %v4025_v35  ;;  %v2091_v10 = vadd.f32 %v2059_v46, %v4406_v42 }
 0x35b   : > { %v1563_v4 = vmul.f32 0.7978846, %v1531_v36  ;;  %v2030_v13 = vmul.f32 %v1998_v62, %v4460_v5  ;;  %v4517_v21 = vadd.f32 %v4350_v14, %v4025_v35  ;;  %v2031_v31 = vmul.f32 %v1999_v55, %v4466_v3  ;;  %v1971_v35 = vpop.f32.mrf.mxu1 }
 0x35c   : > { %5076 = vst [vmem:[#allocation75_spill] sm:$0xff] %v4507_v25  ;;  %5077 = vst [vmem:[#allocation76_spill] sm:$0xff] %v4511_v43  ;;  %v2032_v16 = vmul.f32 %v2000_v24, %v4489_v63  ;;  %v2001_v34 = vmul.f32 %v4507_v25, %v4507_v25  ;;  %v2002_v48 = vmul.f32 %v4511_v43, %v4511_v43  ;;  %v2060_v9 = vmul.f32 0.044715, %v2028_v58 }
 0x35d   : > { %5078 = vst [vmem:[#allocation77_spill] sm:$0xff] %v4517_v21  ;;  %v2061_v50 = vmul.f32 0.044715, %v2029_v56  ;;  %v2003_v46 = vmul.f32 %v4517_v21, %v4517_v21  ;;  %v4529_v36 = vadd.f32 %v4368_v61, %v4119_v33  ;;  %3181 = vtanh.f32 %v1564_v44 }
 0x35e   : > { %v2033_v14 = vmul.f32 %v2001_v34, %v4507_v25  ;;  %v2034_v62 = vmul.f32 %v2002_v48, %v4511_v43  ;;  %v4535_v55 = vadd.f32 %v4387_v0, %v4119_v33  ;;  %3183 = vtanh.f32 %v1563_v4  ;;  %v1973_v4 = vpop.f32.mrf.mxu1 }
 0x35f   : > { %5079 = vst [vmem:[#allocation78_spill] sm:$0xff] %v4529_v36  ;;  %v2062_v58 = vmul.f32 0.044715, %v2030_v13  ;;  %v2035_v56 = vmul.f32 %v2003_v46, %v4517_v21  ;;  %v2004_v24 = vmul.f32 %v4529_v36, %v4529_v36  ;;  %v2063_v42 = vmul.f32 0.044715, %v2031_v31 }
 0x360   : > { %5080 = vst [vmem:[#allocation79_spill] sm:$0xff] %v4535_v55  ;;  %v2064_v61 = vmul.f32 0.044715, %v2032_v16  ;;  %v2005_v44 = vmul.f32 %v4535_v55, %v4535_v55  ;;  %v4544_v34 = vadd.f32 %v4415_v6, %v4014_v2  ;;  %v2123_v48 = vmul.f32 0.7978846, %v2091_v10 }
 0x361   : > { %v2065_v57 = vmul.f32 0.044715, %v2033_v14  ;;  %v2036_v33 = vmul.f32 %v2004_v24, %v4529_v36  ;;  %v4549_v0 = vadd.f32 %v4449_v12, %v4014_v2  ;;  %v2093_v13 = vadd.f32 %v2061_v50, %v4447_v15 }
 0x362   : > { %5081 = vst [vmem:[#allocation80_spill] sm:$0xff] %v4544_v34  ;;  %v2066_v31 = vmul.f32 0.044715, %v2034_v62  ;;  %v2037_v16 = vmul.f32 %v2005_v44, %v4535_v55  ;;  %v2006_v46 = vmul.f32 %v4544_v34, %v4544_v34  ;;  %v4555_v51 = vpop.eup %3175  ;;  %3185 = vtanh.f32 %v1562_v1 }
 0x363   : > { %v2094_v6 = vadd.f32 %v2062_v58, %v4460_v5  ;;  %v2067_v10 = vmul.f32 0.044715, %v2035_v56  ;;  %v2007_v14 = vmul.f32 %v4549_v0, %v4549_v0  ;;  %v4561_v2 = vadd.f32 %v2060_v9, %v4443_v40  ;;  %v1977_v56 = vpop.f32.mrf.mxu1 }
 0x364   : > { %v2095_v12 = vadd.f32 %v2063_v42, %v4466_v3  ;;  %v2096_v50 = vadd.f32 %v2064_v61, %v4489_v63  ;;  %v2068_v62 = vmul.f32 0.044715, %v2036_v33  ;;  %v4565_v24 = vpop.eup %3177  ;;  %3187 = vtanh.f32 %v2123_v48 }
 0x365   : > { %v2097_v44 = vadd.f32 %v2065_v57, %v4507_v25  ;;  %v2069_v1 = vmul.f32 0.044715, %v2037_v16  ;;  %v4570_v58 = vadd.f32 %v4476_v7, %v4006_v41  ;;  %v4572_v15 = vpop.eup %3179  ;;  %v4574_v9 = vmul.f32 0.7978846, %v2093_v13 }
 0x366   : > { %v2098_v42 = vadd.f32 %v2066_v31, %v4511_v43  ;;  %v2038_v61 = vmul.f32 %v2006_v46, %v4544_v34  ;;  %v4579_v33 = vadd.f32 %v1967_v54, %v4006_v41  ;;  %v4581_v48 = vmul.f32 0.7978846, %v2094_v6 }
 0x367   : > { %v2099_v57 = vadd.f32 %v2067_v10, %v4517_v21  ;;  %v2039_v16 = vmul.f32 %v2007_v14, %v4549_v0  ;;  %v2008_v7 = vmul.f32 %v4570_v58, %v4570_v58  ;;  %v4587_v40 = vmul.f32 0.7978846, %v2095_v12  ;;  %v1979_v14 = vpop.f32.mrf.mxu1 }
 0x368   : > { %v4589_v13 = vmul.f32 0.7978846, %v2096_v50  ;;  %v2100_v31 = vadd.f32 %v2068_v62, %v4529_v36  ;;  %v2009_v46 = vmul.f32 %v4579_v33, %v4579_v33  ;;  %v4594_v41 = vmul.f32 0.7978846, %v2097_v44 }
 0x369   : > { %v2101_v54 = vadd.f32 %v2069_v1, %v4535_v55  ;;  %v2040_v6 = vmul.f32 %v2008_v7, %v4570_v58  ;;  %v4599_v10 = vadd.f32 %v1971_v35, %v4089_v29  ;;  %v4601_v5 = vmul.f32 0.7978846, %v2098_v42 }
 0x36a   : > { %v2070_v12 = vmul.f32 0.044715, %v2038_v61  ;;  %v2041_v50 = vmul.f32 %v2009_v46, %v4579_v33  ;;  %v4605_v62 = vadd.f32 %v1973_v4, %v4089_v29  ;;  %v3182_v3 = vpop.eup %3181  ;;  %v4607_v63 = vmul.f32 0.7978846, %v2099_v57 }
 0x36b   : > { %v2071_v44 = vmul.f32 0.044715, %v2039_v16  ;;  %v2010_v1 = vmul.f32 %v4599_v10, %v4599_v10  ;;  %v4612_v7 = vadd.f32 %v1977_v56, %v4004_v60  ;;  %v3184_v35 = vpop.eup %3183  ;;  %v4614_v25 = vmul.f32 0.7978846, %v2100_v31 }
 0x36c   : > { %v2072_v42 = vmul.f32 0.044715, %v2040_v6  ;;  %v2011_v61 = vmul.f32 %v4605_v62, %v4605_v62  ;;  %v4619_v29 = vadd.f32 %v1979_v14, %v4004_v60  ;;  %v4621_v4 = vmul.f32 0.7978846, %v2101_v54 }
 0x36d   : > { %v2073_v57 = vmul.f32 0.044715, %v2041_v50  ;;  %v2042_v16 = vmul.f32 %v2010_v1, %v4599_v10  ;;  %v2012_v46 = vmul.f32 %v4612_v7, %v4612_v7  ;;  %v2102_v56 = vadd.f32 %v2070_v12, %v4544_v34 }
 0x36e   : > { %v2043_v31 = vmul.f32 %v2011_v61, %v4605_v62  ;;  %v2013_v6 = vmul.f32 %v4619_v29, %v4619_v29  ;;  %v1628_v43 = vadd.f32 1.0, %v3182_v3  ;;  %v2103_v21 = vadd.f32 %v2071_v44, %v4549_v0 }
 0x36f   : > { %v2074_v60 = vmul.f32 0.044715, %v2042_v16  ;;  %v2044_v54 = vmul.f32 %v2012_v46, %v4612_v7  ;;  %v1627_v14 = vadd.f32 1.0, %v3184_v35  ;;  %v3186_v50 = vpop.eup %3185  ;;  %v2104_v1 = vadd.f32 %v2072_v42, %v4570_v58 }
 0x370   : > { %v2075_v36 = vmul.f32 0.044715, %v2043_v31  ;;  %v2045_v55 = vmul.f32 %v2013_v6, %v4619_v29  ;;  %v1660_v53 = vmul.f32 0.5, %v1628_v43  ;;  %v2105_v12 = vadd.f32 %v2073_v57, %v4579_v33 }
 0x371   : > { %v2106_v61 = vadd.f32 %v2074_v60, %v4599_v10  ;;  %v2076_v34 = vmul.f32 0.044715, %v2044_v54  ;;  %v1659_v26 = vmul.f32 0.5, %v1627_v14  ;;  %v4636_v3 = vpop.eup %3187  ;;  %v4638_v44 = vmul.f32 0.7978846, %v2102_v56 }
 0x372   : > { %v2107_v16 = vadd.f32 %v2075_v36, %v4605_v62  ;;  %v2077_v35 = vmul.f32 0.044715, %v2045_v55  ;;  %v1692_v46 = vmul.f32 %v1660_v53, %v4421_v39  ;;  %v4642_v42 = vmul.f32 0.7978846, %v2103_v21 }
 0x373   : > { %v2108_v31 = vadd.f32 %v2076_v34, %v4612_v7  ;;  %v1691_v43 = vmul.f32 %v1659_v26, %v4413_v52  ;;  %v1626_v57 = vadd.f32 1.0, %v3186_v50  ;;  %v4646_v6 = vmul.f32 0.7978846, %v2104_v1 }
 0x374   : > { %v2109_v60 = vadd.f32 %v2077_v35, %v4619_v29  ;;  %2294 = vmatprep.subr.mxu0 %v1692_v46  ;;  %2904 = vmatprep.subr.mxu1 %v1692_v46  ;;  %v1625_v56 = vadd.f32 1.0, %v4572_v15  ;;  %v1624_v36 = vadd.f32 1.0, %v4565_v24  ;;  %v4651_v55 = vmul.f32 0.7978846, %v2105_v12 }
 0x375   : > { %v2138_v39 = vmul.f32 0.7978846, %v2106_v61  ;;  %2295 = vmatpush1.msra.mxu0 %v1691_v43  ;;  %2936 = vmatpush1.msra.mxu1 %v1691_v43  ;;  %v1658_v21 = vmul.f32 0.5, %v1626_v57  ;;  %v1623_v53 = vadd.f32 1.0, %v4555_v51  ;;  %v2139_v52 = vmul.f32 0.7978846, %v2107_v16 }
 0x376   : > { %v2141_v26 = vmul.f32 0.7978846, %v2109_v60  ;;  %v1657_v34 = vmul.f32 0.5, %v1625_v56  ;;  %v1656_v54 = vmul.f32 0.5, %v1624_v36  ;;  %v2140_v14 = vmul.f32 0.7978846, %v2108_v31 }
 0x377   : > { %v1690_v50 = vmul.f32 %v1658_v21, %v4385_v59  ;;  %v1655_v1 = vmul.f32 0.5, %v1623_v53  ;;  %v1622_v15 = vadd.f32 1.0, %v4482_v38  ;;  %v1621_v61 = vadd.f32 1.0, %v4462_v20  ;;  %v5083_v56 = vld [vmem:[#allocation54_spill] sm:$0xff]  ;;  %v5085_v53 = vld [vmem:[#allocation52_spill] sm:$0xff] }
 0x378   : > { %3189 = vtanh.f32 %v2141_v26  ;;  %v1689_v24 = vmul.f32 %v1657_v34, %v4346_v37  ;;  %v1688_v12 = vmul.f32 %v1656_v54, %v4323_v19  ;;  %v1620_v35 = vadd.f32 1.0, %v4451_v11  ;;  %v5086_v26 = vld [vmem:[#allocation51_spill] sm:$0xff] }
 0x379   : > { %2296 = vmatprep.subr.mxu0 %v1690_v50  ;;  %2905 = vmatprep.subr.mxu1 %v1690_v50  ;;  %v1687_v51 = vmul.f32 %v1655_v1, %v4306_v22  ;;  %v1654_v16 = vmul.f32 0.5, %v1622_v15  ;;  %v1619_v46 = vadd.f32 1.0, %v4437_v47  ;;  %v1653_v59 = vmul.f32 0.5, %v1621_v61  ;;  %v5089_v1 = vld [vmem:[#allocation46_spill] sm:$0xff] }
 0x37a   : > { %2297 = vmatpush1.msra.mxu0 %v1689_v24  ;;  %2937 = vmatpush1.msra.mxu1 %v1689_v24  ;;  %v1618_v38 = vadd.f32 1.0, %v4408_v45  ;;  %v1617_v37 = vadd.f32 1.0, %v4380_v30  ;;  %v1616_v19 = vadd.f32 1.0, %v4370_v28  ;;  %v1652_v31 = vmul.f32 0.5, %v1620_v35  ;;  %v5090_v24 = vld [vmem:[#allocation24_spill] sm:$0xff]  ;;  %v5092_v35 = vld [vmem:[#allocation23_spill] sm:$0xff] }
 0x37b   : > { %2298 = vmatprep.subr.mxu0 %v1688_v12  ;;  %2906 = vmatprep.subr.mxu1 %v1688_v12  ;;  %v1686_v20 = vmul.f32 %v1654_v16, %v4235_v32  ;;  %v1651_v22 = vmul.f32 0.5, %v1619_v46  ;;  %v1615_v43 = vadd.f32 1.0, %v4361_v27  ;;  %3191 = vtanh.f32 %v2138_v39  ;;  %v5082_v32 = vld [vmem:[#allocation32_spill] sm:$0xff] }
 0x37c   : > { %2299 = vmatpush1.msra.mxu0 %v1687_v51  ;;  %2938 = vmatpush1.msra.mxu1 %v1687_v51  ;;  %v1685_v47 = vmul.f32 %v1653_v59, %v4209_v17  ;;  %v1650_v11 = vmul.f32 0.5, %v1618_v38  ;;  %v1649_v57 = vmul.f32 0.5, %v1617_v37  ;;  %3193 = vtanh.f32 %v2139_v52  ;;  %v5084_v17 = vld [vmem:[#allocation27_spill] sm:$0xff]  ;;  %v5091_v51 = vld [vmem:[#allocation44_spill] sm:$0xff] }
 0x37d   : > { %2300 = vmatprep.subr.mxu0 %v1686_v20  ;;  %2907 = vmatprep.subr.mxu1 %v1686_v20  ;;  %v1684_v28 = vmul.f32 %v1652_v31, %v4195_v8  ;;  %v1648_v30 = vmul.f32 0.5, %v1616_v19  ;;  %v1614_v45 = vadd.f32 1.0, %v4352_v49  ;;  %3195 = vtanh.f32 %v2140_v14  ;;  %v5087_v49 = vld [vmem:[#allocation25_spill] sm:$0xff]  ;;  %v5088_v14 = vld [vmem:[#allocation48_spill] sm:$0xff]  ;;  %v5093_v38 = vld [vmem:[#allocation43_spill] sm:$0xff] }
 0x37e   : > { %2301 = vmatpush1.msra.mxu0 %v1685_v47  ;;  %2939 = vmatpush1.msra.mxu1 %v1685_v47  ;;  %v1683_v27 = vmul.f32 %v1651_v22, %v5082_v32  ;;  %v1647_v60 = vmul.f32 0.5, %v1615_v43  ;;  %v1613_v36 = vadd.f32 1.0, %v5083_v56  ;;  %v1682_v39 = vmul.f32 %v1650_v11, %v5084_v17  ;;  %v5095_v31 = vld [vmem:[#allocation41_spill] sm:$0xff]  ;;  %v5097_v11 = vld [vmem:[#allocation40_spill] sm:$0xff]  ;;  %v5099_v32 = vld [vmem:[#allocation39_spill] sm:$0xff] }
 0x37f   : > { %2302 = vmatprep.subr.mxu0 %v1684_v28  ;;  %2908 = vmatprep.subr.mxu1 %v1684_v28  ;;  %v1646_v21 = vmul.f32 0.5, %v1614_v45  ;;  %v1612_v52 = vadd.f32 1.0, %v5085_v53  ;;  %v1611_v8 = vadd.f32 1.0, %v5086_v26  ;;  %v1681_v34 = vmul.f32 %v1649_v57, %v5087_v49  ;;  %v5103_v53 = vld [vmem:[#allocation36_spill] sm:$0xff]  ;;  %v5105_v49 = vld [vmem:[#allocation33_spill] sm:$0xff] }
 0x380   : > { %2303 = vmatpush1.msra.mxu0 %v1683_v27  ;;  %2940 = vmatpush1.msra.mxu1 %v1683_v27  ;;  %v1645_v54 = vmul.f32 0.5, %v1613_v36  ;;  %v1610_v50 = vadd.f32 1.0, %v5088_v14  ;;  %v1609_v15 = vadd.f32 1.0, %v5089_v1  ;;  %3197 = vtanh.f32 %v4651_v55  ;;  %v5094_v55 = vld [vmem:[#allocation22_spill] sm:$0xff]  ;;  %v5101_v36 = vld [vmem:[#allocation37_spill] sm:$0xff]  ;;  %v5107_v1 = vld [vmem:[#allocation31_spill] sm:$0xff] }
 0x381   : > { %2304 = vmatprep.subr.mxu0 %v1682_v39  ;;  %2909 = vmatprep.subr.mxu1 %v1682_v39  ;;  %v1680_v12 = vmul.f32 %v1648_v30, %v5090_v24  ;;  %v1644_v61 = vmul.f32 0.5, %v1612_v52  ;;  %v1608_v16 = vadd.f32 1.0, %v5091_v51  ;;  %3199 = vtanh.f32 %v4646_v6  ;;  %v5096_v6 = vld [vmem:[#allocation21_spill] sm:$0xff] }
 0x382   : > { %2305 = vmatpush1.msra.mxu0 %v1681_v34  ;;  %2941 = vmatpush1.msra.mxu1 %v1681_v34  ;;  %v1679_v46 = vmul.f32 %v1647_v60, %v5092_v35  ;;  %v1643_v59 = vmul.f32 0.5, %v1611_v8  ;;  %v1607_v37 = vadd.f32 1.0, %v5093_v38  ;;  %3201 = vtanh.f32 %v4642_v42  ;;  %v5098_v42 = vld [vmem:[#allocation20_spill] sm:$0xff] }
 0x383   : > { %2306 = vmatprep.subr.mxu0 %v1680_v12  ;;  %2910 = vmatprep.subr.mxu1 %v1680_v12  ;;  %v1678_v19 = vmul.f32 %v1646_v21, %v5094_v55  ;;  %v1642_v20 = vmul.f32 0.5, %v1610_v50  ;;  %v1606_v22 = vadd.f32 1.0, %v5095_v31  ;;  %3203 = vtanh.f32 %v4638_v44  ;;  %v5100_v44 = vld [vmem:[#allocation19_spill] sm:$0xff] }
 0x384   : > { %2307 = vmatpush1.msra.mxu0 %v1679_v46  ;;  %2942 = vmatpush1.msra.mxu1 %v1679_v46  ;;  %v1677_v43 = vmul.f32 %v1645_v54, %v5096_v6  ;;  %v1641_v47 = vmul.f32 0.5, %v1609_v15  ;;  %v1605_v57 = vadd.f32 1.0, %v5097_v11  ;;  %3205 = vtanh.f32 %v4621_v4  ;;  %v5102_v4 = vld [vmem:[#allocation18_spill] sm:$0xff]  ;;  %v5108_v12 = vld [vmem:[#allocation15_spill] sm:$0xff] }
 0x385   : > { %v3190_v28 = vpop.eup %3189  ;;  %2308 = vmatprep.subr.mxu0 %v1678_v19  ;;  %2911 = vmatprep.subr.mxu1 %v1678_v19  ;;  %v1676_v30 = vmul.f32 %v1644_v61, %v5098_v42  ;;  %v1640_v45 = vmul.f32 0.5, %v1608_v16  ;;  %v1604_v27 = vadd.f32 1.0, %v5099_v32  ;;  %3207 = vtanh.f32 %v4614_v25  ;;  %v5104_v25 = vld [vmem:[#allocation17_spill] sm:$0xff] }
 0x386   : > { %2309 = vmatpush1.msra.mxu0 %v1677_v43  ;;  %2943 = vmatpush1.msra.mxu1 %v1677_v43  ;;  %v1675_v60 = vmul.f32 %v1643_v59, %v5100_v44  ;;  %v1639_v56 = vmul.f32 0.5, %v1607_v37  ;;  %v1603_v17 = vadd.f32 1.0, %v5101_v36  ;;  %3209 = vtanh.f32 %v4607_v63  ;;  %v5106_v63 = vld [vmem:[#allocation16_spill] sm:$0xff]  ;;  %v5118_v36 = vld [vmem:[#allocation67_spill] sm:$0xff] }
 0x387   : > { %2310 = vmatprep.subr.mxu0 %v1676_v30  ;;  %2912 = vmatprep.subr.mxu1 %v1676_v30  ;;  %v1674_v39 = vmul.f32 %v1642_v20, %v5102_v4  ;;  %v1638_v21 = vmul.f32 0.5, %v1606_v22  ;;  %v1602_v52 = vadd.f32 1.0, %v5103_v53  ;;  %3211 = vtanh.f32 %v4601_v5  ;;  %v5113_v22 = vld [vmem:[#allocation47_spill] sm:$0xff]  ;;  %v5119_v4 = vld [vmem:[#allocation8_spill] sm:$0xff] }
 0x388   : > { %2311 = vmatpush1.msra.mxu0 %v1675_v60  ;;  %2944 = vmatpush1.msra.mxu1 %v1675_v60  ;;  %v1673_v26 = vmul.f32 %v1641_v47, %v5104_v25  ;;  %v1637_v8 = vmul.f32 0.5, %v1605_v57  ;;  %v1601_v34 = vadd.f32 1.0, %v5105_v49  ;;  %v3192_v54 = vpop.eup %3191  ;;  %3213 = vtanh.f32 %v4594_v41  ;;  %v5109_v41 = vld [vmem:[#allocation14_spill] sm:$0xff]  ;;  %v5121_v25 = vld [vmem:[#allocation7_spill] sm:$0xff] }
 0x389   : > { %2312 = vmatprep.subr.mxu0 %v1674_v39  ;;  %2913 = vmatprep.subr.mxu1 %v1674_v39  ;;  %v1672_v14 = vmul.f32 %v1640_v45, %v5106_v63  ;;  %v1636_v50 = vmul.f32 0.5, %v1604_v27  ;;  %v1600_v15 = vadd.f32 1.0, %v5107_v1  ;;  %v3194_v24 = vpop.eup %3193  ;;  %v2124_v5 = vmul.f32 0.7978846, %v4561_v2  ;;  %v5110_v2 = vld [vmem:[#allocation13_spill] sm:$0xff]  ;;  %v5117_v27 = vld [vmem:[#allocation26_spill] sm:$0xff] }
 0x38a   : > { %3215 = vtanh.f32 %v4589_v13  ;;  %2313 = vmatpush1.msra.mxu0 %v1673_v26  ;;  %2945 = vmatpush1.msra.mxu1 %v1673_v26  ;;  %v1671_v61 = vmul.f32 %v1639_v56, %v5108_v12  ;;  %v1635_v51 = vmul.f32 0.5, %v1603_v17  ;;  %v3196_v16 = vpop.eup %3195  ;;  %v1670_v35 = vmul.f32 %v1638_v21, %v5109_v41  ;;  %v5116_v45 = vld [vmem:[#allocation9_spill] sm:$0xff] }
 0x38b   : > { %3217 = vtanh.f32 %v4587_v40  ;;  %2314 = vmatprep.subr.mxu0 %v1672_v14  ;;  %2914 = vmatprep.subr.mxu1 %v1672_v14  ;;  %v1634_v46 = vmul.f32 0.5, %v1602_v52  ;;  %v2205_v59 = vadd.f32 1.0, %v3190_v28  ;;  %v2122_v38 = vmul.f32 0.7978846, %v4495_v18  ;;  %v5111_v40 = vld [vmem:[#allocation12_spill] sm:$0xff]  ;;  %v5112_v18 = vld [vmem:[#allocation11_spill] sm:$0xff] }
 0x38c   : > { %3219 = vtanh.f32 %v4581_v48  ;;  %2315 = vmatpush1.msra.mxu0 %v1671_v61  ;;  %2946 = vmatpush1.msra.mxu1 %v1671_v61  ;;  %v1669_v13 = vmul.f32 %v1637_v8, %v5110_v2  ;;  %v1633_v37 = vmul.f32 0.5, %v1601_v34  ;;  %v2121_v55 = vmul.f32 0.7978846, %v4492_v23  ;;  %v5114_v23 = vld [vmem:[#allocation10_spill] sm:$0xff]  ;;  %v5120_v52 = vld [vmem:[#allocation71_spill] sm:$0xff]  ;;  %v5125_v61 = vld [vmem:[#allocation5_spill] sm:$0xff] }
 0x38d   : > { %3221 = vtanh.f32 %v4574_v9  ;;  %2316 = vmatprep.subr.mxu0 %v1670_v35  ;;  %2915 = vmatprep.subr.mxu1 %v1670_v35  ;;  %v1668_v19 = vmul.f32 %v1636_v50, %v5111_v40  ;;  %v1632_v20 = vmul.f32 0.5, %v1600_v15  ;;  %v3198_v31 = vpop.eup %3197  ;;  %v1667_v48 = vmul.f32 %v1635_v51, %v5112_v18  ;;  %v5115_v9 = vld [vmem:[#allocation28_spill] sm:$0xff]  ;;  %v5129_v40 = vld [vmem:[#allocation63_spill] sm:$0xff] }
 0x38e   : > { %3223 = vtanh.f32 %v2124_v5  ;;  %2317 = vmatpush1.msra.mxu0 %v1669_v13  ;;  %2947 = vmatpush1.msra.mxu1 %v1669_v13  ;;  %v1631_v6 = vmul.f32 0.5, %v5113_v22  ;;  %v2204_v43 = vadd.f32 1.0, %v3196_v16  ;;  %v3200_v47 = vpop.eup %3199  ;;  %v1666_v11 = vmul.f32 %v1634_v46, %v5114_v23  ;;  %v5124_v5 = vld [vmem:[#allocation72_spill] sm:$0xff] }
 0x38f   : > { %2318 = vmatprep.subr.mxu0 %v1668_v19  ;;  %2916 = vmatprep.subr.mxu1 %v1668_v19  ;;  %v1630_v57 = vmul.f32 0.5, %v5115_v9  ;;  %v2237_v28 = vmul.f32 0.5, %v2205_v59  ;;  %v2203_v42 = vadd.f32 1.0, %v3194_v24  ;;  %v3202_v30 = vpop.eup %3201  ;;  %3225 = vtanh.f32 %v2122_v38  ;;  %v5123_v24 = vld [vmem:[#allocation57_spill] sm:$0xff]  ;;  %v5126_v46 = vld [vmem:[#allocation56_spill] sm:$0xff] }
 0x390   : > { %2319 = vmatpush1.msra.mxu0 %v1667_v48  ;;  %2948 = vmatpush1.msra.mxu1 %v1667_v48  ;;  %v1665_v32 = vmul.f32 %v1633_v37, %v5116_v45  ;;  %v1629_v44 = vmul.f32 0.5, %v5117_v27  ;;  %v2202_v60 = vadd.f32 1.0, %v3192_v54  ;;  %v3204_v56 = vpop.eup %3203  ;;  %3227 = vtanh.f32 %v2121_v55  ;;  %v5122_v54 = vld [vmem:[#allocation6_spill] sm:$0xff]  ;;  %v5127_v38 = vld [vmem:[#allocation49_spill] sm:$0xff]  ;;  %v5128_v2 = vld [vmem:[#allocation60_spill] sm:$0xff] }
 0x391   : > { %v2049_v17 = vmul.f32 0.044715, %v5118_v36  ;;  %2320 = vmatprep.subr.mxu0 %v1666_v11  ;;  %2917 = vmatprep.subr.mxu1 %v1666_v11  ;;  %v1664_v39 = vmul.f32 %v1632_v20, %v5119_v4  ;;  %v2201_v21 = vadd.f32 1.0, %v3198_v31  ;;  %v3206_v53 = vpop.eup %3205  ;;  %3229 = vtanh.f32 %v5120_v52  ;;  %v5130_v48 = vld [vmem:[#allocation61_spill] sm:$0xff] }
 0x392   : > { %2321 = vmatpush1.msra.mxu0 %v1665_v32  ;;  %2949 = vmatpush1.msra.mxu1 %v1665_v32  ;;  %v1663_v26 = vmul.f32 %v1631_v6, %v5121_v25  ;;  %v2236_v8 = vmul.f32 0.5, %v2204_v43  ;;  %v2200_v49 = vadd.f32 1.0, %v3200_v47  ;;  %v3208_v34 = vpop.eup %3207  ;;  %v1662_v63 = vmul.f32 %v1630_v57, %v5122_v54 }
 0x393   : > { %2322 = vmatprep.subr.mxu0 %v1664_v39  ;;  %2918 = vmatprep.subr.mxu1 %v1664_v39  ;;  %v2269_v14 = vmul.f32 %v2237_v28, %v4619_v29  ;;  %v2235_v50 = vmul.f32 0.5, %v2203_v42  ;;  %v2199_v1 = vadd.f32 1.0, %v3202_v30  ;;  %v3210_v15 = vpop.eup %3209  ;;  %v2080_v12 = vadd.f32 %v5124_v5, %v5123_v24 }
 0x394   : > { %2323 = vmatpush1.msra.mxu0 %v1663_v26  ;;  %2950 = vmatpush1.msra.mxu1 %v1663_v26  ;;  %v1661_v51 = vmul.f32 %v1629_v44, %v5125_v61  ;;  %v2234_v16 = vmul.f32 0.5, %v2202_v60  ;;  %v2198_v41 = vadd.f32 1.0, %v3204_v56  ;;  %v3212_v35 = vpop.eup %3211  ;;  %v4732_v59 = vmul.f32 0.7978846, %v5126_v46  ;;  %v5138_v46 = vld [vmem:[#allocation75_spill] sm:$0xff] }
 0x395   : > { %v2085_v13 = vadd.f32 %v5128_v2, %v5127_v38  ;;  %2324 = vmatprep.subr.mxu0 %v1662_v63  ;;  %2919 = vmatprep.subr.mxu1 %v1662_v63  ;;  %v2233_v29 = vmul.f32 0.5, %v2201_v21  ;;  %v2197_v37 = vadd.f32 1.0, %v3206_v53  ;;  %v3214_v55 = vpop.eup %3213  ;;  %3231 = vtanh.f32 %v5129_v40 }
 0x396   : > { %2325 = vmatpush1.msra.mxu0 %v1661_v51  ;;  %2951 = vmatpush1.msra.mxu1 %v1661_v51  ;;  %v2268_v19 = vmul.f32 %v2236_v8, %v4612_v7  ;;  %v2232_v20 = vmul.f32 0.5, %v2200_v49  ;;  %v2196_v31 = vadd.f32 1.0, %v3208_v34  ;;  %v2081_v22 = vadd.f32 %v2049_v17, %v5130_v48  ;;  %v5137_v51 = vld [vmem:[#allocation76_spill] sm:$0xff] }
 0x397   : > { %v3216_v18 = vpop.eup %3215  ;;  %2326 = vmatprep.subr.mxu0 %v2269_v14  ;;  %2920 = vmatprep.subr.mxu1 %v2269_v14  ;;  %v2267_v6 = vmul.f32 %v2235_v50, %v4605_v62  ;;  %v2231_v43 = vmul.f32 0.5, %v2199_v1  ;;  %v2195_v47 = vadd.f32 1.0, %v3210_v15  ;;  %v2112_v11 = vmul.f32 0.7978846, %v2080_v12  ;;  %v5131_v62 = vld [vmem:[#allocation59_spill] sm:$0xff]  ;;  %v5135_v50 = vld [vmem:[#allocation53_spill] sm:$0xff] }
 0x398   : > { %v3218_v23 = vpop.eup %3217  ;;  %2327 = vmatpush2.msra.mxu0 %v2268_v19  ;;  %2952 = vmatpush2.msra.mxu1 %v2268_v19  ;;  %v2266_v9 = vmul.f32 %v2234_v16, %v4599_v10  ;;  %v2230_v57 = vmul.f32 0.5, %v2198_v41  ;;  %v2194_v28 = vadd.f32 1.0, %v3212_v35  ;;  %v2117_v42 = vmul.f32 0.7978846, %v2085_v13  ;;  %v5136_v15 = vld [vmem:[#allocation77_spill] sm:$0xff] }
 0x399   : > { %v3220_v7 = vpop.eup %3219  ;;  %2328 = vmatprep.subr.mxu0 %v2267_v6  ;;  %2921 = vmatprep.subr.mxu1 %v2267_v6  ;;  %v2265_v30 = vmul.f32 %v2233_v29, %v4579_v33  ;;  %v2229_v45 = vmul.f32 0.5, %v2197_v37  ;;  %v2193_v32 = vadd.f32 1.0, %v3214_v55  ;;  %3233 = vtanh.f32 %v5131_v62  ;;  %v5132_v33 = vld [vmem:[#allocation80_spill] sm:$0xff]  ;;  %v5139_v37 = vld [vmem:[#allocation73_spill] sm:$0xff]  ;;  %v5142_v6 = vld [vmem:[#allocation70_spill] sm:$0xff] }
 0x39a   : > { %v3222_v27 = vpop.eup %3221  ;;  %2329 = vmatpush2.msra.mxu0 %v2266_v9  ;;  %2953 = vmatpush2.msra.mxu1 %v2266_v9  ;;  %v2264_v44 = vmul.f32 %v2232_v20, %v4570_v58  ;;  %v2228_v60 = vmul.f32 0.5, %v2196_v31  ;;  %v2192_v56 = vadd.f32 1.0, %v3216_v18  ;;  %v2113_v36 = vmul.f32 0.7978846, %v2081_v22  ;;  %v5133_v58 = vld [vmem:[#allocation79_spill] sm:$0xff]  ;;  %v5140_v20 = vld [vmem:[#allocation69_spill] sm:$0xff] }
 0x39b   : > { %v3224_v10 = vpop.eup %3223  ;;  %2330 = vmatprep.subr.mxu0 %v2265_v30  ;;  %2922 = vmatprep.subr.mxu1 %v2265_v30  ;;  %v2263_v17 = vmul.f32 %v2231_v43, %v4549_v0  ;;  %v2227_v4 = vmul.f32 0.5, %v2195_v47  ;;  %v2191_v39 = vadd.f32 1.0, %v3218_v23  ;;  %3235 = vtanh.f32 %v2112_v11  ;;  %v5134_v0 = vld [vmem:[#allocation78_spill] sm:$0xff]  ;;  %v5143_v47 = vld [vmem:[#allocation68_spill] sm:$0xff] }
 0x39c   : > { %2331 = vmatpush2.msra.mxu0 %v2264_v44  ;;  %2954 = vmatpush2.msra.mxu1 %v2264_v44  ;;  %v2262_v21 = vmul.f32 %v2230_v57, %v5132_v33  ;;  %v2226_v53 = vmul.f32 0.5, %v2194_v28  ;;  %v2190_v52 = vadd.f32 1.0, %v3220_v7  ;;  %v3226_v25 = vpop.eup %3225  ;;  %v2261_v26 = vmul.f32 %v2229_v45, %v5133_v58  ;;  %v5141_v22 = vld [vmem:[#allocation74_spill] sm:$0xff]  ;;  %v5145_v7 = vld [vmem:[#allocation65_spill] sm:$0xff] }
 0x39d   : > { %2332 = vmatprep.subr.mxu0 %v2263_v17  ;;  %2923 = vmatprep.subr.mxu1 %v2263_v17  ;;  %v2225_v8 = vmul.f32 0.5, %v2193_v32  ;;  %v2189_v49 = vadd.f32 1.0, %v3222_v27  ;;  %3237 = vtanh.f32 %v2117_v42  ;;  %v3228_v34 = vpop.eup %3227  ;;  %v2260_v54 = vmul.f32 %v2228_v60, %v5134_v0  ;;  %v5144_v9 = vld [vmem:[#allocation66_spill] sm:$0xff]  ;;  %v5148_v17 = vld [vmem:[#allocation55_spill] sm:$0xff] }
 0x39e   : > { %2333 = vmatpush2.msra.mxu0 %v2262_v21  ;;  %2955 = vmatpush2.msra.mxu1 %v2262_v21  ;;  %v2224_v63 = vmul.f32 0.5, %v2192_v56  ;;  %v2188_v14 = vadd.f32 1.0, %v3224_v10  ;;  %3239 = vtanh.f32 %v5135_v50  ;;  %v3230_v1 = vpop.eup %3229  ;;  %v2259_v5 = vmul.f32 %v2227_v4, %v5136_v15  ;;  %v5146_v32 = vld [vmem:[#allocation62_spill] sm:$0xff] }
 0x39f   : > { %2334 = vmatprep.subr.mxu0 %v2261_v26  ;;  %2924 = vmatprep.subr.mxu1 %v2261_v26  ;;  %v2223_v12 = vmul.f32 0.5, %v2191_v39  ;;  %v2187_v61 = vadd.f32 1.0, %v4636_v3  ;;  %3241 = vtanh.f32 %v2113_v36  ;;  %v2258_v16 = vmul.f32 %v2226_v53, %v5137_v51  ;;  %v5147_v60 = vld [vmem:[#allocation58_spill] sm:$0xff]  ;;  %v5150_v53 = vld [vmem:[#allocation64_spill] sm:$0xff] }
 0x3a0   : > { %2335 = vmatpush2.msra.mxu0 %v2260_v54  ;;  %2956 = vmatpush2.msra.mxu1 %v2260_v54  ;;  %v2222_v41 = vmul.f32 0.5, %v2190_v52  ;;  %v2186_v35 = vadd.f32 1.0, %v3226_v25  ;;  %3243 = vtanh.f32 %v4732_v59  ;;  %v2257_v2 = vmul.f32 %v2225_v8, %v5138_v46  ;;  %v5149_v33 = vld [vmem:[#allocation50_spill] sm:$0xff]  ;;  %v5153_v46 = vld [vmem:[#allocation45_spill] sm:$0xff] }
 0x3a1   : > { %2336 = vmatprep.subr.mxu0 %v2259_v5  ;;  %2925 = vmatprep.subr.mxu1 %v2259_v5  ;;  %v2221_v13 = vmul.f32 0.5, %v2189_v49  ;;  %v2185_v29 = vadd.f32 1.0, %v3228_v34  ;;  %v2256_v55 = vmul.f32 %v2224_v63, %v5139_v37  ;;  %v2220_v3 = vmul.f32 0.5, %v2188_v14  ;;  %v5151_v58 = vld [vmem:[#allocation42_spill] sm:$0xff]  ;;  %v4779_v37 = vld [vmem:[%s4944_s10 + $0x18] sm:$0xff] }
 0x3a2   : > { %2337 = vmatpush2.msra.mxu0 %v2258_v16  ;;  %2957 = vmatpush2.msra.mxu1 %v2258_v16  ;;  %v2184_v40 = vadd.f32 1.0, %v3230_v1  ;;  %v3232_v19 = vpop.eup %3231  ;;  %v2255_v31 = vmul.f32 %v2223_v12, %v5140_v20  ;;  %v2219_v18 = vmul.f32 0.5, %v2187_v61  ;;  %v2183_v59 = vadd.f32 1.0, %v5141_v22  ;;  %v5152_v8 = vld [vmem:[#allocation38_spill] sm:$0xff] }
 0x3a3   : > { %2338 = vmatprep.subr.mxu0 %v2257_v2  ;;  %2926 = vmatprep.subr.mxu1 %v2257_v2  ;;  %v2182_v43 = vadd.f32 1.0, %v5142_v6  ;;  %v2254_v23 = vmul.f32 %v2222_v41, %v5143_v47  ;;  %v2218_v11 = vmul.f32 0.5, %v2186_v35  ;;  %v2253_v57 = vmul.f32 %v2221_v13, %v5144_v9  ;;  %v5156_v22 = vld [vmem:[#allocation34_spill] sm:$0xff]  ;;  %v2270_v47 = vld [vmem:[%s4940_s6] sm:$0xff] }
 0x3a4   : > { %2339 = vmatpush2.msra.mxu0 %v2256_v55  ;;  %2958 = vmatpush2.msra.mxu1 %v2256_v55  ;;  %v2217_v28 = vmul.f32 0.5, %v2185_v29  ;;  %v2252_v42 = vmul.f32 %v2220_v3, %v5145_v7  ;;  %v2216_v30 = vmul.f32 0.5, %v2184_v40  ;;  %v2251_v27 = vmul.f32 %v2219_v18, %v5146_v32  ;;  %v4773_v29 = vld [vmem:[%s4944_s10 + $0x10] sm:$0xff]  ;;  %v5155_v40 = vld [vmem:[#allocation29_spill] sm:$0xff]  ;;  %v5157_v6 = vld [vmem:[#allocation30_spill] sm:$0xff] }
 0x3a5   : > { %2340 = vmatprep.subr.mxu0 %v2255_v31  ;;  %2927 = vmatprep.subr.mxu1 %v2255_v31  ;;  %v2215_v62 = vmul.f32 0.5, %v2183_v59  ;;  %v2214_v44 = vmul.f32 0.5, %v2182_v43  ;;  %v2250_v56 = vmul.f32 %v2218_v11, %v5147_v60  ;;  %v2180_v10 = vadd.f32 1.0, %v3232_v19  ;;  %v4803_v11 = vld [vmem:[%s4944_s10 + $0x8] sm:$0xff]  ;;  %v2274_v7 = vld [vmem:[%s4940_s6 + $0x20] sm:$0xff] }
 0x3a6   : > { %2341 = vmatpush2.msra.mxu0 %v2254_v23  ;;  %2959 = vmatpush2.msra.mxu1 %v2254_v23  ;;  %v3234_v45 = vpop.eup %3233  ;;  %v2249_v4 = vmul.f32 %v2217_v28, %v5148_v17  ;;  %v2248_v21 = vmul.f32 %v2216_v30, %v5149_v33  ;;  %v2178_v52 = vadd.f32 1.0, %v5150_v53  ;;  %v3339_v35 = vmov 3   ;;  %v2272_v23 = vld [vmem:[%s4940_s6 + $0x10] sm:$0xff]  ;;  %v2275_v9 = vld [vmem:[%s4940_s6 + $0x28] sm:$0xff]  ;;  %v4813_v28 = vld [vmem:[%s4944_s10] sm:$0xff] }
 0x3a7   : > { %2342 = vmatprep.subr.mxu0 %v2253_v57  ;;  %2928 = vmatprep.subr.mxu1 %v2253_v57  ;;  %v2247_v26 = vmul.f32 %v2215_v62, %v5151_v58  ;;  %v2246_v49 = vmul.f32 %v2214_v44, %v5152_v8  ;;  %v2212_v54 = vmul.f32 0.5, %v2180_v10  ;;  %v2174_v51 = vadd.f32 1.0, %v3234_v45  ;;  %v2288_v45 = vpop.permute.xlu1 %2287  ;;  %v2292_v44 = vpop.permute.xlu0 %2291  ;;  %v3249_v33 = vld [vmem:[%s3499_s12 + $0x30] sm:$0xff] }
 0x3a8   : > { %2343 = vmatpush2.msra.mxu0 %v2252_v42  ;;  %2960 = vmatpush2.msra.mxu1 %v2252_v42  ;;  %v3236_v36 = vpop.eup %3235  ;;  %v2210_v12 = vmul.f32 0.5, %v2178_v52  ;;  %v5158_v57 = vmov 2   ;;  %v5159_v42 = vmov 0.0   ;;  %v3340_v30 = vmov 4  }
 0x3a9   : > { %2344 = vmatprep.subr.mxu0 %v2251_v27  ;;  %2929 = vmatprep.subr.mxu1 %v2251_v27  ;;  %v2176_v14 = vadd.f32 1.0, %v3236_v36  ;;  %v2244_v2 = vmul.f32 %v2212_v54, %v5153_v46  ;;  %v2206_v20 = vmul.f32 0.5, %v2174_v51  ;;  %v3251_v51 = vld [vmem:[%s3499_s12 + $0x18] sm:$0xff] }
 0x3aa   : > { %v3238_v39 = vpop.eup %3237  ;;  %2345 = vmatpush2.msra.mxu0 %v2250_v56  ;;  %2961 = vmatpush2.msra.mxu1 %v2250_v56  ;;  %v2242_v19 = vmul.f32 %v2210_v12, %v5155_v40 }
 0x3ab   : > { %v3240_v25 = vpop.eup %3239  ;;  %2346 = vmatprep.subr.mxu0 %v2249_v4  ;;  %2930 = vmatprep.subr.mxu1 %v2249_v4  ;;  %v2181_v34 = vadd.f32 1.0, %v3238_v39  ;;  %v2208_v13 = vmul.f32 0.5, %v2176_v14  ;;  %v2238_v43 = vmul.f32 %v2206_v20, %v5157_v6  ;;  %v2284_v32 = vpop.permute.xlu1 %2283  ;;  %v3256_v20 = vld [vmem:[%s3499_s12] sm:$0xff] }
 0x3ac   : > { %v3242_v0 = vpop.eup %3241  ;;  %2347 = vmatpush2.msra.mxu0 %v2248_v21  ;;  %2962 = vmatpush2.msra.mxu1 %v2248_v21  ;;  %v2179_v63 = vadd.f32 1.0, %v3240_v25  ;;  %v2405_v17 = vpop.permute.xlu0 %2404  ;;  %v3250_v25 = vld [vmem:[%s3499_s12 + $0x38] sm:$0xff] }
 0x3ad   : > { %v3244_v50 = vpop.eup %3243  ;;  %2348 = vmatprep.subr.mxu0 %v2247_v26  ;;  %2931 = vmatprep.subr.mxu1 %v2247_v26  ;;  %v2213_v1 = vmul.f32 0.5, %v2181_v34  ;;  %v2177_v15 = vadd.f32 1.0, %v3242_v0  ;;  %v2240_v18 = vmul.f32 %v2208_v13, %v5123_v24  ;;  %v2273_v24 = vld [vmem:[%s4940_s6 + $0x18] sm:$0xff] }
 0x3ae   : > { %2349 = vmatpush2.msra.mxu0 %v2246_v49  ;;  %2963 = vmatpush2.msra.mxu1 %v2246_v49  ;;  %v2211_v5 = vmul.f32 0.5, %v2179_v63  ;;  %v2175_v61 = vadd.f32 1.0, %v3244_v50 }
 0x3af   : > { %v2245_v16 = vmul.f32 %v2213_v1, %v5127_v38  ;;  %v2209_v41 = vmul.f32 0.5, %v2177_v15  ;;  %3043 = vset.pattern.permute.xlu1 %v3339_v35  ;;  %3042 = vset.pattern.permute.xlu0 %v3339_v35  ;;  %v5154_v38 = vld [vmem:[#allocation35_spill] sm:$0xff]  ;;  %v2280_v27 = vpop.permute.xlu1 %2279 }
 0x3b0   : > { %2424 = vperm.xlu1 %3043, %v4773_v29   ;;  %2428 = vperm.xlu0 %3042, %v4779_v37   ;;  %v2243_v55 = vmul.f32 %v2211_v5, %v5154_v38  ;;  %v2207_v3 = vmul.f32 0.5, %v2175_v61  ;;  %v3254_v38 = vld [vmem:[%s3499_s12 + $0x8] sm:$0xff] }
 0x3b1   : > { %2350 = vmatprep.subr.mxu0 %v2245_v16  ;;  %2932 = vmatprep.subr.mxu1 %v2245_v16  ;;  %v2241_v31 = vmul.f32 %v2209_v41, %v5130_v48  ;;  %v2276_v48 = vld [vmem:[%s4940_s6 + $0x30] sm:$0xff]  ;;  %v3252_v41 = vld [vmem:[%s3499_s12 + $0x20] sm:$0xff] }
 0x3b2   : > { %2351 = vmatpush2.msra.mxu0 %v2244_v2  ;;  %2964 = vmatpush2.msra.mxu1 %v2244_v2  ;;  %v2239_v59 = vmul.f32 %v2207_v3, %v5156_v22  ;;  %v3253_v2 = vld [vmem:[%s3499_s12 + $0x10] sm:$0xff]  ;;  %v3255_v3 = vld [vmem:[%s3499_s12 + $0x28] sm:$0xff]  ;;  %s430_s12 = scalar_lea.vmem [#allocation2], %s2815_s26  ;;  %s3342_s26 = smov [#allocation2]  }
 0x3b3   : > { %2352 = vmatprep.subr.mxu0 %v2243_v55  ;;  %2933 = vmatprep.subr.mxu1 %v2243_v55  ;;  %v2401_v62 = vpop.permute.xlu1 %2400  ;;  %s2713_s28 = sshll.u32 %s430_s12, 4  ;;  %s3261_s14 = sshll.u32 %s3342_s26, 4  ;;  %s4885_s28 = int_to_ptr.vmem [resolvable:$true] %s2713_s28  ;;  %s3262_s14 = int_to_ptr.vmem [resolvable:$false] %s3261_s14 }
 0x3b4   : > { %2353 = vmatpush2.msra.mxu0 %v2242_v19  ;;  %2965 = vmatpush2.msra.mxu1 %v2242_v19  ;;  %s3257_s16 = scalar_lea.vmem %s4885_s28, 1024  ;;  %s3263_s13 = scalar_lea.vmem %s3262_s14, 2048 }
 0x3b5   : > { %2354 = vmatprep.subr.mxu0 %v2241_v31  ;;  %2934 = vmatprep.subr.mxu1 %v2241_v31  ;;  %p3258_p12 = scmp.ne.s32.totalorder %s4885_s28, %s3257_s16  ;;  %p3264_p1 = scmp.lt.s32.totalorder %s4885_s28, %s3262_s14 }
 0x3b6   : > { %2355 = vmatpush2.msra.mxu0 %v2240_v18  ;;  %2966 = vmatpush2.msra.mxu1 %v2240_v18  ;;  %p3265_p2 = scmp.lt.s32.totalorder %s3263_s13, %s3257_s16 }
 0x3b7   : > { %2356 = vmatprep.subr.mxu0 %v2239_v59  ;;  %2935 = vmatprep.subr.mxu1 %v2239_v59  ;;  %v2397_v36 = vpop.permute.xlu1 %2396  ;;  %p3259_p13 = pnand %p3258_p12, %p3445_p4 }
 0x3b8   : > { %2357 = vmatpush2.msra.mxu0 %v2238_v43  ;;  %2967 = vmatpush2.msra.mxu1 %v2238_v43  ;;  %p3266_p3 = por %p3265_p2, %p3264_p1 }
 0x3b9   : > { %2359 = vmatmul.mubr.f32.vlgmr.msra.gmra.mxu0 %v2270_v47  ;;  %2377 = vmatmul.mubr.f32.vlgmr.msra.gmra.mxu1 %v2276_v48  ;;  %p3260_p0 = pneg %p3259_p13 }
 0x3ba   : > { %2364 = vmatprep.mubr.f32.mxu0 %v2273_v24  ;;  %2420 = vperm.xlu1 %3043, %v4803_v11  }
 0x3bb   : > { %3044 = vset.pattern.permute.xlu0 %v5158_v57  ;;  %p3267_p5 = pnand %p3266_p3, %p3260_p0 }
 0x3bc   : > { %2392 = vperm.xlu0 %3044, %v4813_v28  }
 0x3bd   : > { %2365 = vmatmul.mubr.f32.gmra.mxu0 %v2272_v23 }
 0x3be   : > { %2370 = vmatprep.mubr.f32.mxu0 %v2275_v9  ;;  %2416 = vperm.xlu1 %3043, %v4813_v28  }
 0x3c0   : > { %3045 = vset.pattern.permute.xlu0 %v3340_v30 }
 0x3c1   : > { %2371 = vmatmul.mubr.f32.gmra.mxu0 %v2274_v7  ;;  %2456 = vperm.xlu0 %3045, %v4779_v37  }
 0x3c2   : > { %2535 = vmatprep.mubr.f32.mxu0 %v5159_v42  ;;  %3046 = vset.pattern.permute.xlu1 %v3340_v30 }
 0x3c3   : > { %2452 = vperm.xlu1 %3046, %v4773_v29  }
 0x3c5   : > { %2444 = vperm.xlu0 %3045, %v4813_v28  }
 0x3c7   : > { %2448 = vperm.xlu1 %3046, %v4803_v11  }
 0x42b   : > { %v2425_v0 = vpop.permute.xlu1 %2424  ;;  %v2429_v54 = vpop.permute.xlu0 %2428 }
 0x435   : > { %v2421_v19 = vpop.permute.xlu1 %2420 }
 0x437   : > { %v2393_v6 = vpop.permute.xlu0 %2392 }
 0x439   : > { %v2417_v57 = vpop.permute.xlu1 %2416 }
 0x479   : > { %v2360_v60 = vpop.f32.mrf.mxu0  ;;  %v2378_v56 = vpop.f32.mrf.mxu1 }
 0x47a   : > { %v2379_v10 = vadd.f32 %v2378_v56, %v2292_v44  ;;  %v2361_v12 = vadd.f32 %v2360_v60, %v2280_v27  ;;  %v3341_v60 = vmov 5  }
 0x47b   : > { %v2362_v4 = vpop.f32.mrf.mxu0  ;;  %v2380_v39 = vpop.f32.mrf.mxu1  ;;  %3047 = vset.pattern.permute.xlu1 %v3341_v60  ;;  %3048 = vset.pattern.permute.xlu0 %v3341_v60 }
 0x47c   : > { %v2389_v21 = vadd.f32 %v3249_v33, %v2379_v10  ;;  %v2381_v53 = vadd.f32 %v2380_v39, %v2292_v44  ;;  %v2363_v1 = vadd.f32 %v2362_v4, %v2280_v27  ;;  %v2383_v31 = vadd.f32 %v3256_v20, %v2361_v12  ;;  %v2440_v27 = vld [vmem:[%s4941_s7 + $0x8] sm:$0xff]  ;;  %v2442_v44 = vld [vmem:[%s4941_s7 + $0x18] sm:$0xff]  ;;  %2573 = vperm.xlu1 %3047, %v4813_v28   ;;  %v2453_v39 = vpop.permute.xlu1 %2452  ;;  %v2568_v12 = vld [vmem:[%s4942_s8] sm:$0xff] }
 0x47d   : > { %v2366_v52 = vpop.f32.mrf.mxu0  ;;  %2577 = vperm.xlu0 %3048, %v4803_v11  }
 0x47e   : > { %v2390_v58 = vadd.f32 %v3250_v25, %v2381_v53  ;;  %v2413_v26 = vmul.f32 %v2405_v17, %v2389_v21  ;;  %v2367_v63 = vadd.f32 %v2366_v52, %v2284_v32  ;;  %v2384_v55 = vadd.f32 %v3254_v38, %v2363_v1  ;;  %v2457_v21 = vpop.permute.xlu0 %2456 }
 0x47f   : > { %v2368_v8 = vpop.f32.mrf.mxu0  ;;  %v2407_v23 = vmul.f32 %v2393_v6, %v2383_v31 }
 0x480   : > { %v2369_v49 = vadd.f32 %v2368_v8, %v2284_v32  ;;  %v2414_v34 = vmul.f32 %v2405_v17, %v2390_v58  ;;  %v2437_v50 = vadd.f32 %v2429_v54, %v2413_v26  ;;  %v2385_v13 = vadd.f32 %v3253_v2, %v2367_v63  ;;  %v2439_v32 = vld [vmem:[%s4941_s7] sm:$0xff]  ;;  %2581 = vperm.xlu1 %3047, %v4773_v29   ;;  %v2449_v28 = vpop.permute.xlu1 %2448 }
 0x481   : > { %v2372_v14 = vpop.f32.mrf.mxu0  ;;  %v2408_v48 = vmul.f32 %v2393_v6, %v2384_v55 }
 0x482   : > { %v2373_v15 = vadd.f32 %v2372_v14, %v2288_v45  ;;  %v2438_v5 = vadd.f32 %v2429_v54, %v2414_v34  ;;  %v2386_v16 = vadd.f32 %v3251_v51, %v2369_v49  ;;  %v2409_v43 = vmul.f32 %v2397_v36, %v2385_v13  ;;  %v2445_v29 = vpop.permute.xlu0 %2444  ;;  %v2570_v51 = vld [vmem:[%s4942_s8 + $0x10] sm:$0xff] }
 0x483   : > { %v2374_v61 = vpop.f32.mrf.mxu0  ;;  %v2432_v30 = vadd.f32 %v2417_v57, %v2408_v48 }
 0x484   : > { %v2387_v35 = vadd.f32 %v3252_v41, %v2373_v15  ;;  %v2375_v46 = vadd.f32 %v2374_v61, %v2288_v45  ;;  %2495 = vmatprep.subr.mxu0 %v2438_v5  ;;  %v2410_v22 = vmul.f32 %v2397_v36, %v2386_v16  ;;  %v2433_v7 = vadd.f32 %v2421_v19, %v2409_v43  ;;  %v2569_v61 = vld [vmem:[%s4942_s8 + $0x8] sm:$0xff]  ;;  %v2571_v16 = vld [vmem:[%s4942_s8 + $0x18] sm:$0xff] }
 0x485   : > { %2496 = vmatpush1.msra.mxu0 %v2437_v50  ;;  %v2431_v45 = vadd.f32 %v2417_v57, %v2407_v23  ;;  %2585 = vperm.xlu1 %3047, %v4779_v37  }
 0x486   : > { %v2388_v40 = vadd.f32 %v3255_v3, %v2375_v46  ;;  %v2411_v18 = vmul.f32 %v2401_v62, %v2387_v35  ;;  %v2434_v9 = vadd.f32 %v2421_v19, %v2410_v22 }
 0x488   : > { %v2412_v59 = vmul.f32 %v2401_v62, %v2388_v40  ;;  %v2435_v24 = vadd.f32 %v2425_v0, %v2411_v18  ;;  %v2441_v62 = vld [vmem:[%s4941_s7 + $0x10] sm:$0xff] }
 0x48a   : > { %v2436_v47 = vadd.f32 %v2425_v0, %v2412_v59 }
 0x48c   : > { %2497 = vmatprep.subr.mxu0 %v2436_v47 }
 0x48d   : > { %2498 = vmatpush1.msra.mxu0 %v2435_v24 }
 0x48e   : > { %2499 = vmatprep.subr.mxu0 %v2434_v9 }
 0x48f   : > { %2500 = vmatpush1.msra.mxu0 %v2433_v7 }
 0x490   : > { %2501 = vmatprep.subr.mxu0 %v2432_v30 }
 0x491   : > { %2502 = vmatpush1.msra.mxu0 %v2431_v45 }
 0x492   : > { %2888 = vmatmul.mubr.msk.f32.vlgmr.msra.gmra.mxu0 %vm778_vm1, %v2439_v32 }
 0x493   : > { %2541 = vmatprep.mubr.f32.mxu0 %v5159_v42 }
 0x496   : > { %2889 = vmatmul.mubr.msk.f32.gmra.mxu0 %vm778_vm1, %v2440_v27 }
 0x497   : > { %2547 = vmatprep.mubr.f32.mxu0 %v5159_v42 }
 0x49a   : > { %2890 = vmatmul.mubr.msk.f32.gmra.mxu0 %vm778_vm1, %v2441_v62 }
 0x49b   : > { %2553 = vmatprep.mubr.f32.mxu0 %v5159_v42 }
 0x49e   : > { %2891 = vmatmul.mubr.msk.f32.gmra.mxu0 %vm778_vm1, %v2442_v44 }
 0x49f   : > { %2664 = vmatprep.mubr.f32.mxu0 %v5159_v42 }
 0x4f7   : > { %v2574_v35 = vpop.permute.xlu1 %2573 }
 0x4f8   : > { %v2578_v13 = vpop.permute.xlu0 %2577 }
 0x4fb   : > { %v2582_v40 = vpop.permute.xlu1 %2581 }
 0x500   : > { %v2586_v6 = vpop.permute.xlu1 %2585 }
 0x552   : > { %v2537_v56 = vpop.f32.mrf.mxu0 }
 0x553   : > { %v2538_v14 = vadd.f32 %v2537_v56, %v2445_v29 }
 0x554   : > { %v2539_v10 = vpop.f32.mrf.mxu0 }
 0x555   : > { %v2540_v54 = vadd.f32 %v2539_v10, %v2445_v29  ;;  %v2560_v5 = vmax.f32 %v2538_v14, 0.0 }
 0x556   : > { %v2543_v36 = vpop.f32.mrf.mxu0 }
 0x557   : > { %v2544_v37 = vadd.f32 %v2543_v36, %v2449_v28  ;;  %v2561_v15 = vmax.f32 %v2540_v54, 0.0 }
 0x558   : > { %v2545_v17 = vpop.f32.mrf.mxu0 }
 0x559   : > { %v2546_v49 = vadd.f32 %v2545_v17, %v2449_v28  ;;  %v2562_v1 = vmax.f32 %v2544_v37, 0.0 }
 0x55a   : > { %v2549_v4 = vpop.f32.mrf.mxu0 }
 0x55b   : > { %v2550_v8 = vadd.f32 %v2549_v4, %v2453_v39  ;;  %v2563_v50 = vmax.f32 %v2546_v49, 0.0 }
 0x55c   : > { %v2551_v33 = vpop.f32.mrf.mxu0 }
 0x55d   : > { %v2552_v58 = vadd.f32 %v2551_v33, %v2453_v39  ;;  %v2564_v63 = vmax.f32 %v2550_v8, 0.0 }
 0x55e   : > { %v2555_v53 = vpop.f32.mrf.mxu0 }
 0x55f   : > { %v2556_v52 = vadd.f32 %v2555_v53, %v2457_v21  ;;  %v2565_v0 = vmax.f32 %v2552_v58, 0.0 }
 0x560   : > { %v2557_v25 = vpop.f32.mrf.mxu0 }
 0x561   : > { %v2558_v26 = vadd.f32 %v2557_v25, %v2457_v21  ;;  %v2566_v34 = vmax.f32 %v2556_v52, 0.0 }
 0x563   : > { %v2567_v11 = vmax.f32 %v2558_v26, 0.0 }
 0x565   : > { %2624 = vmatprep.subr.mxu0 %v2567_v11 }
 0x566   : > { %2625 = vmatpush1.msra.mxu0 %v2566_v34 }
 0x567   : > { %2626 = vmatprep.subr.mxu0 %v2565_v0 }
 0x568   : > { %2627 = vmatpush1.msra.mxu0 %v2564_v63 }
 0x569   : > { %2628 = vmatprep.subr.mxu0 %v2563_v50 }
 0x56a   : > { %2629 = vmatpush1.msra.mxu0 %v2562_v1 }
 0x56b   : > { %2630 = vmatprep.subr.mxu0 %v2561_v15 }
 0x56c   : > { %2631 = vmatpush1.msra.mxu0 %v2560_v5 }
 0x56d   : > { %2892 = vmatmul.mubr.msk.f32.vlgmr.msra.gmra.mxu0 %vm778_vm1, %v2568_v12 }
 0x56e   : > { %2670 = vmatprep.mubr.f32.mxu0 %v5159_v42 }
 0x571   : > { %2893 = vmatmul.mubr.msk.f32.gmra.mxu0 %vm778_vm1, %v2569_v61 }
 0x572   : > { %2676 = vmatprep.mubr.f32.mxu0 %v5159_v42 }
 0x575   : > { %2894 = vmatmul.mubr.msk.f32.gmra.mxu0 %vm778_vm1, %v2570_v51 }
 0x576   : > { %2682 = vmatprep.mubr.f32.mxu0 %v5159_v42 }
 0x579   : > { %2895 = vmatmul.mubr.msk.f32.gmra.mxu0 %vm778_vm1, %v2571_v16 }
 0x62d   : > { %v2666_v41 = vpop.f32.mrf.mxu0 }
 0x62e   : > { %v2667_v46 = vadd.f32 %v2666_v41, %v2574_v35 }
 0x62f   : > { %v2668_v2 = vpop.f32.mrf.mxu0 }
 0x630   : > { %v2669_v38 = vadd.f32 %v2668_v2, %v2574_v35  ;;  %2689 = vst [vmem:[%s430_s12] sm:$0xff] %v2667_v46 }
 0x631   : > { %v2672_v55 = vpop.f32.mrf.mxu0 }
 0x632   : > { %2690 = vst [vmem:[%s430_s12 + $0x8] sm:$0xff] %v2669_v38  ;;  %v2673_v42 = vadd.f32 %v2672_v55, %v2578_v13 }
 0x633   : > { %v2674_v3 = vpop.f32.mrf.mxu0 }
 0x634   : > { %v2675_v19 = vadd.f32 %v2674_v3, %v2578_v13  ;;  %2691 = vst [vmem:[%s430_s12 + $0x10] sm:$0xff] %v2673_v42 }
 0x635   : > { %v2678_v20 = vpop.f32.mrf.mxu0 }
 0x636   : > { %v2679_v31 = vadd.f32 %v2678_v20, %v2582_v40  ;;  %2692 = vst [vmem:[%s430_s12 + $0x18] sm:$0xff] %v2675_v19 }
 0x637   : > { %v2680_v18 = vpop.f32.mrf.mxu0 }
 0x638   : > { %2693 = vst [vmem:[%s430_s12 + $0x20] sm:$0xff] %v2679_v31  ;;  %v2681_v22 = vadd.f32 %v2680_v18, %v2582_v40 }
 0x639   : > { %v2684_v59 = vpop.f32.mrf.mxu0 }
 0x63a   : > { %2694 = vst [vmem:[%s430_s12 + $0x28] sm:$0xff] %v2681_v22  ;;  %v2685_v43 = vadd.f32 %v2684_v59, %v2586_v6 }
 0x63b   : > { %v2686_v47 = vpop.f32.mrf.mxu0 }
 0x63c   : > { %2695 = vst [vmem:[%s430_s12 + $0x30] sm:$0xff] %v2685_v43  ;;  %v2687_v48 = vadd.f32 %v2686_v47, %v2586_v6 }
 0x63e   : > { %2696 = vst [vmem:[%s430_s12 + $0x38] sm:$0xff] %v2687_v48 }
 0x63f   : > { %3270 = shalt.err (!%p3267_p5)
}
 0x640   : > { %s3271_s24 = scalar_lea.hbm %s4883_s23, 1024  ;;  %s3275_s26 = scalar_lea.hbm %s4945_s11, 2048 }
 0x641   : > { %p3272_p6 = scmp.ne.s32.totalorder %s4883_s23, %s3271_s24  ;;  %p3276_p10 = scmp.lt.s32.totalorder %s4883_s23, %s4945_s11 }
 0x642   : > { %p3277_p11 = scmp.lt.s32.totalorder %s3275_s26, %s3271_s24 }
 0x643   : > { %p3273_p7 = pnand %p3272_p6, %p3445_p4 }
 0x644   : > { %p3278_p12 = por %p3277_p11, %p3276_p10 }
 0x645   : > { %p3274_p9 = pneg %p3273_p7 }
 0x647   : > { %p3279_p13 = pnand %p3278_p12, %p3274_p9 }
 0x649   : > { %3282 = shalt.err (!%p3279_p13)
}
 0x64a   : > { %s3343_s16 = smov 256   ;;  %s3344_s14 = smov 16  }
 0x64b   : > { %2968 = dma.vmem_to_hbm [thread:$0]  (%p3445_p4), %s4885_s28, 1024, %s4883_s23, %s4889_s20, %s3343_s16, %s3343_s16, %s3344_s14  }
 0x64c PF: > { %p2974_p0 = scmp.ge.s32.totalorder %s3333_s22, 2  ;;  %s2728_s13 = sand.u32 1, %s3313_s17  }
 0x64d   : > { %s2729_s0 = scalar_lea.sflag [#allocation3], %s2728_s13 }
 0x64e   : > { %p2971_p1 = pnand %p2974_p0, %p3452_p8 }
 0x650   : > { %p2972_p2 = pneg %p2971_p1 }
 0x652   : > { %3308 = dma.done.wait (%p2972_p2), %s2729_s0, 1024  }
 0x653   : > { %3310 = vsyncadd (%p2972_p2), %s2729_s0, 4294966272  ;;  %s24_s22 = sadd.s32 1, %s3333_s22   ;;  %s5160_s17 = smov %s3317_s18 }
 0x654   : > { %p21_p3 = scmp.ge.s32.totalorder %s24_s22, 4   ;;  %s5161_s18 = smov %s3321_s19 }
 0x655   : > { %s5162_s19 = smov %s3458_s30  ;;  %s5163_s20 = smov %s3329_s21 }
 0x656   : > { %s5164_s21 = smov %s5166_s25  ;;  %23 = sbr.rel (!%p21_p3) target bundleno = 7 (0x7), region = 102 }
 0x65b   :  { %2734 = vsyncpa [#allocation3], 1 }
 0x65c   :  { %2736 = vsyncpa [#allocation3 + $0x1], 1 }

</bundles_post_ra>
